<compile_context>
chip_gen: v6e
topology: v6e:2x2x1
jax: 0.10.0
libtpu: 0.0.40
codegen_flags: <defaults>
</compile_context>

<pallas_src>
import functools
import math

import numpy as np
import jax
import jax.numpy as jnp
from jax.experimental import pallas as pl
from jax.experimental.pallas import tpu as pltpu

KERNEL_SIZE = 11
SIGMA = 1.5
K1, K2, DATA_RANGE = 0.01, 0.03, 1.0
C1 = (K1 * DATA_RANGE) ** 2
C2 = (K2 * DATA_RANGE) ** 2


def _gaussian_1d(kernel_size=KERNEL_SIZE, sigma=SIGMA):
    # Matches torchmetrics _gaussian(): dist = arange((1-k)/2, (1+k)/2)
    dist = np.arange((1 - kernel_size) / 2.0, (1 + kernel_size) / 2.0, 1.0, dtype=np.float64)
    g = np.exp(-((dist / sigma) ** 2) / 2.0)
    return (g / g.sum()).astype(np.float32)


def _band_matrix(n, g):
    """(n, n-k+1) matrix M with M[j+a, j] = g[a]; x @ M == valid 1-D correlation."""
    k = g.shape[0]
    nv = n - k + 1
    m = np.zeros((n, nv), dtype=np.float32)
    for j in range(nv):
        m[j:j + k, j] = g
    return m


def _ssim_kernel(x_ref, y_ref, aw_ref, mask_ref, out_ref, *, bh_out, gvals):
    x = x_ref[...]              # (B*H, W) f32 -- B images stacked along the sublane axis
    y = y_ref[...]
    aw = aw_ref[...]            # (W, Wv) band matrix: lane-direction valid conv (MXU)
    mask = mask_ref[...]        # (B*H - K + 1, 1): 1.0 where the 11-row window stays
                                # inside a single image, 0.0 on cross-image rows

    def sep_conv(z):
        # Lane (W) direction on the MXU: one big matmul with M = B*H.
        t = jnp.dot(z, aw, preferred_element_type=jnp.float32)        # (B*H, Wv)
        # Sublane (H) direction as 11 shifted FMAs on the VPU.
        acc = t[0:bh_out, :] * gvals[0]
        for a in range(1, len(gvals)):
            acc = acc + t[a:a + bh_out, :] * gvals[a]
        return acc                                                     # (B*H - K + 1, Wv)

    mu1 = sep_conv(x)
    mu2 = sep_conv(y)
    s11 = sep_conv(x * x)
    s22 = sep_conv(y * y)
    s12 = sep_conv(x * y)

    mu1_sq = mu1 * mu1
    mu2_sq = mu2 * mu2
    mu12 = mu1 * mu2
    sigma1 = s11 - mu1_sq
    sigma2 = s22 - mu2_sq
    sigma12 = s12 - mu12

    num = (2.0 * mu12 + C1) * (2.0 * sigma12 + C2)
    den = (mu1_sq + mu2_sq + C1) * (sigma1 + sigma2 + C2)
    ssim_map = (num / den) * mask   # zero rows whose window crosses an image boundary

    # Per-block partial sum; final mean and (1 - x) happen outside the kernel so the
    # grid axis can be fully parallel (and the reduction stays accurate in f32).
    out_ref[0] = jnp.sum(ssim_map, keepdims=True)


def _pick_batch(nc, h, w, budget_bytes):
    """Images per grid step: largest divisor of nc that (a) keeps the f32 working set
    within the VMEM budget, (b) keeps the (B*H, W) block sublane-aligned (B*H % 8 == 0
    unless B == nc), and (c) leaves >= 2 grid blocks for megacore when possible."""
    per_img = 24 * h * w * 4                       # rough live-f32 working set per image
    cap = max(1, min(budget_bytes // per_img, 32))
    need = 8 // math.gcd(h, 8)                     # alignment requirement on B
    good = [b for b in range(1, nc) if nc % b == 0 and b % need == 0 and b <= cap]
    if good:
        return max(good)
    return nc                                      # single block: block dims == array dims


def ssim_loss(img1, img2):
    """1 - SSIM(img1, img2); inputs NCHW, float32, data_range=1.0."""
    n, c, h, w = img1.shape
    assert h >= KERNEL_SIZE and w >= KERNEL_SIZE
    nc = n * c
    hv = h - KERNEL_SIZE + 1
    wv = w - KERNEL_SIZE + 1
    g = _gaussian_1d()
    aw = jnp.asarray(_band_matrix(w, g))           # (W, Wv)

    # Generation-aware VMEM budget (default scoped limits are only 16/32 MiB).
    try:
        vmem_cap = int(pltpu.get_tpu_info().vmem_capacity_bytes)
    except Exception:
        vmem_cap = 64 * 1024 * 1024
    vmem_limit = int(min(vmem_cap * 0.8, 100 * 1024 * 1024))

    b = _pick_batch(nc, h, w, vmem_limit // 2)
    num_blocks = nc // b
    bh = b * h
    bh_out = bh - KERNEL_SIZE + 1

    x = img1.reshape(nc * h, w).astype(jnp.float32)
    y = img2.reshape(nc * h, w).astype(jnp.float32)

    # Row-validity mask for the merged (B*H) axis (identical for every block since
    # each block starts on an image boundary).
    rows = np.arange(bh_out)
    mask = jnp.asarray(((rows % h) < hv).astype(np.float32).reshape(bh_out, 1))

    kernel = functools.partial(_ssim_kernel, bh_out=bh_out,
                               gvals=tuple(float(v) for v in g))

    # TODO(synk): for very large images (H, W >= ~1024) row-chunk the SSIM map inside
    # the kernel to stay under v7x's 64 MiB VMEM.
    partial_sums = pl.pallas_call(
        kernel,
        out_shape=jax.ShapeDtypeStruct((num_blocks, 1, 1), jnp.float32),
        grid_spec=pltpu.PrefetchScalarGridSpec(
            num_scalar_prefetch=0,
            grid=(num_blocks,),
            in_specs=[
                pl.BlockSpec((bh, w), lambda i: (i, 0)),
                pl.BlockSpec((bh, w), lambda i: (i, 0)),
                pl.BlockSpec((w, wv), lambda i: (0, 0)),
                pl.BlockSpec((bh_out, 1), lambda i: (0, 0)),
            ],
            out_specs=pl.BlockSpec((1, 1, 1), lambda i: (i, 0, 0)),
        ),
        compiler_params=pltpu.CompilerParams(
            dimension_semantics=("parallel",),
            vmem_limit_bytes=vmem_limit,
        ),
    )(x, y, aw, mask)

    inv_total = 1.0 / float(nc * hv * wv)
    return 1.0 - jnp.sum(partial_sums) * inv_total


def ssim_loss_ref(img1, img2):
    """Pure-JAX reference (same math, no Pallas) for correctness checking."""
    n, c, h, w = img1.shape
    g = _gaussian_1d()
    bht = jnp.asarray(_band_matrix(h, g).T)
    aw = jnp.asarray(_band_matrix(w, g))
    x = img1.reshape(n * c, h, w).astype(jnp.float32)
    y = img2.reshape(n * c, h, w).astype(jnp.float32)

    def conv(z):
        return jnp.einsum("vh,nhw,wu->nvu", bht, z, aw)

    mu1, mu2 = conv(x), conv(y)
    s11, s22, s12 = conv(x * x), conv(y * y), conv(x * y)
    sigma1, sigma2, sigma12 = s11 - mu1 * mu1, s22 - mu2 * mu2, s12 - mu1 * mu2
    ssim_map = ((2 * mu1 * mu2 + C1) * (2 * sigma12 + C2)) / (
        (mu1 * mu1 + mu2 * mu2 + C1) * (sigma1 + sigma2 + C2))
    return 1.0 - jnp.mean(ssim_map)


if __name__ == "__main__":
    key = jax.random.PRNGKey(0)
    k1, k2 = jax.random.split(key)
    img1 = jax.random.uniform(k1, (2, 4, 16, 16), dtype=jnp.float32)
    img2 = jax.random.uniform(k2, (2, 4, 16, 16), dtype=jnp.float32)

    loss = jax.block_until_ready(ssim_loss(img1, img2))
    ref = ssim_loss_ref(img1, img2)
    assert np.allclose(np.asarray(loss), np.asarray(ref), rtol=1e-5, atol=1e-5), (loss, ref)
    print("KERNEL_OK")
</pallas_src>

<mosaic_0001>
module attributes {stable_mosaic.version = 11 : i64} {
  func.func @_ssim_kernel(%arg0: i32, %arg1: memref<64x16xf32, #tpu.memory_space<vmem>>, %arg2: memref<64x16xf32, #tpu.memory_space<vmem>>, %arg3: memref<16x6xf32, #tpu.memory_space<vmem>>, %arg4: memref<54x1xf32, #tpu.memory_space<vmem>>, %arg5: memref<1x1x1xf32, #tpu.memory_space<vmem>>) attributes {dimension_semantics = [#tpu.dimension_semantics<parallel>], iteration_bounds = array<i64: 2>, scalar_prefetch = 0 : i64, scratch_operands = 0 : i64, tpu.core_type = #tpu.core_type<tc>, window_params = [{transform_indices = @transform_0, window_bounds = array<i64: 64, 16>}, {transform_indices = @transform_1, window_bounds = array<i64: 64, 16>}, {pipeline_mode = #tpu.pipeline_mode<synchronous>, transform_indices = @transform_2, window_bounds = array<i64: 16, 6>}, {pipeline_mode = #tpu.pipeline_mode<synchronous>, transform_indices = @transform_3, window_bounds = array<i64: 54, 1>}, {transform_indices = @transform_4, window_bounds = array<i64: 1, 1, 1>}]} {
    %c0 = arith.constant 0 : index
    %c0_0 = arith.constant 0 : index
    %0 = vector.load %arg1[%c0, %c0_0] : memref<64x16xf32, #tpu.memory_space<vmem>>, vector<64x16xf32>
    %c0_1 = arith.constant 0 : index
    %c0_2 = arith.constant 0 : index
    %1 = vector.load %arg2[%c0_1, %c0_2] : memref<64x16xf32, #tpu.memory_space<vmem>>, vector<64x16xf32>
    %c0_3 = arith.constant 0 : index
    %c0_4 = arith.constant 0 : index
    %2 = vector.load %arg3[%c0_3, %c0_4] : memref<16x6xf32, #tpu.memory_space<vmem>>, vector<16x6xf32>
    %c0_5 = arith.constant 0 : index
    %c0_6 = arith.constant 0 : index
    %3 = vector.load %arg4[%c0_5, %c0_6] : memref<54x1xf32, #tpu.memory_space<vmem>>, vector<54x1xf32>
    %cst = arith.constant dense<0.000000e+00> : vector<64x6xf32>
    %4 = tpu.matmul %0, %2, %cst {dimension_numbers = #tpu.dot_dimension_numbers<[1], [0], [0], [1], [0, 0, 1, 1], [], []>} : vector<64x16xf32>, vector<16x6xf32>, vector<64x6xf32> -> vector<64x6xf32>
    %5 = vector.extract_strided_slice %4 {offsets = [0, 0], sizes = [54, 6], strides = [1, 1]} : vector<64x6xf32> to vector<54x6xf32>
    %cst_7 = arith.constant 0.00102838012 : f32
    %6 = vector.broadcast %cst_7 : f32 to vector<54x6xf32>
    %7 = arith.mulf %5, %6 : vector<54x6xf32>
    %8 = vector.extract_strided_slice %4 {offsets = [1, 0], sizes = [54, 6], strides = [1, 1]} : vector<64x6xf32> to vector<54x6xf32>
    %cst_8 = arith.constant 0.00759875821 : f32
    %9 = vector.broadcast %cst_8 : f32 to vector<54x6xf32>
    %10 = arith.mulf %8, %9 : vector<54x6xf32>
    %11 = arith.addf %7, %10 : vector<54x6xf32>
    %12 = vector.extract_strided_slice %4 {offsets = [2, 0], sizes = [54, 6], strides = [1, 1]} : vector<64x6xf32> to vector<54x6xf32>
    %cst_9 = arith.constant 0.0360007733 : f32
    %13 = vector.broadcast %cst_9 : f32 to vector<54x6xf32>
    %14 = arith.mulf %12, %13 : vector<54x6xf32>
    %15 = arith.addf %11, %14 : vector<54x6xf32>
    %16 = vector.extract_strided_slice %4 {offsets = [3, 0], sizes = [54, 6], strides = [1, 1]} : vector<64x6xf32> to vector<54x6xf32>
    %cst_10 = arith.constant 0.109360687 : f32
    %17 = vector.broadcast %cst_10 : f32 to vector<54x6xf32>
    %18 = arith.mulf %16, %17 : vector<54x6xf32>
    %19 = arith.addf %15, %18 : vector<54x6xf32>
    %20 = vector.extract_strided_slice %4 {offsets = [4, 0], sizes = [54, 6], strides = [1, 1]} : vector<64x6xf32> to vector<54x6xf32>
    %cst_11 = arith.constant 0.213005543 : f32
    %21 = vector.broadcast %cst_11 : f32 to vector<54x6xf32>
    %22 = arith.mulf %20, %21 : vector<54x6xf32>
    %23 = arith.addf %19, %22 : vector<54x6xf32>
    %24 = vector.extract_strided_slice %4 {offsets = [5, 0], sizes = [54, 6], strides = [1, 1]} : vector<64x6xf32> to vector<54x6xf32>
    %cst_12 = arith.constant 0.266011715 : f32
    %25 = vector.broadcast %cst_12 : f32 to vector<54x6xf32>
    %26 = arith.mulf %24, %25 : vector<54x6xf32>
    %27 = arith.addf %23, %26 : vector<54x6xf32>
    %28 = vector.extract_strided_slice %4 {offsets = [6, 0], sizes = [54, 6], strides = [1, 1]} : vector<64x6xf32> to vector<54x6xf32>
    %cst_13 = arith.constant 0.213005543 : f32
    %29 = vector.broadcast %cst_13 : f32 to vector<54x6xf32>
    %30 = arith.mulf %28, %29 : vector<54x6xf32>
    %31 = arith.addf %27, %30 : vector<54x6xf32>
    %32 = vector.extract_strided_slice %4 {offsets = [7, 0], sizes = [54, 6], strides = [1, 1]} : vector<64x6xf32> to vector<54x6xf32>
    %cst_14 = arith.constant 0.109360687 : f32
    %33 = vector.broadcast %cst_14 : f32 to vector<54x6xf32>
    %34 = arith.mulf %32, %33 : vector<54x6xf32>
    %35 = arith.addf %31, %34 : vector<54x6xf32>
    %36 = vector.extract_strided_slice %4 {offsets = [8, 0], sizes = [54, 6], strides = [1, 1]} : vector<64x6xf32> to vector<54x6xf32>
    %cst_15 = arith.constant 0.0360007733 : f32
    %37 = vector.broadcast %cst_15 : f32 to vector<54x6xf32>
    %38 = arith.mulf %36, %37 : vector<54x6xf32>
    %39 = arith.addf %35, %38 : vector<54x6xf32>
    %40 = vector.extract_strided_slice %4 {offsets = [9, 0], sizes = [54, 6], strides = [1, 1]} : vector<64x6xf32> to vector<54x6xf32>
    %cst_16 = arith.constant 0.00759875821 : f32
    %41 = vector.broadcast %cst_16 : f32 to vector<54x6xf32>
    %42 = arith.mulf %40, %41 : vector<54x6xf32>
    %43 = arith.addf %39, %42 : vector<54x6xf32>
    %44 = vector.extract_strided_slice %4 {offsets = [10, 0], sizes = [54, 6], strides = [1, 1]} : vector<64x6xf32> to vector<54x6xf32>
    %cst_17 = arith.constant 0.00102838012 : f32
    %45 = vector.broadcast %cst_17 : f32 to vector<54x6xf32>
    %46 = arith.mulf %44, %45 : vector<54x6xf32>
    %47 = arith.addf %43, %46 : vector<54x6xf32>
    %cst_18 = arith.constant dense<0.000000e+00> : vector<64x6xf32>
    %48 = tpu.matmul %1, %2, %cst_18 {dimension_numbers = #tpu.dot_dimension_numbers<[1], [0], [0], [1], [0, 0, 1, 1], [], []>} : vector<64x16xf32>, vector<16x6xf32>, vector<64x6xf32> -> vector<64x6xf32>
    %49 = vector.extract_strided_slice %48 {offsets = [0, 0], sizes = [54, 6], strides = [1, 1]} : vector<64x6xf32> to vector<54x6xf32>
    %cst_19 = arith.constant 0.00102838012 : f32
    %50 = vector.broadcast %cst_19 : f32 to vector<54x6xf32>
    %51 = arith.mulf %49, %50 : vector<54x6xf32>
    %52 = vector.extract_strided_slice %48 {offsets = [1, 0], sizes = [54, 6], strides = [1, 1]} : vector<64x6xf32> to vector<54x6xf32>
    %cst_20 = arith.constant 0.00759875821 : f32
    %53 = vector.broadcast %cst_20 : f32 to vector<54x6xf32>
    %54 = arith.mulf %52, %53 : vector<54x6xf32>
    %55 = arith.addf %51, %54 : vector<54x6xf32>
    %56 = vector.extract_strided_slice %48 {offsets = [2, 0], sizes = [54, 6], strides = [1, 1]} : vector<64x6xf32> to vector<54x6xf32>
    %cst_21 = arith.constant 0.0360007733 : f32
    %57 = vector.broadcast %cst_21 : f32 to vector<54x6xf32>
    %58 = arith.mulf %56, %57 : vector<54x6xf32>
    %59 = arith.addf %55, %58 : vector<54x6xf32>
    %60 = vector.extract_strided_slice %48 {offsets = [3, 0], sizes = [54, 6], strides = [1, 1]} : vector<64x6xf32> to vector<54x6xf32>
    %cst_22 = arith.constant 0.109360687 : f32
    %61 = vector.broadcast %cst_22 : f32 to vector<54x6xf32>
    %62 = arith.mulf %60, %61 : vector<54x6xf32>
    %63 = arith.addf %59, %62 : vector<54x6xf32>
    %64 = vector.extract_strided_slice %48 {offsets = [4, 0], sizes = [54, 6], strides = [1, 1]} : vector<64x6xf32> to vector<54x6xf32>
    %cst_23 = arith.constant 0.213005543 : f32
    %65 = vector.broadcast %cst_23 : f32 to vector<54x6xf32>
    %66 = arith.mulf %64, %65 : vector<54x6xf32>
    %67 = arith.addf %63, %66 : vector<54x6xf32>
    %68 = vector.extract_strided_slice %48 {offsets = [5, 0], sizes = [54, 6], strides = [1, 1]} : vector<64x6xf32> to vector<54x6xf32>
    %cst_24 = arith.constant 0.266011715 : f32
    %69 = vector.broadcast %cst_24 : f32 to vector<54x6xf32>
    %70 = arith.mulf %68, %69 : vector<54x6xf32>
    %71 = arith.addf %67, %70 : vector<54x6xf32>
    %72 = vector.extract_strided_slice %48 {offsets = [6, 0], sizes = [54, 6], strides = [1, 1]} : vector<64x6xf32> to vector<54x6xf32>
    %cst_25 = arith.constant 0.213005543 : f32
    %73 = vector.broadcast %cst_25 : f32 to vector<54x6xf32>
    %74 = arith.mulf %72, %73 : vector<54x6xf32>
    %75 = arith.addf %71, %74 : vector<54x6xf32>
    %76 = vector.extract_strided_slice %48 {offsets = [7, 0], sizes = [54, 6], strides = [1, 1]} : vector<64x6xf32> to vector<54x6xf32>
    %cst_26 = arith.constant 0.109360687 : f32
    %77 = vector.broadcast %cst_26 : f32 to vector<54x6xf32>
    %78 = arith.mulf %76, %77 : vector<54x6xf32>
    %79 = arith.addf %75, %78 : vector<54x6xf32>
    %80 = vector.extract_strided_slice %48 {offsets = [8, 0], sizes = [54, 6], strides = [1, 1]} : vector<64x6xf32> to vector<54x6xf32>
    %cst_27 = arith.constant 0.0360007733 : f32
    %81 = vector.broadcast %cst_27 : f32 to vector<54x6xf32>
    %82 = arith.mulf %80, %81 : vector<54x6xf32>
    %83 = arith.addf %79, %82 : vector<54x6xf32>
    %84 = vector.extract_strided_slice %48 {offsets = [9, 0], sizes = [54, 6], strides = [1, 1]} : vector<64x6xf32> to vector<54x6xf32>
    %cst_28 = arith.constant 0.00759875821 : f32
    %85 = vector.broadcast %cst_28 : f32 to vector<54x6xf32>
    %86 = arith.mulf %84, %85 : vector<54x6xf32>
    %87 = arith.addf %83, %86 : vector<54x6xf32>
    %88 = vector.extract_strided_slice %48 {offsets = [10, 0], sizes = [54, 6], strides = [1, 1]} : vector<64x6xf32> to vector<54x6xf32>
    %cst_29 = arith.constant 0.00102838012 : f32
    %89 = vector.broadcast %cst_29 : f32 to vector<54x6xf32>
    %90 = arith.mulf %88, %89 : vector<54x6xf32>
    %91 = arith.addf %87, %90 : vector<54x6xf32>
    %92 = arith.mulf %0, %0 : vector<64x16xf32>
    %cst_30 = arith.constant dense<0.000000e+00> : vector<64x6xf32>
    %93 = tpu.matmul %92, %2, %cst_30 {dimension_numbers = #tpu.dot_dimension_numbers<[1], [0], [0], [1], [0, 0, 1, 1], [], []>} : vector<64x16xf32>, vector<16x6xf32>, vector<64x6xf32> -> vector<64x6xf32>
    %94 = vector.extract_strided_slice %93 {offsets = [0, 0], sizes = [54, 6], strides = [1, 1]} : vector<64x6xf32> to vector<54x6xf32>
    %cst_31 = arith.constant 0.00102838012 : f32
    %95 = vector.broadcast %cst_31 : f32 to vector<54x6xf32>
    %96 = arith.mulf %94, %95 : vector<54x6xf32>
    %97 = vector.extract_strided_slice %93 {offsets = [1, 0], sizes = [54, 6], strides = [1, 1]} : vector<64x6xf32> to vector<54x6xf32>
    %cst_32 = arith.constant 0.00759875821 : f32
    %98 = vector.broadcast %cst_32 : f32 to vector<54x6xf32>
    %99 = arith.mulf %97, %98 : vector<54x6xf32>
    %100 = arith.addf %96, %99 : vector<54x6xf32>
    %101 = vector.extract_strided_slice %93 {offsets = [2, 0], sizes = [54, 6], strides = [1, 1]} : vector<64x6xf32> to vector<54x6xf32>
    %cst_33 = arith.constant 0.0360007733 : f32
    %102 = vector.broadcast %cst_33 : f32 to vector<54x6xf32>
    %103 = arith.mulf %101, %102 : vector<54x6xf32>
    %104 = arith.addf %100, %103 : vector<54x6xf32>
    %105 = vector.extract_strided_slice %93 {offsets = [3, 0], sizes = [54, 6], strides = [1, 1]} : vector<64x6xf32> to vector<54x6xf32>
    %cst_34 = arith.constant 0.109360687 : f32
    %106 = vector.broadcast %cst_34 : f32 to vector<54x6xf32>
    %107 = arith.mulf %105, %106 : vector<54x6xf32>
    %108 = arith.addf %104, %107 : vector<54x6xf32>
    %109 = vector.extract_strided_slice %93 {offsets = [4, 0], sizes = [54, 6], strides = [1, 1]} : vector<64x6xf32> to vector<54x6xf32>
    %cst_35 = arith.constant 0.213005543 : f32
    %110 = vector.broadcast %cst_35 : f32 to vector<54x6xf32>
    %111 = arith.mulf %109, %110 : vector<54x6xf32>
    %112 = arith.addf %108, %111 : vector<54x6xf32>
    %113 = vector.extract_strided_slice %93 {offsets = [5, 0], sizes = [54, 6], strides = [1, 1]} : vector<64x6xf32> to vector<54x6xf32>
    %cst_36 = arith.constant 0.266011715 : f32
    %114 = vector.broadcast %cst_36 : f32 to vector<54x6xf32>
    %115 = arith.mulf %113, %114 : vector<54x6xf32>
    %116 = arith.addf %112, %115 : vector<54x6xf32>
    %117 = vector.extract_strided_slice %93 {offsets = [6, 0], sizes = [54, 6], strides = [1, 1]} : vector<64x6xf32> to vector<54x6xf32>
    %cst_37 = arith.constant 0.213005543 : f32
    %118 = vector.broadcast %cst_37 : f32 to vector<54x6xf32>
    %119 = arith.mulf %117, %118 : vector<54x6xf32>
    %120 = arith.addf %116, %119 : vector<54x6xf32>
    %121 = vector.extract_strided_slice %93 {offsets = [7, 0], sizes = [54, 6], strides = [1, 1]} : vector<64x6xf32> to vector<54x6xf32>
    %cst_38 = arith.constant 0.109360687 : f32
    %122 = vector.broadcast %cst_38 : f32 to vector<54x6xf32>
    %123 = arith.mulf %121, %122 : vector<54x6xf32>
    %124 = arith.addf %120, %123 : vector<54x6xf32>
    %125 = vector.extract_strided_slice %93 {offsets = [8, 0], sizes = [54, 6], strides = [1, 1]} : vector<64x6xf32> to vector<54x6xf32>
    %cst_39 = arith.constant 0.0360007733 : f32
    %126 = vector.broadcast %cst_39 : f32 to vector<54x6xf32>
    %127 = arith.mulf %125, %126 : vector<54x6xf32>
    %128 = arith.addf %124, %127 : vector<54x6xf32>
    %129 = vector.extract_strided_slice %93 {offsets = [9, 0], sizes = [54, 6], strides = [1, 1]} : vector<64x6xf32> to vector<54x6xf32>
    %cst_40 = arith.constant 0.00759875821 : f32
    %130 = vector.broadcast %cst_40 : f32 to vector<54x6xf32>
    %131 = arith.mulf %129, %130 : vector<54x6xf32>
    %132 = arith.addf %128, %131 : vector<54x6xf32>
    %133 = vector.extract_strided_slice %93 {offsets = [10, 0], sizes = [54, 6], strides = [1, 1]} : vector<64x6xf32> to vector<54x6xf32>
    %cst_41 = arith.constant 0.00102838012 : f32
    %134 = vector.broadcast %cst_41 : f32 to vector<54x6xf32>
    %135 = arith.mulf %133, %134 : vector<54x6xf32>
    %136 = arith.addf %132, %135 : vector<54x6xf32>
    %137 = arith.mulf %1, %1 : vector<64x16xf32>
    %cst_42 = arith.constant dense<0.000000e+00> : vector<64x6xf32>
    %138 = tpu.matmul %137, %2, %cst_42 {dimension_numbers = #tpu.dot_dimension_numbers<[1], [0], [0], [1], [0, 0, 1, 1], [], []>} : vector<64x16xf32>, vector<16x6xf32>, vector<64x6xf32> -> vector<64x6xf32>
    %139 = vector.extract_strided_slice %138 {offsets = [0, 0], sizes = [54, 6], strides = [1, 1]} : vector<64x6xf32> to vector<54x6xf32>
    %cst_43 = arith.constant 0.00102838012 : f32
    %140 = vector.broadcast %cst_43 : f32 to vector<54x6xf32>
    %141 = arith.mulf %139, %140 : vector<54x6xf32>
    %142 = vector.extract_strided_slice %138 {offsets = [1, 0], sizes = [54, 6], strides = [1, 1]} : vector<64x6xf32> to vector<54x6xf32>
    %cst_44 = arith.constant 0.00759875821 : f32
    %143 = vector.broadcast %cst_44 : f32 to vector<54x6xf32>
    %144 = arith.mulf %142, %143 : vector<54x6xf32>
    %145 = arith.addf %141, %144 : vector<54x6xf32>
    %146 = vector.extract_strided_slice %138 {offsets = [2, 0], sizes = [54, 6], strides = [1, 1]} : vector<64x6xf32> to vector<54x6xf32>
    %cst_45 = arith.constant 0.0360007733 : f32
    %147 = vector.broadcast %cst_45 : f32 to vector<54x6xf32>
    %148 = arith.mulf %146, %147 : vector<54x6xf32>
    %149 = arith.addf %145, %148 : vector<54x6xf32>
    %150 = vector.extract_strided_slice %138 {offsets = [3, 0], sizes = [54, 6], strides = [1, 1]} : vector<64x6xf32> to vector<54x6xf32>
    %cst_46 = arith.constant 0.109360687 : f32
    %151 = vector.broadcast %cst_46 : f32 to vector<54x6xf32>
    %152 = arith.mulf %150, %151 : vector<54x6xf32>
    %153 = arith.addf %149, %152 : vector<54x6xf32>
    %154 = vector.extract_strided_slice %138 {offsets = [4, 0], sizes = [54, 6], strides = [1, 1]} : vector<64x6xf32> to vector<54x6xf32>
    %cst_47 = arith.constant 0.213005543 : f32
    %155 = vector.broadcast %cst_47 : f32 to vector<54x6xf32>
    %156 = arith.mulf %154, %155 : vector<54x6xf32>
    %157 = arith.addf %153, %156 : vector<54x6xf32>
    %158 = vector.extract_strided_slice %138 {offsets = [5, 0], sizes = [54, 6], strides = [1, 1]} : vector<64x6xf32> to vector<54x6xf32>
    %cst_48 = arith.constant 0.266011715 : f32
    %159 = vector.broadcast %cst_48 : f32 to vector<54x6xf32>
    %160 = arith.mulf %158, %159 : vector<54x6xf32>
    %161 = arith.addf %157, %160 : vector<54x6xf32>
    %162 = vector.extract_strided_slice %138 {offsets = [6, 0], sizes = [54, 6], strides = [1, 1]} : vector<64x6xf32> to vector<54x6xf32>
    %cst_49 = arith.constant 0.213005543 : f32
    %163 = vector.broadcast %cst_49 : f32 to vector<54x6xf32>
    %164 = arith.mulf %162, %163 : vector<54x6xf32>
    %165 = arith.addf %161, %164 : vector<54x6xf32>
    %166 = vector.extract_strided_slice %138 {offsets = [7, 0], sizes = [54, 6], strides = [1, 1]} : vector<64x6xf32> to vector<54x6xf32>
    %cst_50 = arith.constant 0.109360687 : f32
    %167 = vector.broadcast %cst_50 : f32 to vector<54x6xf32>
    %168 = arith.mulf %166, %167 : vector<54x6xf32>
    %169 = arith.addf %165, %168 : vector<54x6xf32>
    %170 = vector.extract_strided_slice %138 {offsets = [8, 0], sizes = [54, 6], strides = [1, 1]} : vector<64x6xf32> to vector<54x6xf32>
    %cst_51 = arith.constant 0.0360007733 : f32
    %171 = vector.broadcast %cst_51 : f32 to vector<54x6xf32>
    %172 = arith.mulf %170, %171 : vector<54x6xf32>
    %173 = arith.addf %169, %172 : vector<54x6xf32>
    %174 = vector.extract_strided_slice %138 {offsets = [9, 0], sizes = [54, 6], strides = [1, 1]} : vector<64x6xf32> to vector<54x6xf32>
    %cst_52 = arith.constant 0.00759875821 : f32
    %175 = vector.broadcast %cst_52 : f32 to vector<54x6xf32>
    %176 = arith.mulf %174, %175 : vector<54x6xf32>
    %177 = arith.addf %173, %176 : vector<54x6xf32>
    %178 = vector.extract_strided_slice %138 {offsets = [10, 0], sizes = [54, 6], strides = [1, 1]} : vector<64x6xf32> to vector<54x6xf32>
    %cst_53 = arith.constant 0.00102838012 : f32
    %179 = vector.broadcast %cst_53 : f32 to vector<54x6xf32>
    %180 = arith.mulf %178, %179 : vector<54x6xf32>
    %181 = arith.addf %177, %180 : vector<54x6xf32>
    %182 = arith.mulf %0, %1 : vector<64x16xf32>
    %cst_54 = arith.constant dense<0.000000e+00> : vector<64x6xf32>
    %183 = tpu.matmul %182, %2, %cst_54 {dimension_numbers = #tpu.dot_dimension_numbers<[1], [0], [0], [1], [0, 0, 1, 1], [], []>} : vector<64x16xf32>, vector<16x6xf32>, vector<64x6xf32> -> vector<64x6xf32>
    %184 = vector.extract_strided_slice %183 {offsets = [0, 0], sizes = [54, 6], strides = [1, 1]} : vector<64x6xf32> to vector<54x6xf32>
    %cst_55 = arith.constant 0.00102838012 : f32
    %185 = vector.broadcast %cst_55 : f32 to vector<54x6xf32>
    %186 = arith.mulf %184, %185 : vector<54x6xf32>
    %187 = vector.extract_strided_slice %183 {offsets = [1, 0], sizes = [54, 6], strides = [1, 1]} : vector<64x6xf32> to vector<54x6xf32>
    %cst_56 = arith.constant 0.00759875821 : f32
    %188 = vector.broadcast %cst_56 : f32 to vector<54x6xf32>
    %189 = arith.mulf %187, %188 : vector<54x6xf32>
    %190 = arith.addf %186, %189 : vector<54x6xf32>
    %191 = vector.extract_strided_slice %183 {offsets = [2, 0], sizes = [54, 6], strides = [1, 1]} : vector<64x6xf32> to vector<54x6xf32>
    %cst_57 = arith.constant 0.0360007733 : f32
    %192 = vector.broadcast %cst_57 : f32 to vector<54x6xf32>
    %193 = arith.mulf %191, %192 : vector<54x6xf32>
    %194 = arith.addf %190, %193 : vector<54x6xf32>
    %195 = vector.extract_strided_slice %183 {offsets = [3, 0], sizes = [54, 6], strides = [1, 1]} : vector<64x6xf32> to vector<54x6xf32>
    %cst_58 = arith.constant 0.109360687 : f32
    %196 = vector.broadcast %cst_58 : f32 to vector<54x6xf32>
    %197 = arith.mulf %195, %196 : vector<54x6xf32>
    %198 = arith.addf %194, %197 : vector<54x6xf32>
    %199 = vector.extract_strided_slice %183 {offsets = [4, 0], sizes = [54, 6], strides = [1, 1]} : vector<64x6xf32> to vector<54x6xf32>
    %cst_59 = arith.constant 0.213005543 : f32
    %200 = vector.broadcast %cst_59 : f32 to vector<54x6xf32>
    %201 = arith.mulf %199, %200 : vector<54x6xf32>
    %202 = arith.addf %198, %201 : vector<54x6xf32>
    %203 = vector.extract_strided_slice %183 {offsets = [5, 0], sizes = [54, 6], strides = [1, 1]} : vector<64x6xf32> to vector<54x6xf32>
    %cst_60 = arith.constant 0.266011715 : f32
    %204 = vector.broadcast %cst_60 : f32 to vector<54x6xf32>
    %205 = arith.mulf %203, %204 : vector<54x6xf32>
    %206 = arith.addf %202, %205 : vector<54x6xf32>
    %207 = vector.extract_strided_slice %183 {offsets = [6, 0], sizes = [54, 6], strides = [1, 1]} : vector<64x6xf32> to vector<54x6xf32>
    %cst_61 = arith.constant 0.213005543 : f32
    %208 = vector.broadcast %cst_61 : f32 to vector<54x6xf32>
    %209 = arith.mulf %207, %208 : vector<54x6xf32>
    %210 = arith.addf %206, %209 : vector<54x6xf32>
    %211 = vector.extract_strided_slice %183 {offsets = [7, 0], sizes = [54, 6], strides = [1, 1]} : vector<64x6xf32> to vector<54x6xf32>
    %cst_62 = arith.constant 0.109360687 : f32
    %212 = vector.broadcast %cst_62 : f32 to vector<54x6xf32>
    %213 = arith.mulf %211, %212 : vector<54x6xf32>
    %214 = arith.addf %210, %213 : vector<54x6xf32>
    %215 = vector.extract_strided_slice %183 {offsets = [8, 0], sizes = [54, 6], strides = [1, 1]} : vector<64x6xf32> to vector<54x6xf32>
    %cst_63 = arith.constant 0.0360007733 : f32
    %216 = vector.broadcast %cst_63 : f32 to vector<54x6xf32>
    %217 = arith.mulf %215, %216 : vector<54x6xf32>
    %218 = arith.addf %214, %217 : vector<54x6xf32>
    %219 = vector.extract_strided_slice %183 {offsets = [9, 0], sizes = [54, 6], strides = [1, 1]} : vector<64x6xf32> to vector<54x6xf32>
    %cst_64 = arith.constant 0.00759875821 : f32
    %220 = vector.broadcast %cst_64 : f32 to vector<54x6xf32>
    %221 = arith.mulf %219, %220 : vector<54x6xf32>
    %222 = arith.addf %218, %221 : vector<54x6xf32>
    %223 = vector.extract_strided_slice %183 {offsets = [10, 0], sizes = [54, 6], strides = [1, 1]} : vector<64x6xf32> to vector<54x6xf32>
    %cst_65 = arith.constant 0.00102838012 : f32
    %224 = vector.broadcast %cst_65 : f32 to vector<54x6xf32>
    %225 = arith.mulf %223, %224 : vector<54x6xf32>
    %226 = arith.addf %222, %225 : vector<54x6xf32>
    %227 = arith.mulf %47, %47 : vector<54x6xf32>
    %228 = arith.mulf %91, %91 : vector<54x6xf32>
    %229 = arith.mulf %47, %91 : vector<54x6xf32>
    %230 = arith.subf %136, %227 : vector<54x6xf32>
    %231 = arith.subf %181, %228 : vector<54x6xf32>
    %232 = arith.subf %226, %229 : vector<54x6xf32>
    %cst_66 = arith.constant 2.000000e+00 : f32
    %233 = vector.broadcast %cst_66 : f32 to vector<54x6xf32>
    %234 = arith.mulf %233, %229 : vector<54x6xf32>
    %cst_67 = arith.constant 9.99999974E-5 : f32
    %235 = vector.broadcast %cst_67 : f32 to vector<54x6xf32>
    %236 = arith.addf %234, %235 : vector<54x6xf32>
    %cst_68 = arith.constant 2.000000e+00 : f32
    %237 = vector.broadcast %cst_68 : f32 to vector<54x6xf32>
    %238 = arith.mulf %237, %232 : vector<54x6xf32>
    %cst_69 = arith.constant 8.99999984E-4 : f32
    %239 = vector.broadcast %cst_69 : f32 to vector<54x6xf32>
    %240 = arith.addf %238, %239 : vector<54x6xf32>
    %241 = arith.mulf %236, %240 : vector<54x6xf32>
    %242 = arith.addf %227, %228 : vector<54x6xf32>
    %cst_70 = arith.constant 9.99999974E-5 : f32
    %243 = vector.broadcast %cst_70 : f32 to vector<54x6xf32>
    %244 = arith.addf %242, %243 : vector<54x6xf32>
    %245 = arith.addf %230, %231 : vector<54x6xf32>
    %cst_71 = arith.constant 8.99999984E-4 : f32
    %246 = vector.broadcast %cst_71 : f32 to vector<54x6xf32>
    %247 = arith.addf %245, %246 : vector<54x6xf32>
    %248 = arith.mulf %244, %247 : vector<54x6xf32>
    %249 = arith.divf %241, %248 : vector<54x6xf32>
    %250 = vector.broadcast %3 : vector<54x1xf32> to vector<54x6xf32>
    %251 = arith.mulf %249, %250 : vector<54x6xf32>
    %252 = vector.shape_cast %251 : vector<54x6xf32> to vector<1x54x6xf32>
    %cst_72 = arith.constant dense<0.000000e+00> : vector<1xf32>
    %253 = vector.multi_reduction <add>, %252, %cst_72 [1, 2] : vector<1x54x6xf32> to vector<1xf32>
    %254 = vector.shape_cast %253 : vector<1xf32> to vector<1x1x1xf32>
    %255 = vector.extract %254[0, 0, 0] : f32 from vector<1x1x1xf32>
    %256 = vector.broadcast %255 : f32 to vector<1x1xf32>
    %c0_73 = arith.constant 0 : index
    %c0_74 = arith.constant 0 : index
    %c0_75 = arith.constant 0 : index
    %257 = vector.load %arg5[%c0_73, %c0_74, %c0_75] : memref<1x1x1xf32, #tpu.memory_space<vmem>>, vector<1x1x1xf32>
    %258 = vector.shape_cast %257 : vector<1x1x1xf32> to vector<1x1xf32>
    %259 = vector.shape_cast %256 : vector<1x1xf32> to vector<1x1x1xf32>
    tpu.vector_store %arg5[%c0_73, %c0_74, %c0_75], %259 {strides = array<i32>} : memref<1x1x1xf32, #tpu.memory_space<vmem>>, vector<1x1x1xf32>,
    return
  }
  func.func @transform_0(%arg0: i32) -> (i32, i32) {
    %c0_i32 = arith.constant 0 : i32
    %c0_i32_0 = arith.constant 0 : i32
    return %arg0, %c0_i32 : i32, i32
  }
  func.func @transform_1(%arg0: i32) -> (i32, i32) {
    %c0_i32 = arith.constant 0 : i32
    %c0_i32_0 = arith.constant 0 : i32
    return %arg0, %c0_i32 : i32, i32
  }
  func.func @transform_2(%arg0: i32) -> (i32, i32) {
    %c0_i32 = arith.constant 0 : i32
    %c0_i32_0 = arith.constant 0 : i32
    %c0_i32_1 = arith.constant 0 : i32
    return %c0_i32, %c0_i32_0 : i32, i32
  }
  func.func @transform_3(%arg0: i32) -> (i32, i32) {
    %c0_i32 = arith.constant 0 : i32
    %c0_i32_0 = arith.constant 0 : i32
    %c0_i32_1 = arith.constant 0 : i32
    return %c0_i32, %c0_i32_0 : i32, i32
  }
  func.func @transform_4(%arg0: i32) -> (i32, i32, i32) {
    %c0_i32 = arith.constant 0 : i32
    %c0_i32_0 = arith.constant 0 : i32
    %c0_i32_1 = arith.constant 0 : i32
    return %arg0, %c0_i32, %c0_i32_0 : i32, i32, i32
  }
}

</mosaic_0001>

<bundles_post_ra>
// kernel: tpu_custom_call.1
= control target key start
LH: loop header
LB: loop body
LE: loop exit
PB: predicated region body
PF: predicated region fallthrough
CT: control target
= control target key end

     0   :  { %s3110_s15 = smov 0   ;;  %s5246_s0 = inlined_call_operand.vmem [shape: f32[128,16], index: 0, kind: input, shape index: {}]   ;;  %s5247_s1 = inlined_call_operand.vmem [shape: f32[128,16], index: 1, kind: input, shape index: {}]   ;;  %s5248_s2 = inlined_call_operand.vmem [shape: f32[16,6], index: 2, kind: input, shape index: {}]   ;;  %s5249_s3 = inlined_call_operand.vmem [shape: f32[54,1], index: 3, kind: input, shape index: {}]   ;;  %s5250_s4 = inlined_call_operand.vmem [shape: f32[2,1,1], index: 4, kind: output, shape index: {}]  }
   0x1 LB: > { %s3116_s16 = sadd.s32 4294967295, %s3082_s15   ;;  %p2868_p0 = scmp.ge.s32.totalorder %s3082_s15, 1  ;;  %s3082_s15 = sphi %s3110_s15, %s14_s15  }
   0x2   : > { %p174_p1 = scmp.lt.s32.totalorder %s3082_s15, 3 }
   0x4   : > { %p175_p2 = pnand %p2868_p0, %p174_p1 }
   0x6   : > { %178 = sbr.rel (%p175_p2) target bundleno = 797 (0x31d), region = 36 }
   0xb   : > { %v3123_v0 = vld [vmem:[%s5248_s2 + $0x8] sm:$0xff]  ;;  %v3128_v1 = vld [vmem:[%s5248_s2] sm:$0xff]  ;;  %s2869_s21 = sshll.u32 %s3116_s16, 3  ;;  %v238_v3 = vld [vmem:[%s5249_s3 + $0x10] sm:$0xff]  ;;  %vm243_vm0 = vcmask 130048   ;;  %v3084_v4 = vmov 0  }
   0xc   : > { %3045 = vmatprep.subr.mxu1 %v3123_v0  ;;  %2965 = vmatprep.subr.mxu0 %v3123_v0  ;;  %p204_p3 = scmp.lt.s32.totalorder %s2869_s21, 15  ;;  %v236_v2 = vld [vmem:[%s5249_s3] sm:$0xff]  ;;  %v237_v23 = vld [vmem:[%s5249_s3 + $0x8] sm:$0xff]  ;;  %v239_v25 = vld [vmem:[%s5249_s3 + $0x18] sm:$0xff]  ;;  %vm394_vm1 = vcmask 1046528   ;;  %vm436_vm2 = vcmask 1045504  }
   0xd   : > { %3047 = vmatpush3.msra.mxu1 %v3123_v0  ;;  %2966 = vmatpush3.msra.mxu0 %v3123_v0  ;;  %v240_v29 = vld [vmem:[%s5249_s3 + $0x20] sm:$0xff]  ;;  %v241_v31 = vld [vmem:[%s5249_s3 + $0x28] sm:$0xff]  ;;  %v242_v35 = vld [vmem:[%s5249_s3 + $0x30] sm:$0x3f]  ;;  %vm480_vm3 = vcmask 1044480   ;;  %vm526_vm4 = vcmask 1043456  }
   0xe   : > { %3046 = vmatprep.subr.mxu1 %v3128_v1  ;;  %2967 = vmatprep.subr.mxu0 %v3128_v1  ;;  %s5904_s21 = smov (!%p204_p3, %s2869_s21), 15  ;;  %vm572_vm5 = vcmask 1042432   ;;  %vm602_vm6 = vcmask 1041408   ;;  %vm632_vm7 = vcmask 1040384   ;;  %vm2778_vm8 = vcmask 48128   ;;  %p215_p4 = scmp.lt.s32.totalorder %s3116_s16, 1 }
   0xf   : > { %3048 = vmatpush3.msra.mxu1 %v3128_v1  ;;  %2968 = vmatpush3.msra.mxu0 %v3128_v1  ;;  %s2870_s26 = sshll.u32 %s5904_s21, 3  ;;  %vm2790_vm9 = vcmask 46080   ;;  %vm2803_vm10 = vcmask 0  }
  0x10   : > { %2981 = vmatprep.subr.mxu1 %v3123_v0  ;;  %2997 = vmatprep.subr.mxu0 %v3123_v0  ;;  %s207_s29 = scalar_lea.vmem %s5246_s0, %s2870_s26  ;;  %s3159_s6 = scalar_lea.vmem %s5247_s1, %s2870_s26 }
  0x11   : > { %3060 = vset.pattern.permute.xlu0 %v3084_v4  ;;  %3061 = vset.pattern.permute.xlu1 %v3084_v4  ;;  %v3150_v5 = vld [vmem:[%s207_s29] sm:$0xff]  ;;  %v3154_v7 = vld [vmem:[%s207_s29 + $0x8] sm:$0xff]  ;;  %v3167_v9 = vld [vmem:[%s207_s29 + $0x10] sm:$0xff]  ;;  %s5906_s16 = smov (!%p215_p4, %s3116_s16), 1 }
  0x12   : > { %v3152_v6 = vld [vmem:[%s207_s29 + $0x20] sm:$0xff]  ;;  %2738 = vperm.xlu0 %3060, %v236_v2   ;;  %2748 = vperm.xlu1 %3061, %v238_v3   ;;  %v3165_v8 = vld [vmem:[%s207_s29 + $0x28] sm:$0xff]  ;;  %v3173_v10 = vld [vmem:[%s207_s29 + $0x30] sm:$0xff]  ;;  %v1185_v13 = vmul.f32 %v3150_v5, %v3150_v5  ;;  %v1186_v15 = vmul.f32 %v3154_v7, %v3154_v7  ;;  %v1187_v17 = vmul.f32 %v3167_v9, %v3167_v9  ;;  %s217_s21 = scalar_lea.vmem %s5250_s4, %s5906_s16 }
  0x13   : > { %2969 = vmatprep.mubr.msk.f32.mxu0 %vm243_vm0, %v3150_v5  ;;  %2975 = vmatprep.mubr.msk.f32.mxu1 %vm243_vm0, %v3152_v6  ;;  %v3178_v11 = vld [vmem:[%s207_s29 + $0x18] sm:$0xff]  ;;  %v226_v14 = vld [vmem:[%s3159_s6] sm:$0xff]  ;;  %v227_v16 = vld [vmem:[%s3159_s6 + $0x8] sm:$0xff]  ;;  %v1189_v20 = vmul.f32 %v3152_v6, %v3152_v6  ;;  %v1190_v24 = vmul.f32 %v3165_v8, %v3165_v8  ;;  %v1191_v26 = vmul.f32 %v3173_v10, %v3173_v10 }
  0x14   : > { %2970 = vmatmul.mubr.msk.f32.vlgmr.msra.gmra.mxu0 %vm243_vm0, %v3154_v7  ;;  %2976 = vmatmul.mubr.msk.f32.vlgmr.msra.gmra.mxu1 %vm243_vm0, %v3165_v8  ;;  %v3180_v12 = vld [vmem:[%s207_s29 + $0x38] sm:$0xff]  ;;  %v228_v18 = vld [vmem:[%s3159_s6 + $0x10] sm:$0xff]  ;;  %v1188_v19 = vmul.f32 %v3178_v11, %v3178_v11  ;;  %v230_v22 = vld [vmem:[%s3159_s6 + $0x20] sm:$0xff]  ;;  %v1660_v32 = vmul.f32 %v226_v14, %v226_v14  ;;  %v2135_v33 = vmul.f32 %v226_v14, %v3150_v5 }
  0x15   : > { %2982 = vmatpush3.msra.mxu1 %v3123_v0  ;;  %2972 = vmatprep.mubr.msk.f32.mxu0 %vm243_vm0, %v3167_v9  ;;  %v229_v21 = vld [vmem:[%s3159_s6 + $0x18] sm:$0xff]  ;;  %v231_v27 = vld [vmem:[%s3159_s6 + $0x28] sm:$0xff]  ;;  %v232_v28 = vld [vmem:[%s3159_s6 + $0x30] sm:$0xff]  ;;  %v1192_v30 = vmul.f32 %v3180_v12, %v3180_v12  ;;  %v1661_v36 = vmul.f32 %v227_v16, %v227_v16  ;;  %v2136_v37 = vmul.f32 %v227_v16, %v3154_v7 }
  0x16   : > { %2978 = vmatprep.mubr.msk.f32.mxu1 %vm243_vm0, %v3173_v10  ;;  %2983 = vmatprep.subr.mxu1 %v3128_v1  ;;  %v233_v34 = vld [vmem:[%s3159_s6 + $0x38] sm:$0xff]  ;;  %v1662_v38 = vmul.f32 %v228_v18, %v228_v18  ;;  %v2137_v39 = vmul.f32 %v228_v18, %v3167_v9  ;;  %v1663_v40 = vmul.f32 %v229_v21, %v229_v21 }
  0x17   : > { %2984 = vmatpush3.msra.mxu1 %v3128_v1  ;;  %2998 = vmatpush3.msra.mxu0 %v3123_v0  ;;  %v2138_v41 = vmul.f32 %v229_v21, %v3178_v11  ;;  %v1664_v42 = vmul.f32 %v230_v22, %v230_v22  ;;  %v2139_v43 = vmul.f32 %v230_v22, %v3152_v6 }
  0x18   : > { %2973 = vmatmul.mubr.msk.f32.gmra.mxu0 %vm243_vm0, %v3178_v11  ;;  %2979 = vmatmul.mubr.msk.f32.gmra.mxu1 %vm243_vm0, %v3180_v12  ;;  %v1665_v44 = vmul.f32 %v231_v27, %v231_v27  ;;  %v2140_v45 = vmul.f32 %v231_v27, %v3165_v8  ;;  %v1666_v46 = vmul.f32 %v232_v28, %v232_v28 }
  0x19   : > { %2999 = vmatprep.subr.mxu0 %v3128_v1  ;;  %2985 = vmatprep.mubr.msk.f32.mxu1 %vm243_vm0, %v226_v14  ;;  %v2141_v47 = vmul.f32 %v232_v28, %v3173_v10  ;;  %v1667_v48 = vmul.f32 %v233_v34, %v233_v34  ;;  %v2142_v49 = vmul.f32 %v233_v34, %v3180_v12 }
  0x1a   : > { %3000 = vmatpush3.msra.mxu0 %v3128_v1  ;;  %3001 = vmatprep.mubr.msk.f32.mxu0 %vm243_vm0, %v1185_v13 }
  0x1b   : > { %3013 = vmatprep.subr.mxu1 %v3123_v0  ;;  %3029 = vmatprep.subr.mxu0 %v3123_v0 }
  0x1c   : > { %2986 = vmatmul.mubr.msk.f32.vlgmr.msra.gmra.mxu1 %vm243_vm0, %v227_v16  ;;  %3002 = vmatmul.mubr.msk.f32.vlgmr.msra.gmra.mxu0 %vm243_vm0, %v1186_v15 }
  0x1d   : > { %3014 = vmatpush3.msra.mxu1 %v3123_v0  ;;  %2988 = vmatprep.mubr.msk.f32.mxu1 %vm243_vm0, %v228_v18 }
  0x1e   : > { %3004 = vmatprep.mubr.msk.f32.mxu0 %vm243_vm0, %v1187_v17  ;;  %3015 = vmatprep.subr.mxu1 %v3128_v1 }
  0x1f   : > { %3016 = vmatpush3.msra.mxu1 %v3128_v1  ;;  %3030 = vmatpush3.msra.mxu0 %v3123_v0 }
  0x20   : > { %2989 = vmatmul.mubr.msk.f32.gmra.mxu1 %vm243_vm0, %v229_v21  ;;  %3005 = vmatmul.mubr.msk.f32.gmra.mxu0 %vm243_vm0, %v1188_v19 }
  0x21   : > { %2991 = vmatprep.mubr.msk.f32.mxu1 %vm243_vm0, %v230_v22  ;;  %3007 = vmatprep.mubr.msk.f32.mxu0 %vm243_vm0, %v1189_v20 }
  0x22   : > { %3031 = vmatprep.subr.mxu0 %v3128_v1  ;;  %2743 = vperm.xlu0 %3060, %v237_v23  }
  0x23   : > { %3032 = vmatpush3.msra.mxu0 %v3128_v1  ;;  %2753 = vperm.xlu1 %3061, %v239_v25  }
  0x24   : > { %2992 = vmatmul.mubr.msk.f32.gmra.mxu1 %vm243_vm0, %v231_v27  ;;  %3008 = vmatmul.mubr.msk.f32.gmra.mxu0 %vm243_vm0, %v1190_v24 }
  0x25   : > { %2994 = vmatprep.mubr.msk.f32.mxu1 %vm243_vm0, %v232_v28  ;;  %3010 = vmatprep.mubr.msk.f32.mxu0 %vm243_vm0, %v1191_v26 }
  0x26   : > { %2758 = vperm.xlu0 %3060, %v240_v29  }
  0x27   : > { %2763 = vperm.xlu1 %3061, %v241_v31  }
  0x28   : > { %2995 = vmatmul.mubr.msk.f32.gmra.mxu1 %vm243_vm0, %v233_v34  ;;  %3011 = vmatmul.mubr.msk.f32.gmra.mxu0 %vm243_vm0, %v1192_v30 }
  0x29   : > { %3017 = vmatprep.mubr.msk.f32.mxu1 %vm243_vm0, %v1660_v32  ;;  %3033 = vmatprep.mubr.msk.f32.mxu0 %vm243_vm0, %v2135_v33 }
  0x2a   : > { %2768 = vperm.xlu0 %3060, %v242_v35  }
  0x2c   : > { %3018 = vmatmul.mubr.msk.f32.vlgmr.msra.gmra.mxu1 %vm243_vm0, %v1661_v36  ;;  %3034 = vmatmul.mubr.msk.f32.vlgmr.msra.gmra.mxu0 %vm243_vm0, %v2136_v37 }
  0x2d   : > { %3020 = vmatprep.mubr.msk.f32.mxu1 %vm243_vm0, %v1662_v38  ;;  %3036 = vmatprep.mubr.msk.f32.mxu0 %vm243_vm0, %v2137_v39 }
  0x30   : > { %3021 = vmatmul.mubr.msk.f32.gmra.mxu1 %vm243_vm0, %v1663_v40  ;;  %3037 = vmatmul.mubr.msk.f32.gmra.mxu0 %vm243_vm0, %v2138_v41 }
  0x31   : > { %3023 = vmatprep.mubr.msk.f32.mxu1 %vm243_vm0, %v1664_v42  ;;  %3039 = vmatprep.mubr.msk.f32.mxu0 %vm243_vm0, %v2139_v43 }
  0x34   : > { %3024 = vmatmul.mubr.msk.f32.gmra.mxu1 %vm243_vm0, %v1665_v44  ;;  %3040 = vmatmul.mubr.msk.f32.gmra.mxu0 %vm243_vm0, %v2140_v45 }
  0x35   : > { %3026 = vmatprep.mubr.msk.f32.mxu1 %vm243_vm0, %v1666_v46  ;;  %3042 = vmatprep.mubr.msk.f32.mxu0 %vm243_vm0, %v2141_v47 }
  0x38   : > { %3027 = vmatmul.mubr.msk.f32.gmra.mxu1 %vm243_vm0, %v1667_v48  ;;  %3043 = vmatmul.mubr.msk.f32.gmra.mxu0 %vm243_vm0, %v2142_v49 }
  0xd4   : > { %v2971_v50 = vpop.f32.mrf.mxu0  ;;  %v2977_v53 = vpop.f32.mrf.mxu1 }
  0xd5   : > { %v3280_v51 = vmul.f32 0.007598758, %v2971_v50  ;;  %v3283_v56 = vmul.f32 0.036000773, %v2971_v50  ;;  %v3285_v59 = vmul.f32 0.10936069, %v2971_v50 }
  0xd6   : > { %v334_v52 = vpop.f32.mrf.mxu0  ;;  %v354_v61 = vpop.f32.mrf.mxu1  ;;  %v3293_v2 = vmul.f32 0.21300554, %v2971_v50  ;;  %v3295_v3 = vmul.f32 0.26601171, %v2971_v50  ;;  %v3299_v5 = vmul.f32 0.0010283801, %v2971_v50 }
  0xd7   : > { %v380_v54 = vmul.f32 0.007598758, %v334_v52  ;;  %v396_v55 = vrot.slane %v3280_v51, 1  ;;  %v422_v58 = vmul.f32 0.036000773, %v334_v52  ;;  %v438_v62 = vrot.slane %v3283_v56, 2 }
  0xd8   : > { %v373_v60 = vmul.f32 0.0010283801, %v334_v52  ;;  %v3291_v1 = vmul.f32 0.10936069, %v334_v52  ;;  %v3297_v4 = vmul.f32 0.007598758, %v354_v61  ;;  %v2974_v36 = vpop.f32.mrf.mxu0 }
  0xd9   : > { %v395_v57 = vrot.slane %v380_v54, 1  ;;  %v437_v0 = vrot.slane %v422_v58, 2  ;;  %5396 = vst [vmem:[#allocation2_spill] sm:$0xff] %v3299_v5  ;;  %v482_v6 = vrot.slane %v3285_v59, 3  ;;  %v3302_v8 = vmul.f32 0.007598758, %v2977_v53 }
  0xda   : > { %v481_v10 = vrot.slane %v3291_v1, 3  ;;  %v510_v11 = vmul.f32 0.21300554, %v334_v52  ;;  %v528_v13 = vrot.slane %v3293_v2, 4  ;;  %v5257_v14 = vrot.slane %v3295_v3, 5  ;;  %v344_v54 = vpop.f32.mrf.mxu0 }
  0xdb   : > { %v397_v63 = vsel %vm394_vm1, %v395_v57, %v396_v55  ;;  %v439_v9 = vsel %vm436_vm2, %v437_v0, %v438_v62  ;;  %v3311_v15 = vmul.f32 0.0010283801, %v2977_v53  ;;  %v402_v16 = vrot.slane %v3297_v4, 1 }
  0xdc   : > { %v415_v7 = vadd.f32 %v397_v63, %v373_v60  ;;  %v5255_v17 = vrot.slane %v3293_v2, 6  ;;  %v556_v20 = vmul.f32 0.26601171, %v334_v52  ;;  %v5258_v21 = vrot.slane %v3302_v8, 1 }
  0xdd   : > { %5397 = vst [vmem:[#allocation3_spill] sm:$0xff] %v3311_v15  ;;  %v483_v22 = vsel %vm480_vm3, %v481_v10, %v482_v6  ;;  %v527_v23 = vrot.slane %v510_v11, 4  ;;  %v3320_v24 = vmul.f32 0.036000773, %v354_v61  ;;  %v3322_v25 = vmul.f32 0.036000773, %v2977_v53 }
  0xde   : > { %v457_v19 = vadd.f32 %v439_v9, %v415_v7  ;;  %v3324_v26 = vmul.f32 0.10936069, %v2977_v53  ;;  %v3326_v27 = vmul.f32 0.21300554, %v2977_v53  ;;  %v3328_v28 = vmul.f32 0.26601171, %v2977_v53 }
  0xdf   : > { %5398 = vst [vmem:[#allocation4_spill] sm:$0xff] %v3320_v24  ;;  %5399 = vst [vmem:[#allocation5_spill] sm:$0xff] %v3322_v25  ;;  %v3335_v29 = vsel %vm394_vm1, %v402_v16, %v5258_v21  ;;  %v3337_v30 = vmul.f32 0.10936069, %v354_v61  ;;  %v3339_v31 = vmul.f32 0.21300554, %v354_v61  ;;  %v529_v37 = vsel %vm526_vm4, %v527_v23, %v528_v13 }
  0xe0   : > { %5400 = vst [vmem:[#allocation6_spill] sm:$0xff] %v3324_v26  ;;  %5401 = vst [vmem:[#allocation7_spill] sm:$0xff] %v3335_v29  ;;  %v503_v33 = vadd.f32 %v483_v22, %v457_v19  ;;  %v573_v34 = vrot.slane %v556_v20, 5  ;;  %v3342_v35 = vmul.f32 0.0010283801, %v354_v61  ;;  %v603_v38 = vrot.slane %v510_v11, 6 }
  0xe1   : > { %5402 = vst [vmem:[#allocation8_spill] sm:$0xff] %v3337_v30  ;;  %v444_v39 = vrot.slane %v3320_v24, 2  ;;  %v3348_v40 = vmul.f32 0.26601171, %v354_v61  ;;  %v5256_v41 = vrot.slane %v3322_v25, 2  ;;  %v5254_v42 = vrot.slane %v3324_v26, 3 }
  0xe2   : > { %5403 = vst [vmem:[#allocation9_spill] sm:$0xff] %v3342_v35  ;;  %v5253_v43 = vrot.slane %v3326_v27, 4  ;;  %v419_v44 = vadd.f32 %v3335_v29, %v3342_v35  ;;  %v5252_v45 = vrot.slane %v3328_v28, 5  ;;  %v5251_v46 = vrot.slane %v3326_v27, 6 }
  0xe3   : > { %v488_v47 = vrot.slane %v3337_v30, 3  ;;  %v534_v48 = vrot.slane %v3339_v31, 4  ;;  %v549_v50 = vadd.f32 %v529_v37, %v503_v33  ;;  %v383_v53 = vmul.f32 0.007598758, %v2974_v36 }
  0xe4   : > { %v575_v57 = vsel %vm572_vm5, %v573_v34, %v5257_v14  ;;  %v3367_v58 = vsel %vm602_vm6, %v603_v38, %v5255_v17  ;;  %v447_v60 = vsel %vm436_vm2, %v444_v39, %v5256_v41  ;;  %v580_v61 = vrot.slane %v3348_v40, 5 }
  0xe5   : > { %v461_v63 = vadd.f32 %v447_v60, %v419_v44  ;;  %v610_v0 = vrot.slane %v3339_v31, 6  ;;  %v3377_v9 = vmul.f32 0.0010283801, %v2974_v36  ;;  %v491_v10 = vsel %vm480_vm3, %v488_v47, %v5254_v42  ;;  %v2980_v44 = vpop.f32.mrf.mxu1 }
  0xe6   : > { %v537_v11 = vsel %vm526_vm4, %v534_v48, %v5253_v43  ;;  %v382_v20 = vmul.f32 0.007598758, %v344_v54  ;;  %v3388_v22 = vadd.f32 %v575_v57, %v549_v50  ;;  %v400_v23 = vrot.slane %v383_v53, 1 }
  0xe7   : > { %5404 = vst [vmem:[#allocation10_spill] sm:$0xff] %v3377_v9  ;;  %v3390_v33 = vmul.f32 0.036000773, %v344_v54  ;;  %v3392_v34 = vmul.f32 0.10936069, %v344_v54  ;;  %v583_v37 = vsel %vm572_vm5, %v580_v61, %v5252_v45  ;;  %v507_v32 = vadd.f32 %v491_v10, %v461_v63  ;;  %v364_v4 = vpop.f32.mrf.mxu1 }
  0xe8   : > { %v3397_v38 = vmul.f32 0.036000773, %v2974_v36  ;;  %v3399_v40 = vmul.f32 0.10936069, %v2974_v36  ;;  %v398_v60 = vrot.slane %v382_v20, 1  ;;  %v3404_v50 = vsel %vm602_vm6, %v610_v0, %v5251_v46 }
  0xe9   : > { %5405 = vst [vmem:[#allocation11_spill] sm:$0xff] %v3392_v34  ;;  %5408 = vst [vmem:[#allocation14_spill] sm:$0xff] %v3404_v50  ;;  %v440_v57 = vrot.slane %v3390_v33, 2  ;;  %v3408_v7 = vmul.f32 0.21300554, %v2974_v36  ;;  %v484_v12 = vrot.slane %v3392_v34, 3  ;;  %v3421_v63 = vsel %vm394_vm1, %v400_v23, %v402_v16 }
  0xea   : > { %5406 = vst [vmem:[#allocation12_spill] sm:$0xff] %v3397_v38  ;;  %5407 = vst [vmem:[#allocation13_spill] sm:$0xff] %v3399_v40  ;;  %v3413_v19 = vsel %vm394_vm1, %v396_v55, %v398_v60  ;;  %v3416_v20 = vmul.f32 0.21300554, %v344_v54  ;;  %v3423_v10 = vmul.f32 0.26601171, %v2974_v36  ;;  %v553_v16 = vadd.f32 %v537_v11, %v507_v32 }
  0xeb   : > { %5409 = vst [vmem:[#allocation15_spill] sm:$0xff] %v3421_v63  ;;  %v416_v53 = vadd.f32 %v3413_v19, %v3299_v5  ;;  %v441_v51 = vsel %vm436_vm2, %v438_v62, %v440_v57  ;;  %v442_v55 = vrot.slane %v3397_v38, 2  ;;  %v486_v52 = vrot.slane %v3399_v40, 3 }
  0xec   : > { %v3432_v49 = vmul.f32 0.10936069, %v2980_v44  ;;  %v3434_v46 = vmul.f32 0.0010283801, %v344_v54  ;;  %v3438_v45 = vsel %vm394_vm1, %v398_v60, %v400_v23  ;;  %v418_v18 = vadd.f32 %v3421_v63, %v3377_v9 }
  0xed   : > { %5412 = vst [vmem:[#allocation18_spill] sm:$0xff] %v3438_v45  ;;  %v458_v43 = vadd.f32 %v441_v51, %v416_v53  ;;  %v485_v62 = vsel %vm480_vm3, %v482_v6, %v484_v12  ;;  %v530_v42 = vrot.slane %v3416_v20, 4  ;;  %v558_v17 = vmul.f32 0.26601171, %v344_v54 }
  0xee   : > { %5410 = vst [vmem:[#allocation16_spill] sm:$0xff] %v3432_v49  ;;  %5411 = vst [vmem:[#allocation17_spill] sm:$0xff] %v3434_v46  ;;  %v532_v41 = vrot.slane %v3408_v7, 4  ;;  %v578_v32 = vrot.slane %v3423_v10, 5  ;;  %v386_v36 = vmul.f32 0.007598758, %v364_v4  ;;  %v445_v23 = vsel %vm436_vm2, %v442_v55, %v444_v39 }
  0xef   : > { %v489_v60 = vsel %vm480_vm3, %v486_v52, %v488_v47  ;;  %v494_v53 = vrot.slane %v3432_v49, 3  ;;  %v417_v6 = vadd.f32 %v3438_v45, %v3434_v46  ;;  %v443_v54 = vsel %vm436_vm2, %v440_v57, %v442_v55 }
  0xf0   : > { %v504_v51 = vadd.f32 %v485_v62, %v458_v43  ;;  %v3457_v14 = vrot.slane %v386_v36, 1  ;;  %v3459_v10 = vmul.f32 0.036000773, %v364_v4  ;;  %v3461_v21 = vadd.f32 %v583_v37, %v553_v16 }
  0xf1   : > { %v460_v11 = vadd.f32 %v445_v23, %v418_v18  ;;  %v531_v39 = vsel %vm526_vm4, %v528_v13, %v530_v42  ;;  %v576_v47 = vrot.slane %v558_v17, 5  ;;  %v535_v29 = vsel %vm526_vm4, %v532_v41, %v534_v48 }
  0xf2   : > { %5413 = vst [vmem:[#allocation19_spill] sm:$0xff] %v3457_v14  ;;  %5414 = vst [vmem:[#allocation20_spill] sm:$0xff] %v3461_v21  ;;  %v581_v24 = vsel %vm572_vm5, %v578_v32, %v580_v61  ;;  %v5415_v43 = vrot.slane %v3408_v7, 6  ;;  %v5417_v37 = vrot.slane %v3302_v8, 1  ;;  %v3481_v55 = vmul.f32 0.21300554, %v2980_v44 }
  0xf3   : > { %v563_v13 = vmul.f32 0.26601171, %v2980_v44  ;;  %v459_v17 = vadd.f32 %v443_v54, %v417_v6  ;;  %v487_v31 = vsel %vm480_vm3, %v484_v12, %v486_v52  ;;  %v550_v48 = vadd.f32 %v531_v39, %v504_v51 }
  0xf4   : > { %v3473_v57 = vsel %vm602_vm6, %v5415_v43, %v610_v0  ;;  %v3479_v18 = vsel %vm394_vm1, %v5417_v37, %v3457_v14  ;;  %v3484_v16 = vmul.f32 0.0010283801, %v364_v4  ;;  %v448_v61 = vrot.slane %v3459_v10, 2 }
  0xf5   : > { %5416 = vst [vmem:[#allocation21_spill] sm:$0xff] %v3473_v57  ;;  %5418 = vst [vmem:[#allocation22_spill] sm:$0xff] %v3479_v18  ;;  %v3487_v36 = vmul.f32 0.10936069, %v364_v4  ;;  %v506_v0 = vadd.f32 %v489_v60, %v460_v11  ;;  %v5421_v8 = vrot.slane %v3295_v3, 5  ;;  %v420_v6 = vadd.f32 %v3479_v18, %v3311_v15 }
  0xf6   : > { %5419 = vst [vmem:[#allocation23_spill] sm:$0xff] %v3484_v16  ;;  %v3495_v54 = vmul.f32 0.036000773, %v2980_v44  ;;  %v3497_v12 = vmul.f32 0.007598758, %v2980_v44  ;;  %v421_v51 = vadd.f32 %v3457_v14, %v3484_v16  ;;  %v505_v11 = vadd.f32 %v487_v31, %v459_v17  ;;  %v2987_v14 = vpop.f32.mrf.mxu1 }
  0xf7   : > { %5420 = vst [vmem:[#allocation24_spill] sm:$0xff] %v3487_v36  ;;  %v577_v23 = vsel %vm572_vm5, %v5421_v8, %v576_v47  ;;  %v3499_v52 = vmul.f32 0.0010283801, %v2980_v44  ;;  %v533_v60 = vsel %vm526_vm4, %v530_v42, %v532_v41  ;;  %v606_v3 = vrot.slane %v3416_v20, 6 }
  0xf8   : > { %5422 = vst [vmem:[#allocation25_spill] sm:$0xff] %v3495_v54  ;;  %5423 = vst [vmem:[#allocation26_spill] sm:$0xff] %v3497_v12  ;;  %v516_v39 = vmul.f32 0.21300554, %v364_v4  ;;  %v596_v43 = vadd.f32 %v577_v23, %v550_v48  ;;  %v5425_v37 = vrot.slane %v3322_v25, 2  ;;  %v492_v62 = vrot.slane %v3487_v36, 3 }
  0xf9   : > { %5424 = vst [vmem:[#allocation27_spill] sm:$0xff] %v3499_v52  ;;  %v562_v54 = vmul.f32 0.26601171, %v364_v4  ;;  %v552_v49 = vadd.f32 %v535_v29, %v506_v0  ;;  %v540_v44 = vrot.slane %v3481_v55, 4  ;;  %v586_v15 = vrot.slane %v563_v13, 5 }
  0xfa   : > { %v449_v8 = vsel %vm436_vm2, %v5425_v37, %v448_v61  ;;  %v616_v17 = vrot.slane %v3481_v55, 6  ;;  %v5267_v42 = vrot.slane %v3392_v34, 7  ;;  %v463_v20 = vadd.f32 %v448_v61, %v421_v51 }
  0xfb   : > { %v462_v18 = vadd.f32 %v449_v8, %v420_v6  ;;  %v551_v48 = vadd.f32 %v533_v60, %v505_v11  ;;  %v5426_v23 = vrot.slane %v3293_v2, 6  ;;  %v538_v29 = vrot.slane %v516_v39, 4  ;;  %v3524_v11 = vpop.f32.mrf.mxu0  ;;  %v808_v2 = vpop.f32.mrf.mxu1 }
  0xfc   : > { %v579_v0 = vsel %vm572_vm5, %v576_v47, %v578_v32  ;;  %v5427_v6 = vrot.slane %v3324_v26, 3  ;;  %v584_v37 = vrot.slane %v562_v54, 5  ;;  %v3521_v8 = vadd.f32 %v581_v24, %v552_v49 }
  0xfd   : > { %v607_v4 = vsel %vm602_vm6, %v5426_v23, %v606_v3  ;;  %v495_v61 = vsel %vm480_vm3, %v492_v62, %v494_v53  ;;  %v614_v31 = vrot.slane %v516_v39, 6  ;;  %v5429_v60 = vrot.slane %v3408_v7, 6 }
  0xfe   : > { %v626_v13 = vadd.f32 %v607_v4, %v596_v43  ;;  %v493_v55 = vsel %vm480_vm3, %v5427_v6, %v492_v62  ;;  %5428 = vst [vmem:[#allocation28_spill] sm:$0xff] %v3521_v8  ;;  %v5431_v32 = vrot.slane %v3285_v59, 7  ;;  %v509_v49 = vadd.f32 %v495_v61, %v463_v20 }
  0xff   : > { %v508_v51 = vadd.f32 %v493_v55, %v462_v18  ;;  %v3529_v23 = vsel %vm602_vm6, %v606_v3, %v5429_v60  ;;  %v3537_v53 = vadd.f32 %v579_v0, %v551_v48  ;;  %v5433_v18 = vrot.slane %v3326_v27, 4 }
 0x100   : > { %5430 = vst [vmem:[#allocation29_spill] sm:$0xff] %v3529_v23  ;;  %v637_v47 = vsel %vm632_vm7, %v5431_v32, %v5267_v42  ;;  %v541_v7 = vsel %vm526_vm4, %v538_v29, %v540_v44  ;;  %v3543_v54 = vmul.f32 0.007598758, %v2987_v14  ;;  %v5434_v39 = vrot.slane %v3328_v28, 5  ;;  %v1283_v44 = vpop.f32.mrf.mxu0  ;;  %v2990_v42 = vpop.f32.mrf.mxu1 }
 0x101   : > { %5432 = vst [vmem:[#allocation30_spill] sm:$0xff] %v3537_v53  ;;  %v539_v62 = vsel %vm526_vm4, %v5433_v18, %v538_v29  ;;  %v656_v3 = vadd.f32 %v637_v47, %v626_v13  ;;  %v5266_v4 = vrot.slane %v3487_v36, 7  ;;  %v854_v6 = vmul.f32 0.007598758, %v808_v2 }
 0x102   : > { %v585_v43 = vsel %vm572_vm5, %v5434_v39, %v584_v37  ;;  %v554_v55 = vadd.f32 %v539_v62, %v508_v51  ;;  %v587_v20 = vsel %vm572_vm5, %v584_v37, %v586_v15  ;;  %v5435_v48 = vrot.slane %v3326_v27, 6 }
 0x103   : > { %v3553_v61 = vmul.f32 0.036000773, %v2987_v14  ;;  %v555_v29 = vadd.f32 %v541_v7, %v509_v49  ;;  %v3556_v13 = vsel %vm602_vm6, %v614_v31, %v616_v17  ;;  %v3558_v28 = vmul.f32 0.0010283801, %v2987_v14 }
 0x104   : > { %v615_v0 = vsel %vm602_vm6, %v5435_v48, %v614_v31  ;;  %5437 = vst [vmem:[#allocation32_spill] sm:$0xff] %v3556_v13  ;;  %v868_v60 = vrot.slane %v854_v6, 1  ;;  %v5268_v51 = vrot.slane %v3543_v54, 1  ;;  %v3563_v15 = vmul.f32 0.007598758, %v3524_v11 }
 0x105   : > { %5436 = vst [vmem:[#allocation31_spill] sm:$0xff] %v3553_v61  ;;  %5438 = vst [vmem:[#allocation33_spill] sm:$0xff] %v3558_v28  ;;  %v895_v27 = vmul.f32 0.036000773, %v808_v2  ;;  %v3566_v37 = vadd.f32 %v656_v3, %v3390_v33  ;;  %v5440_v47 = vrot.slane %v3324_v26, 7  ;;  %v600_v18 = vadd.f32 %v585_v43, %v554_v55 }
 0x106   : > { %v3573_v31 = vmul.f32 0.10936069, %v2987_v14  ;;  %v1329_v49 = vmul.f32 0.007598758, %v1283_v44  ;;  %v3576_v7 = vmul.f32 0.21300554, %v2987_v14  ;;  %v870_v39 = vsel %vm394_vm1, %v868_v60, %v5268_v51 }
 0x107   : > { %5439 = vst [vmem:[#allocation34_spill] sm:$0xff] %v3566_v37  ;;  %v645_v17 = vsel %vm632_vm7, %v5440_v47, %v5266_v4  ;;  %v3581_v33 = vadd.f32 %v587_v20, %v555_v29  ;;  %v3584_v3 = vmul.f32 0.036000773, %v3524_v11  ;;  %v847_v6 = vmul.f32 0.0010283801, %v808_v2 }
 0x108   : > { %v3586_v48 = vmul.f32 0.10936069, %v808_v2  ;;  %v909_v41 = vrot.slane %v895_v27, 2  ;;  %v1343_v43 = vrot.slane %v1329_v49, 1  ;;  %v1370_v55 = vmul.f32 0.036000773, %v1283_v44 }
 0x109   : > { %5441 = vst [vmem:[#allocation35_spill] sm:$0xff] %v3581_v33  ;;  %v3590_v32 = vmul.f32 0.26601171, %v2987_v14  ;;  %v888_v60 = vadd.f32 %v870_v39, %v847_v6  ;;  %v630_v20 = vadd.f32 %v615_v0, %v600_v18  ;;  %v3596_v51 = vmul.f32 0.10936069, %v3524_v11 }
 0x10a   : > { %5442 = vst [vmem:[#allocation36_spill] sm:$0xff] %v3586_v48  ;;  %v952_v27 = vrot.slane %v3586_v48, 3  ;;  %v981_v49 = vmul.f32 0.21300554, %v808_v2  ;;  %v1322_v62 = vmul.f32 0.0010283801, %v1283_v44 }
 0x10b   : > { %v5443_v14 = vrot.slane %v3553_v61, 2  ;;  %v5444_v39 = vrot.slane %v3563_v15, 1  ;;  %v1384_v18 = vrot.slane %v1370_v55, 2  ;;  %v1411_v6 = vmul.f32 0.10936069, %v1283_v44 }
 0x10c   : > { %v3608_v24 = vmul.f32 0.21300554, %v3524_v11  ;;  %v1026_v47 = vmul.f32 0.26601171, %v808_v2  ;;  %v660_v52 = vadd.f32 %v645_v17, %v630_v20  ;;  %v3612_v36 = vmul.f32 0.0010283801, %v3524_v11 }
 0x10d   : > { %v911_v4 = vsel %vm436_vm2, %v909_v41, %v5443_v14  ;;  %v1345_v0 = vsel %vm394_vm1, %v1343_v43, %v5444_v39  ;;  %v3615_v41 = vmul.f32 0.26601171, %v3524_v11  ;;  %v1456_v14 = vmul.f32 0.21300554, %v1283_v44 }
 0x10e   : > { %v929_v29 = vadd.f32 %v911_v4, %v888_v60  ;;  %5445 = vst [vmem:[#allocation37_spill] sm:$0xff] %v3612_v36  ;;  %v1363_v55 = vadd.f32 %v1345_v0, %v1322_v62  ;;  %v1501_v39 = vmul.f32 0.26601171, %v1283_v44  ;;  %v5446_v13 = vrot.slane %v3573_v31, 3 }
 0x10f   : > { %v997_v2 = vrot.slane %v981_v49, 4  ;;  %v5447_v17 = vrot.slane %v3584_v3, 2  ;;  %v1427_v20 = vrot.slane %v1411_v6, 3  ;;  %v1042_v43 = vrot.slane %v1026_v47, 5 }
 0x110   : > { %v954_v4 = vsel %vm480_vm3, %v952_v27, %v5446_v13  ;;  %v5276_v62 = vrot.slane %v3615_v41, 5  ;;  %v1071_v16 = vrot.slane %v981_v49, 6  ;;  %v3630_v13 = vadd.f32 %v660_v52, %v3459_v10 }
 0x111   : > { %v1386_v60 = vsel %vm436_vm2, %v1384_v18, %v5447_v17  ;;  %v974_v33 = vadd.f32 %v954_v4, %v929_v29  ;;  %v1472_v57 = vrot.slane %v1456_v14, 4  ;;  %v1517_v18 = vrot.slane %v1501_v39, 5  ;;  %v818_v17 = vpop.f32.mrf.mxu1 }
 0x112   : > { %5448 = vst [vmem:[#allocation38_spill] sm:$0xff] %v3630_v13  ;;  %v1404_v27 = vadd.f32 %v1386_v60, %v1363_v55  ;;  %v5449_v12 = vrot.slane %v3576_v7, 4  ;;  %v5450_v29 = vrot.slane %v3596_v51, 3  ;;  %v1546_v44 = vrot.slane %v1456_v14, 6 }
 0x113   : > { %v5451_v49 = vrot.slane %v3590_v32, 5  ;;  %v1575_v52 = vrot.slane %v1411_v6, 7  ;;  %v3642_v55 = vmul.f32 0.007598758, %v2990_v42  ;;  %v5452_v39 = vrot.slane %v3576_v7, 6 }
 0x114   : > { %v999_v11 = vsel %vm526_vm4, %v997_v2, %v5449_v12  ;;  %v1429_v4 = vsel %vm480_vm3, %v1427_v20, %v5450_v29  ;;  %v3649_v12 = vmul.f32 0.0010283801, %v2990_v42  ;;  %v856_v2 = vmul.f32 0.007598758, %v818_v17 }
 0x115   : > { %v1019_v0 = vadd.f32 %v999_v11, %v974_v33  ;;  %v1044_v10 = vsel %vm572_vm5, %v1042_v43, %v5451_v49  ;;  %v3647_v60 = vsel %vm602_vm6, %v1071_v16, %v5452_v39  ;;  %v3651_v47 = vmul.f32 0.036000773, %v818_v17  ;;  %v3659_v43 = vpop.f32.mrf.mxu0 }
 0x116   : > { %5453 = vst [vmem:[#allocation39_spill] sm:$0xff] %v3647_v60  ;;  %5454 = vst [vmem:[#allocation40_spill] sm:$0xff] %v3649_v12  ;;  %v1449_v20 = vadd.f32 %v1429_v4, %v1404_v27  ;;  %v5455_v33 = vrot.slane %v3608_v24, 4  ;;  %v1519_v6 = vsel %vm572_vm5, %v1517_v18, %v5276_v62  ;;  %v3661_v11 = vmul.f32 0.10936069, %v818_v17 }
 0x117   : > { %v5457_v16 = vrot.slane %v3608_v24, 6  ;;  %v3667_v49 = vmul.f32 0.007598758, %v3659_v43  ;;  %v871_v27 = vrot.slane %v856_v2, 1  ;;  %v912_v4 = vrot.slane %v3651_v47, 2 }
 0x118   : > { %v1474_v14 = vsel %vm526_vm4, %v1472_v57, %v5455_v33  ;;  %5456 = vst [vmem:[#allocation41_spill] sm:$0xff] %v3661_v11  ;;  %v3670_v39 = vadd.f32 %v1044_v10, %v1019_v0  ;;  %v5459_v57 = vrot.slane %v3596_v51, 7  ;;  %v3676_v62 = vmul.f32 0.036000773, %v2990_v42 }
 0x119   : > { %v1548_v29 = vsel %vm602_vm6, %v1546_v44, %v5457_v16  ;;  %v3678_v13 = vmul.f32 0.10936069, %v2990_v42  ;;  %v5462_v44 = vrot.slane %v3543_v54, 1  ;;  %v955_v2 = vrot.slane %v3661_v11, 3 }
 0x11a   : > { %5458 = vst [vmem:[#allocation42_spill] sm:$0xff] %v3670_v39  ;;  %v1577_v18 = vsel %vm632_vm7, %v1575_v52, %v5459_v57  ;;  %5460 = vst [vmem:[#allocation43_spill] sm:$0xff] %v3676_v62  ;;  %v3686_v8 = vmul.f32 0.21300554, %v818_v17  ;;  %v1494_v0 = vadd.f32 %v1474_v14, %v1449_v20  ;;  %v3688_v10 = vmul.f32 0.21300554, %v2990_v42  ;;  %v1293_v57 = vpop.f32.mrf.mxu0 }
 0x11b   : > { %5461 = vst [vmem:[#allocation44_spill] sm:$0xff] %v3678_v13  ;;  %v3683_v16 = vsel %vm394_vm1, %v5462_v44, %v871_v27  ;;  %v3690_v25 = vmul.f32 0.26601171, %v2990_v42  ;;  %v3697_v44 = vmul.f32 0.036000773, %v3659_v43  ;;  %v5464_v35 = vrot.slane %v3553_v61, 2 }
 0x11c   : > { %5463 = vst [vmem:[#allocation45_spill] sm:$0xff] %v3683_v16  ;;  %v889_v52 = vadd.f32 %v3683_v16, %v3558_v28  ;;  %v3702_v20 = vmul.f32 0.0010283801, %v818_v17  ;;  %v5466_v42 = vrot.slane %v3642_v55, 1  ;;  %v3709_v63 = vmul.f32 0.26601171, %v818_v17 }
 0x11d   : > { %v913_v30 = vsel %vm436_vm2, %v5464_v35, %v912_v4  ;;  %v5468_v33 = vrot.slane %v3573_v31, 3  ;;  %v1000_v50 = vrot.slane %v3686_v8, 4  ;;  %v1331_v21 = vmul.f32 0.007598758, %v1293_v57 }
 0x11e   : > { %5465 = vst [vmem:[#allocation46_spill] sm:$0xff] %v3702_v20  ;;  %v3707_v14 = vsel %vm394_vm1, %v871_v27, %v5466_v42  ;;  %v930_v26 = vadd.f32 %v913_v30, %v889_v52  ;;  %v3715_v38 = vmul.f32 0.036000773, %v1293_v57  ;;  %v1539_v35 = vadd.f32 %v1519_v6, %v1494_v0 }
 0x11f   : > { %5467 = vst [vmem:[#allocation47_spill] sm:$0xff] %v3707_v14  ;;  %v956_v54 = vsel %vm480_vm3, %v5468_v33, %v955_v2  ;;  %v3720_v27 = vmul.f32 0.10936069, %v3659_v43  ;;  %v890_v30 = vadd.f32 %v3707_v14, %v3702_v20  ;;  %v3724_v17 = vmul.f32 0.0010283801, %v1293_v57 }
 0x120   : > { %v975_v23 = vadd.f32 %v956_v54, %v930_v26  ;;  %v1346_v33 = vrot.slane %v1331_v21, 1  ;;  %v1387_v6 = vrot.slane %v3715_v38, 2  ;;  %v3729_v0 = vmul.f32 0.10936069, %v1293_v57 }
 0x121   : > { %5469 = vst [vmem:[#allocation48_spill] sm:$0xff] %v3724_v17  ;;  %v5470_v40 = vrot.slane %v3576_v7, 4  ;;  %v1045_v54 = vrot.slane %v3709_v63, 5  ;;  %v5471_v34 = vrot.slane %v3563_v15, 1  ;;  %v5472_v21 = vrot.slane %v3667_v49, 1 }
 0x122   : > { %v1568_v42 = vadd.f32 %v1548_v29, %v1539_v35  ;;  %v3744_v9 = vmul.f32 0.21300554, %v3659_v43  ;;  %v5473_v37 = vrot.slane %v3676_v62, 2  ;;  %v5475_v35 = vrot.slane %v3697_v44, 2 }
 0x123   : > { %v1001_v26 = vsel %vm526_vm4, %v5470_v40, %v1000_v50  ;;  %v1347_v53 = vsel %vm394_vm1, %v5471_v34, %v1346_v33  ;;  %v3741_v52 = vsel %vm394_vm1, %v1346_v33, %v5472_v21  ;;  %v5474_v33 = vrot.slane %v3584_v3, 2 }
 0x124   : > { %v915_v45 = vsel %vm436_vm2, %v912_v4, %v5473_v37  ;;  %v1020_v40 = vadd.f32 %v1001_v26, %v975_v23  ;;  %v1364_v15 = vadd.f32 %v1347_v53, %v3612_v36  ;;  %v1365_v34 = vadd.f32 %v3741_v52, %v3724_v17 }
 0x125   : > { %v931_v14 = vadd.f32 %v915_v45, %v890_v30  ;;  %v1388_v29 = vsel %vm436_vm2, %v5474_v33, %v1387_v6  ;;  %v1390_v21 = vsel %vm436_vm2, %v1387_v6, %v5475_v35  ;;  %v1430_v28 = vrot.slane %v3729_v0, 3 }
 0x126   : > { %v1458_v37 = vmul.f32 0.21300554, %v1293_v57  ;;  %v3762_v45 = vmul.f32 0.0010283801, %v3659_v43  ;;  %v5477_v4 = vrot.slane %v3590_v32, 5  ;;  %v1074_v26 = vrot.slane %v3686_v8, 6 }
 0x127   : > { %v3770_v63 = vmul.f32 0.26601171, %v3659_v43  ;;  %v5478_v6 = vrot.slane %v3678_v13, 3  ;;  %v1597_v23 = vadd.f32 %v1577_v18, %v1568_v42  ;;  %v1405_v61 = vadd.f32 %v1388_v29, %v1364_v15 }
 0x128   : > { %5476 = vst [vmem:[#allocation49_spill] sm:$0xff] %v3762_v45  ;;  %v1046_v30 = vsel %vm572_vm5, %v5477_v4, %v1045_v54  ;;  %v1406_v48 = vadd.f32 %v1390_v21, %v1365_v34  ;;  %v5479_v32 = vrot.slane %v3596_v51, 3  ;;  %v5480_v8 = vrot.slane %v3720_v27, 3 }
 0x129   : > { %v958_v35 = vsel %vm480_vm3, %v955_v2, %v5478_v6  ;;  %v1065_v36 = vadd.f32 %v1046_v30, %v1020_v40  ;;  %v1475_v60 = vrot.slane %v1458_v37, 4  ;;  %v1503_v43 = vmul.f32 0.26601171, %v1293_v57  ;;  %v2993_v6 = vpop.f32.mrf.mxu1 }
 0x12a   : > { %v976_v16 = vadd.f32 %v958_v35, %v931_v14  ;;  %v1431_v4 = vsel %vm480_vm3, %v5479_v32, %v1430_v28  ;;  %v1433_v33 = vsel %vm480_vm3, %v1430_v28, %v5480_v8  ;;  %v5302_v39 = vrot.slane %v3690_v25, 5 }
 0x12b   : > { %v5301_v5 = vrot.slane %v3688_v10, 6  ;;  %v5481_v2 = vrot.slane %v3576_v7, 6  ;;  %v5298_v14 = vrot.slane %v3661_v11, 7  ;;  %v5482_v15 = vrot.slane %v3688_v10, 4 }
 0x12c   : > { %v1450_v29 = vadd.f32 %v1431_v4, %v1405_v61  ;;  %v1451_v21 = vadd.f32 %v1433_v33, %v1406_v48  ;;  %v1605_v30 = vadd.f32 %v1597_v23, %v3584_v3  ;;  %v5483_v7 = vrot.slane %v3608_v24, 4 }
 0x12d   : > { %v1075_v18 = vsel %vm602_vm6, %v5481_v2, %v1074_v26  ;;  %v1003_v28 = vsel %vm526_vm4, %v1000_v50, %v5482_v15  ;;  %v5484_v32 = vrot.slane %v3744_v9, 4  ;;  %v1520_v2 = vrot.slane %v1503_v43, 5 }
 0x12e   : > { %v1094_v34 = vadd.f32 %v1075_v18, %v1065_v36  ;;  %v1021_v57 = vadd.f32 %v1003_v28, %v976_v16  ;;  %v1476_v35 = vsel %vm526_vm4, %v5483_v7, %v1475_v60  ;;  %v1549_v40 = vrot.slane %v1458_v37, 6  ;;  %v828_v18 = vpop.f32.mrf.mxu1 }
 0x12f   : > { %v1478_v8 = vsel %vm526_vm4, %v1475_v60, %v5484_v32  ;;  %v5300_v42 = vrot.slane %v3744_v9, 6  ;;  %v5299_v50 = vrot.slane %v3720_v27, 7  ;;  %v5485_v36 = vrot.slane %v3573_v31, 7 }
 0x130   : > { %v1578_v3 = vrot.slane %v3729_v0, 7  ;;  %v1048_v48 = vsel %vm572_vm5, %v1045_v54, %v5302_v39  ;;  %v3813_v60 = vsel %vm602_vm6, %v1074_v26, %v5301_v5  ;;  %v1495_v33 = vadd.f32 %v1476_v35, %v1450_v29 }
 0x131   : > { %v1104_v61 = vsel %vm632_vm7, %v5485_v36, %v5298_v14  ;;  %5486 = vst [vmem:[#allocation50_spill] sm:$0xff] %v3813_v60  ;;  %v3816_v23 = vadd.f32 %v1048_v48, %v1021_v57  ;;  %v1496_v4 = vadd.f32 %v1478_v8, %v1451_v21  ;;  %v3818_v43 = vadd.f32 %v1605_v30, %v1347_v53 }
 0x132   : > { %v1123_v16 = vadd.f32 %v1104_v61, %v1094_v34  ;;  %v5489_v0 = vrot.slane %v3615_v41, 5  ;;  %v5490_v54 = vrot.slane %v3770_v63, 5  ;;  %v5491_v26 = vrot.slane %v3608_v24, 6 }
 0x133   : > { %5487 = vst [vmem:[#allocation51_spill] sm:$0xff] %v3816_v23  ;;  %5488 = vst [vmem:[#allocation52_spill] sm:$0xff] %v3818_v43  ;;  %v1552_v53 = vsel %vm602_vm6, %v1549_v40, %v5300_v42  ;;  %v5492_v29 = vrot.slane %v3596_v51, 7  ;;  %v3836_v21 = vmul.f32 0.007598758, %v2993_v6  ;;  %v1581_v24 = vsel %vm632_vm7, %v1578_v3, %v5299_v50 }
 0x134   : > { %v1521_v15 = vsel %vm572_vm5, %v5489_v0, %v1520_v2  ;;  %v1523_v28 = vsel %vm572_vm5, %v1520_v2, %v5490_v54  ;;  %v1550_v34 = vsel %vm602_vm6, %v5491_v26, %v1549_v40  ;;  %v3838_v30 = vmul.f32 0.036000773, %v2993_v6  ;;  %v3848_v2 = vpop.f32.mrf.mxu0 }
 0x135   : > { %v1579_v41 = vsel %vm632_vm7, %v5492_v29, %v1578_v3  ;;  %v3841_v7 = vadd.f32 %v1123_v16, %v3651_v47  ;;  %v3846_v35 = vmul.f32 0.0010283801, %v2993_v6  ;;  %v858_v32 = vmul.f32 0.007598758, %v828_v18 }
 0x136   : > { %5493 = vst [vmem:[#allocation53_spill] sm:$0xff] %v3838_v30  ;;  %v1540_v8 = vadd.f32 %v1521_v15, %v1495_v33  ;;  %v1541_v40 = vadd.f32 %v1523_v28, %v1496_v4  ;;  %v3850_v51 = vmul.f32 0.036000773, %v828_v18  ;;  %v3852_v36 = vmul.f32 0.10936069, %v828_v18  ;;  %v1303_v57 = vpop.f32.mrf.mxu0 }
 0x137   : > { %5494 = vst [vmem:[#allocation54_spill] sm:$0xff] %v3841_v7  ;;  %5495 = vst [vmem:[#allocation55_spill] sm:$0xff] %v3846_v35  ;;  %v3854_v61 = vmul.f32 0.10936069, %v2993_v6  ;;  %v3856_v48 = vmul.f32 0.21300554, %v2993_v6  ;;  %v3860_v16 = vadd.f32 %v3367_v58, %v3388_v22 }
 0x138   : > { %5496 = vst [vmem:[#allocation56_spill] sm:$0xff] %v3852_v36  ;;  %v875_v47 = vrot.slane %v858_v32, 1  ;;  %v5303_v3 = vrot.slane %v3836_v21, 1  ;;  %v916_v4 = vrot.slane %v3850_v51, 2  ;;  %v3865_v0 = vmul.f32 0.21300554, %v828_v18 }
 0x139   : > { %5497 = vst [vmem:[#allocation57_spill] sm:$0xff] %v3854_v61  ;;  %v3867_v15 = vmul.f32 0.26601171, %v2993_v6  ;;  %v3870_v54 = vmul.f32 0.007598758, %v3848_v2  ;;  %v5498_v28 = vrot.slane %v3642_v55, 1  ;;  %v1569_v22 = vadd.f32 %v1550_v34, %v1540_v8 }
 0x13a   : > { %v959_v58 = vrot.slane %v3852_v36, 3  ;;  %v1570_v29 = vadd.f32 %v1552_v53, %v1541_v40  ;;  %v3884_v50 = vmul.f32 0.036000773, %v3848_v2  ;;  %v5500_v55 = vrot.slane %v3676_v62, 2 }
 0x13b   : > { %v3875_v26 = vsel %vm394_vm1, %v5498_v28, %v875_v47  ;;  %v3892_v34 = vsel %vm394_vm1, %v875_v47, %v5303_v3  ;;  %v1004_v8 = vrot.slane %v3865_v0, 4  ;;  %v3895_v40 = vmul.f32 0.26601171, %v828_v18 }
 0x13c   : > { %5499 = vst [vmem:[#allocation58_spill] sm:$0xff] %v3875_v26  ;;  %v891_v14 = vadd.f32 %v3875_v26, %v3649_v12  ;;  %v917_v28 = vsel %vm436_vm2, %v5500_v55, %v916_v4  ;;  %5501 = vst [vmem:[#allocation59_spill] sm:$0xff] %v3892_v34  ;;  %v3898_v42 = vmul.f32 0.0010283801, %v828_v18  ;;  %v5503_v37 = vrot.slane %v3678_v13, 3 }
 0x13d   : > { %v1333_v6 = vmul.f32 0.007598758, %v1303_v57  ;;  %v3905_v3 = vmul.f32 0.036000773, %v1303_v57  ;;  %v1049_v39 = vrot.slane %v3895_v40, 5  ;;  %v5507_v26 = vrot.slane %v3870_v54, 1 }
 0x13e   : > { %v932_v53 = vadd.f32 %v917_v28, %v891_v14  ;;  %5502 = vst [vmem:[#allocation60_spill] sm:$0xff] %v3898_v42  ;;  %v960_v5 = vsel %vm480_vm3, %v5503_v37, %v959_v58  ;;  %v3909_v28 = vmul.f32 0.10936069, %v3848_v2  ;;  %v892_v18 = vadd.f32 %v3892_v34, %v3898_v42 }
 0x13f   : > { %v1350_v33 = vrot.slane %v1333_v6, 1  ;;  %v5504_v37 = vrot.slane %v3688_v10, 4  ;;  %v1391_v6 = vrot.slane %v3905_v3, 2  ;;  %v3931_v32 = vmul.f32 0.10936069, %v1303_v57 }
 0x140   : > { %v977_v47 = vadd.f32 %v960_v5, %v932_v53  ;;  %v3918_v5 = vmul.f32 0.0010283801, %v1303_v57  ;;  %v5506_v53 = vrot.slane %v3667_v49, 1  ;;  %v1598_v62 = vadd.f32 %v1579_v41, %v1569_v22 }
 0x141   : > { %v1005_v55 = vsel %vm526_vm4, %v5504_v37, %v1004_v8  ;;  %v3928_v34 = vsel %vm394_vm1, %v1350_v33, %v5507_v26  ;;  %v3934_v37 = vmul.f32 0.0010283801, %v3848_v2  ;;  %v5509_v40 = vrot.slane %v3838_v30, 2 }
 0x142   : > { %5505 = vst [vmem:[#allocation61_spill] sm:$0xff] %v3918_v5  ;;  %v3923_v14 = vsel %vm394_vm1, %v5506_v53, %v1350_v33  ;;  %v1022_v11 = vadd.f32 %v1005_v55, %v977_v47  ;;  %v1599_v53 = vadd.f32 %v1581_v24, %v1570_v29  ;;  %v3941_v23 = vmul.f32 0.21300554, %v3848_v2 }
 0x143   : > { %5508 = vst [vmem:[#allocation62_spill] sm:$0xff] %v3934_v37  ;;  %v919_v49 = vsel %vm436_vm2, %v916_v4, %v5509_v40  ;;  %v5510_v26 = vrot.slane %v3690_v25, 5  ;;  %v1078_v41 = vrot.slane %v3865_v0, 6  ;;  %v1366_v22 = vadd.f32 %v3923_v14, %v3762_v45 }
 0x144   : > { %v933_v33 = vadd.f32 %v919_v49, %v892_v18  ;;  %v1367_v4 = vadd.f32 %v3928_v34, %v3918_v5  ;;  %v5511_v24 = vrot.slane %v3697_v44, 2  ;;  %v5512_v55 = vrot.slane %v3884_v50, 2 }
 0x145   : > { %v1050_v12 = vsel %vm572_vm5, %v5510_v26, %v1049_v39  ;;  %v1434_v25 = vrot.slane %v3931_v32, 3  ;;  %v1460_v18 = vmul.f32 0.21300554, %v1303_v57  ;;  %v3959_v40 = vmul.f32 0.26601171, %v3848_v2 }
 0x146   : > { %v1392_v29 = vsel %vm436_vm2, %v5511_v24, %v1391_v6  ;;  %v1394_v47 = vsel %vm436_vm2, %v1391_v6, %v5512_v55  ;;  %v5513_v0 = vrot.slane %v3854_v61, 3  ;;  %v1067_v26 = vadd.f32 %v1050_v12, %v1022_v11 }
 0x147   : > { %v5514_v60 = vrot.slane %v3285_v59, 7  ;;  %v5515_v45 = vrot.slane %v3291_v1, 7  ;;  %v1606_v6 = vadd.f32 %v1598_v62, %v3715_v38  ;;  %v1505_v17 = vmul.f32 0.26601171, %v1303_v57 }
 0x148   : > { %v962_v49 = vsel %vm480_vm3, %v959_v58, %v5513_v0  ;;  %v5320_v2 = vrot.slane %v3941_v23, 4  ;;  %v5316_v7 = vrot.slane %v3852_v36, 7  ;;  %v1407_v20 = vadd.f32 %v1392_v29, %v1366_v22 }
 0x149   : > { %v3969_v24 = vsel %vm632_vm7, %v5515_v45, %v5514_v60  ;;  %v978_v43 = vadd.f32 %v962_v49, %v933_v33  ;;  %v1408_v58 = vadd.f32 %v1394_v47, %v1367_v4  ;;  %v5516_v12 = vrot.slane %v3688_v10, 6  ;;  %v2996_v4 = vpop.f32.mrf.mxu1 }
 0x14a   : > { %v5517_v1 = vrot.slane %v3720_v27, 3  ;;  %v5518_v38 = vrot.slane %v3909_v28, 3  ;;  %v1479_v45 = vrot.slane %v1460_v18, 4  ;;  %v5319_v60 = vrot.slane %v3959_v40, 5 }
 0x14b   : > { %v1079_v59 = vsel %vm602_vm6, %v5516_v12, %v1078_v41  ;;  %v5318_v57 = vrot.slane %v3941_v23, 6  ;;  %v5519_v33 = vrot.slane %v3856_v48, 4  ;;  %v3990_v29 = vadd.f32 %v1606_v6, %v3741_v52 }
 0x14c   : > { %v1435_v11 = vsel %vm480_vm3, %v5517_v1, %v1434_v25  ;;  %v1437_v62 = vsel %vm480_vm3, %v1434_v25, %v5518_v38  ;;  %v1096_v10 = vadd.f32 %v1079_v59, %v1067_v26  ;;  %v5317_v47 = vrot.slane %v3909_v28, 7 }
 0x14d   : > { %v1007_v22 = vsel %vm526_vm4, %v1004_v8, %v5519_v33  ;;  %5520 = vst [vmem:[#allocation63_spill] sm:$0xff] %v3990_v29  ;;  %v1524_v49 = vrot.slane %v1505_v17, 5  ;;  %v1452_v12 = vadd.f32 %v1435_v11, %v1407_v20  ;;  %v1453_v25 = vadd.f32 %v1437_v62, %v1408_v58  ;;  %v838_v58 = vpop.f32.mrf.mxu1 }
 0x14e   : > { %v1023_v0 = vadd.f32 %v1007_v22, %v978_v43  ;;  %v1553_v1 = vrot.slane %v1460_v18, 6  ;;  %v1607_v38 = vadd.f32 %v1599_v53, %v3697_v44  ;;  %v5521_v55 = vrot.slane %v3678_v13, 7 }
 0x14f   : > { %v5522_v52 = vrot.slane %v3744_v9, 4  ;;  %v1482_v20 = vsel %vm526_vm4, %v1479_v45, %v5320_v2  ;;  %v5523_v17 = vrot.slane %v3867_v15, 5  ;;  %v5524_v43 = vrot.slane %v3856_v48, 6 }
 0x150   : > { %v1108_v8 = vsel %vm632_vm7, %v5521_v55, %v5316_v7  ;;  %v1582_v55 = vrot.slane %v3931_v32, 7  ;;  %v5527_v11 = vrot.slane %v3770_v63, 5  ;;  %v1498_v22 = vadd.f32 %v1482_v20, %v1453_v25  ;;  %v4047_v20 = vpop.f32.mrf.mxu0 }
 0x151   : > { %v1480_v6 = vsel %vm526_vm4, %v5522_v52, %v1479_v45  ;;  %v1052_v44 = vsel %vm572_vm5, %v1049_v39, %v5523_v17  ;;  %v4012_v53 = vsel %vm602_vm6, %v1078_v41, %v5524_v43  ;;  %v1125_v18 = vadd.f32 %v1108_v8, %v1096_v10 }
 0x152   : > { %5525 = vst [vmem:[#allocation64_spill] sm:$0xff] %v4012_v53  ;;  %v4015_v59 = vadd.f32 %v1052_v44, %v1023_v0  ;;  %v1525_v62 = vsel %vm572_vm5, %v5527_v11, %v1524_v49  ;;  %v1527_v45 = vsel %vm572_vm5, %v1524_v49, %v5319_v60  ;;  %v1497_v33 = vadd.f32 %v1480_v6, %v1452_v12 }
 0x153   : > { %v5528_v41 = vrot.slane %v3744_v9, 6  ;;  %v4027_v32 = vmul.f32 0.10936069, %v2996_v4  ;;  %v1556_v63 = vsel %vm602_vm6, %v1553_v1, %v5318_v57  ;;  %v4032_v0 = vmul.f32 0.21300554, %v2996_v4 }
 0x154   : > { %5526 = vst [vmem:[#allocation65_spill] sm:$0xff] %v4015_v59  ;;  %v860_v8 = vmul.f32 0.007598758, %v838_v58  ;;  %v4034_v52 = vmul.f32 0.036000773, %v838_v58  ;;  %v4037_v49 = vadd.f32 %v1125_v18, %v3850_v51  ;;  %v5531_v12 = vrot.slane %v3720_v27, 7 }
 0x155   : > { %v1554_v10 = vsel %vm602_vm6, %v5528_v41, %v1553_v1  ;;  %5529 = vst [vmem:[#allocation66_spill] sm:$0xff] %v4027_v32  ;;  %v4043_v25 = vadd.f32 %v1607_v38, %v3923_v14  ;;  %v4045_v6 = vmul.f32 0.26601171, %v2996_v4  ;;  %v1585_v1 = vsel %vm632_vm7, %v1582_v55, %v5317_v47 }
 0x156   : > { %5530 = vst [vmem:[#allocation67_spill] sm:$0xff] %v4037_v49  ;;  %v1583_v9 = vsel %vm632_vm7, %v5531_v12, %v1582_v55  ;;  %v4052_v17 = vrot.slane %v860_v8, 1  ;;  %v920_v51 = vrot.slane %v4034_v52, 2  ;;  %v4055_v44 = vmul.f32 0.10936069, %v838_v58 }
 0x157   : > { %5532 = vst [vmem:[#allocation68_spill] sm:$0xff] %v4043_v25  ;;  %v1542_v27 = vadd.f32 %v1525_v62, %v1497_v33  ;;  %v1543_v43 = vadd.f32 %v1527_v45, %v1498_v22  ;;  %v965_v18 = vrot.slane %v4027_v32, 3  ;;  %v4058_v14 = vmul.f32 0.007598758, %v2996_v4  ;;  %v1313_v22 = vpop.f32.mrf.mxu0 }
 0x158   : > { %5533 = vst [vmem:[#allocation69_spill] sm:$0xff] %v4052_v17  ;;  %5534 = vst [vmem:[#allocation70_spill] sm:$0xff] %v4055_v44  ;;  %v4062_v41 = vmul.f32 0.036000773, %v2996_v4  ;;  %v5537_v55 = vrot.slane %v3836_v21, 1  ;;  %v5540_v39 = vrot.slane %v3838_v30, 2 }
 0x159   : > { %5535 = vst [vmem:[#allocation71_spill] sm:$0xff] %v4058_v14  ;;  %v4072_v45 = vmul.f32 0.0010283801, %v2996_v4  ;;  %v4077_v11 = vmul.f32 0.10936069, %v4047_v20  ;;  %v1571_v62 = vadd.f32 %v1554_v10, %v1542_v27  ;;  %v5543_v14 = vrot.slane %v3854_v61, 3 }
 0x15a   : > { %5536 = vst [vmem:[#allocation72_spill] sm:$0xff] %v4062_v41  ;;  %v4068_v8 = vsel %vm394_vm1, %v5537_v55, %v4052_v17  ;;  %v921_v21 = vsel %vm436_vm2, %v5540_v39, %v920_v51  ;;  %v963_v55 = vrot.slane %v4055_v44, 3  ;;  %v4083_v7 = vmul.f32 0.21300554, %v838_v58 }
 0x15b   : > { %5538 = vst [vmem:[#allocation73_spill] sm:$0xff] %v4068_v8  ;;  %5539 = vst [vmem:[#allocation74_spill] sm:$0xff] %v4072_v45  ;;  %v893_v33 = vadd.f32 %v4068_v8, %v3846_v35  ;;  %v4087_v4 = vmul.f32 0.21300554, %v4047_v20  ;;  %v4090_v47 = vmul.f32 0.26601171, %v4047_v20  ;;  %v1572_v39 = vadd.f32 %v1556_v63, %v1543_v43 }
 0x15c   : > { %v4092_v12 = vmul.f32 0.0010283801, %v838_v58  ;;  %v4094_v60 = vmul.f32 0.0010283801, %v1313_v22  ;;  %v1335_v38 = vmul.f32 0.007598758, %v1313_v22  ;;  %v4114_v43 = vadd.f32 %v3969_v24, %v3860_v16 }
 0x15d   : > { %v934_v57 = vadd.f32 %v921_v21, %v893_v33  ;;  %v4096_v2 = vmul.f32 0.26601171, %v838_v58  ;;  %v4098_v41 = vmul.f32 0.036000773, %v1313_v22  ;;  %v4100_v32 = vmul.f32 0.10936069, %v1313_v22 }
 0x15e   : > { %5541 = vst [vmem:[#allocation75_spill] sm:$0xff] %v4092_v12  ;;  %5542 = vst [vmem:[#allocation76_spill] sm:$0xff] %v4094_v60  ;;  %v894_v26 = vadd.f32 %v4052_v17, %v4092_v12  ;;  %v964_v33 = vsel %vm480_vm3, %v5543_v14, %v963_v55  ;;  %v1008_v10 = vrot.slane %v4083_v7, 4  ;;  %v4108_v27 = vrot.slane %v1335_v38, 1 }
 0x15f   : > { %v1440_v21 = vrot.slane %v4077_v11, 3  ;;  %v979_v63 = vadd.f32 %v964_v33, %v934_v57  ;;  %v1395_v58 = vrot.slane %v4098_v41, 2  ;;  %v5544_v17 = vrot.slane %v3870_v54, 1 }
 0x160   : > { %v1369_v14 = vadd.f32 %v4108_v27, %v4094_v60  ;;  %v1438_v38 = vrot.slane %v4100_v32, 3  ;;  %v4125_v35 = vmul.f32 0.21300554, %v1313_v22  ;;  %v1600_v57 = vadd.f32 %v1583_v9, %v1571_v62 }
 0x161   : > { %v4120_v49 = vsel %vm394_vm1, %v5544_v17, %v4108_v27  ;;  %v1601_v33 = vadd.f32 %v1585_v1, %v1572_v39  ;;  %v5545_v16 = vrot.slane %v3884_v50, 2  ;;  %v935_v17 = vadd.f32 %v920_v51, %v894_v26 }
 0x162   : > { %v1368_v25 = vadd.f32 %v4120_v49, %v3934_v37  ;;  %v5546_v8 = vrot.slane %v3856_v48, 4  ;;  %v1053_v30 = vrot.slane %v4096_v2, 5  ;;  %v1485_v36 = vrot.slane %v4087_v4, 4 }
 0x163   : > { %v1396_v24 = vsel %vm436_vm2, %v5545_v16, %v1395_v58  ;;  %v1410_v62 = vadd.f32 %v1395_v58, %v1369_v14  ;;  %v5547_v39 = vrot.slane %v3909_v28, 3  ;;  %v1441_v16 = vsel %vm480_vm3, %v1438_v38, %v1440_v21 }
 0x164   : > { %v1009_v5 = vsel %vm526_vm4, %v5546_v8, %v1008_v10  ;;  %v1409_v1 = vadd.f32 %v1396_v24, %v1368_v25  ;;  %v1483_v54 = vrot.slane %v4125_v35, 4  ;;  %v1507_v26 = vmul.f32 0.26601171, %v1313_v22 }
 0x165   : > { %v1024_v9 = vadd.f32 %v1009_v5, %v979_v63  ;;  %v1439_v37 = vsel %vm480_vm3, %v5547_v39, %v1438_v38  ;;  %v1608_v51 = vadd.f32 %v1600_v57, %v3905_v3  ;;  %v1530_v8 = vrot.slane %v4090_v47, 5 }
 0x166   : > { %v1559_v2 = vrot.slane %v4087_v4, 6  ;;  %v966_v45 = vsel %vm480_vm3, %v963_v55, %v965_v18  ;;  %v4148_v5 = vmul.f32 0.007598758, %v4047_v20  ;;  %v5549_v63 = vrot.slane %v3867_v15, 5 }
 0x167   : > { %v980_v25 = vadd.f32 %v966_v45, %v935_v17  ;;  %v1082_v21 = vrot.slane %v4083_v7, 6  ;;  %v4155_v22 = vmul.f32 0.0010283801, %v4047_v20  ;;  %v1454_v14 = vadd.f32 %v1439_v37, %v1409_v1  ;;  %v3019_v17 = vpop.f32.mrf.mxu1 }
 0x168   : > { %5548 = vst [vmem:[#allocation77_spill] sm:$0xff] %v4148_v5  ;;  %v1054_v58 = vsel %vm572_vm5, %v5549_v63, %v1053_v30  ;;  %v1455_v47 = vadd.f32 %v1441_v16, %v1410_v62  ;;  %v1588_v4 = vrot.slane %v4077_v11, 7  ;;  %v5551_v18 = vrot.slane %v3941_v23, 4 }
 0x169   : > { %5550 = vst [vmem:[#allocation78_spill] sm:$0xff] %v4155_v22  ;;  %v1069_v3 = vadd.f32 %v1054_v58, %v1024_v9  ;;  %v1486_v45 = vsel %vm526_vm4, %v1483_v54, %v1485_v36  ;;  %v1528_v38 = vrot.slane %v1507_v26, 5  ;;  %v4163_v15 = vmul.f32 0.036000773, %v4047_v20 }
 0x16a   : > { %v1484_v55 = vsel %vm526_vm4, %v5551_v18, %v1483_v54  ;;  %v5553_v7 = vrot.slane %v4032_v0, 4  ;;  %v5337_v24 = vrot.slane %v4055_v44, 7  ;;  %v1609_v37 = vadd.f32 %v1601_v33, %v3884_v50 }
 0x16b   : > { %5552 = vst [vmem:[#allocation79_spill] sm:$0xff] %v4163_v15  ;;  %v4171_v11 = vadd.f32 %v1608_v51, %v3928_v34  ;;  %v5336_v9 = vrot.slane %v4148_v5, 1  ;;  %v5555_v36 = vrot.slane %v3856_v48, 6  ;;  %v1499_v39 = vadd.f32 %v1484_v55, %v1454_v14  ;;  %v1758_v14 = vpop.f32.mrf.mxu1 }
 0x16c   : > { %v1011_v57 = vsel %vm526_vm4, %v1008_v10, %v5553_v7  ;;  %v1500_v10 = vadd.f32 %v1486_v45, %v1455_v47  ;;  %v5556_v50 = vrot.slane %v3959_v40, 5  ;;  %v1531_v34 = vsel %vm572_vm5, %v1528_v38, %v1530_v8  ;;  %v3035_v8 = vpop.f32.mrf.mxu0 }
 0x16d   : > { %5554 = vst [vmem:[#allocation80_spill] sm:$0xff] %v4171_v11  ;;  %v1025_v1 = vadd.f32 %v1011_v57, %v980_v25  ;;  %v1083_v20 = vsel %vm602_vm6, %v5555_v36, %v1082_v21  ;;  %v1557_v26 = vrot.slane %v4125_v35, 6  ;;  %v5557_v51 = vrot.slane %v4045_v6, 5 }
 0x16e   : > { %v1098_v62 = vadd.f32 %v1083_v20, %v1069_v3  ;;  %v1529_v33 = vsel %vm572_vm5, %v5556_v50, %v1528_v38  ;;  %v5558_v25 = vrot.slane %v4032_v0, 6  ;;  %v5560_v58 = vrot.slane %v3854_v61, 7 }
 0x16f   : > { %v1056_v48 = vsel %vm572_vm5, %v1053_v30, %v5557_v51  ;;  %v1586_v3 = vrot.slane %v4100_v32, 7  ;;  %v4204_v30 = vsel %vm394_vm1, %v4108_v27, %v5336_v9  ;;  %v4207_v6 = vmul.f32 0.007598758, %v3019_v17 }
 0x170   : > { %v4190_v63 = vsel %vm602_vm6, %v1082_v21, %v5558_v25  ;;  %v1112_v40 = vsel %vm632_vm7, %v5560_v58, %v5337_v24  ;;  %v4198_v35 = vadd.f32 %v1056_v48, %v1025_v1  ;;  %v1544_v47 = vadd.f32 %v1529_v33, %v1499_v39 }
 0x171   : > { %5559 = vst [vmem:[#allocation81_spill] sm:$0xff] %v4190_v63  ;;  %v1127_v21 = vadd.f32 %v1112_v40, %v1098_v62  ;;  %v1545_v18 = vadd.f32 %v1531_v34, %v1500_v10  ;;  %v4210_v55 = vadd.f32 %v1609_v37, %v4120_v49  ;;  %v5563_v32 = vrot.slane %v3941_v23, 6  ;;  %v2233_v49 = vpop.f32.mrf.mxu0 }
 0x172   : > { %5561 = vst [vmem:[#allocation82_spill] sm:$0xff] %v4198_v35  ;;  %v1560_v38 = vsel %vm602_vm6, %v1557_v26, %v1559_v2  ;;  %v4216_v7 = vmul.f32 0.0010283801, %v3019_v17  ;;  %v1804_v27 = vmul.f32 0.007598758, %v1758_v14  ;;  %v5565_v57 = vrot.slane %v3909_v28, 7 }
 0x173   : > { %5562 = vst [vmem:[#allocation83_spill] sm:$0xff] %v4210_v55  ;;  %v1558_v45 = vsel %vm602_vm6, %v5563_v32, %v1557_v26  ;;  %v4221_v36 = vmul.f32 0.036000773, %v3019_v17  ;;  %v4223_v20 = vmul.f32 0.10936069, %v3019_v17  ;;  %v5339_v37 = vrot.slane %v4207_v6, 1 }
 0x174   : > { %5564 = vst [vmem:[#allocation84_spill] sm:$0xff] %v4216_v7  ;;  %v1587_v1 = vsel %vm632_vm7, %v5565_v57, %v1586_v3  ;;  %v1845_v62 = vmul.f32 0.036000773, %v1758_v14  ;;  %v4226_v23 = vmul.f32 0.21300554, %v3019_v17  ;;  %v1818_v2 = vrot.slane %v1804_v27, 1 }
 0x175   : > { %v4228_v39 = vmul.f32 0.26601171, %v3019_v17  ;;  %v4231_v10 = vadd.f32 %v1127_v21, %v4034_v52  ;;  %v1573_v50 = vadd.f32 %v1558_v45, %v1544_v47  ;;  %v1574_v28 = vadd.f32 %v1560_v38, %v1545_v18 }
 0x176   : > { %v1589_v33 = vsel %vm632_vm7, %v1586_v3, %v1588_v4  ;;  %v4234_v34 = vmul.f32 0.007598758, %v3035_v8  ;;  %v1797_v26 = vmul.f32 0.0010283801, %v1758_v14  ;;  %v1820_v51 = vsel %vm394_vm1, %v1818_v2, %v5339_v37  ;;  %v3022_v37 = vpop.f32.mrf.mxu1 }
 0x177   : > { %5566 = vst [vmem:[#allocation85_spill] sm:$0xff] %v4231_v10  ;;  %v2279_v48 = vmul.f32 0.007598758, %v2233_v49  ;;  %v5338_v25 = vrot.slane %v4221_v36, 2  ;;  %v1859_v58 = vrot.slane %v1845_v62, 2  ;;  %v5341_v52 = vrot.slane %v4223_v20, 3 }
 0x178   : > { %v1886_v40 = vmul.f32 0.10936069, %v1758_v14  ;;  %v1838_v3 = vadd.f32 %v1820_v51, %v1797_v26  ;;  %v4244_v47 = vadd.f32 %v1589_v33, %v1574_v28  ;;  %v4248_v45 = vmul.f32 0.036000773, %v3035_v8 }
 0x179   : > { %v1602_v38 = vadd.f32 %v1587_v1, %v1573_v50  ;;  %v5340_v27 = vrot.slane %v4234_v34, 1  ;;  %v2293_v57 = vrot.slane %v2279_v48, 1  ;;  %v2320_v62 = vmul.f32 0.036000773, %v2233_v49 }
 0x17a   : > { %5567 = vst [vmem:[#allocation86_spill] sm:$0xff] %v4244_v47  ;;  %v4251_v2 = vmul.f32 0.0010283801, %v3035_v8  ;;  %v1861_v54 = vsel %vm436_vm2, %v1859_v58, %v5338_v25  ;;  %v1902_v26 = vrot.slane %v1886_v40, 3  ;;  %v1931_v28 = vmul.f32 0.21300554, %v1758_v14 }
 0x17b   : > { %v4256_v33 = vmul.f32 0.10936069, %v3035_v8  ;;  %v4258_v51 = vmul.f32 0.21300554, %v3035_v8  ;;  %v1879_v9 = vadd.f32 %v1861_v54, %v1838_v3  ;;  %v1976_v24 = vmul.f32 0.26601171, %v1758_v14 }
 0x17c   : > { %v5342_v1 = vrot.slane %v4248_v45, 2  ;;  %v4261_v50 = vmul.f32 0.26601171, %v3035_v8  ;;  %v2272_v0 = vmul.f32 0.0010283801, %v2233_v49  ;;  %v1610_v16 = vadd.f32 %v1602_v38, %v4098_v41 }
 0x17d   : > { %v2295_v58 = vsel %vm394_vm1, %v2293_v57, %v5340_v27  ;;  %v2334_v17 = vrot.slane %v2320_v62, 2  ;;  %v4268_v25 = vmul.f32 0.10936069, %v2233_v49  ;;  %v1904_v54 = vsel %vm480_vm3, %v1902_v26, %v5341_v52 }
 0x17e   : > { %v1947_v14 = vrot.slane %v1931_v28, 4  ;;  %v2406_v3 = vmul.f32 0.21300554, %v2233_v49  ;;  %v2451_v8 = vmul.f32 0.26601171, %v2233_v49  ;;  %v5343_v48 = vrot.slane %v4256_v33, 3 }
 0x17f   : > { %v5344_v32 = vrot.slane %v4258_v51, 4  ;;  %v1924_v41 = vadd.f32 %v1904_v54, %v1879_v9  ;;  %v1992_v38 = vrot.slane %v1976_v24, 5  ;;  %v2021_v57 = vrot.slane %v1931_v28, 6  ;;  %v1768_v28 = vpop.f32.mrf.mxu1 }
 0x180   : > { %v2050_v62 = vrot.slane %v1886_v40, 7  ;;  %v2313_v27 = vadd.f32 %v2295_v58, %v2272_v0  ;;  %v2336_v49 = vsel %vm436_vm2, %v2334_v17, %v5342_v1  ;;  %v2377_v26 = vrot.slane %v4268_v25, 3 }
 0x181   : > { %v5568_v52 = vrot.slane %v4226_v23, 4  ;;  %v2422_v24 = vrot.slane %v2406_v3, 4  ;;  %v2467_v54 = vrot.slane %v2451_v8, 5  ;;  %v2496_v18 = vrot.slane %v2406_v3, 6 }
 0x182   : > { %v4286_v0 = vadd.f32 %v4204_v30, %v1610_v16  ;;  %v5570_v58 = vrot.slane %v4228_v39, 5  ;;  %v4291_v4 = vmul.f32 0.007598758, %v3022_v37  ;;  %v5571_v17 = vrot.slane %v4226_v23, 6 }
 0x183   : > { %v1949_v9 = vsel %vm526_vm4, %v1947_v14, %v5568_v52  ;;  %v5572_v52 = vrot.slane %v4223_v20, 7  ;;  %v2354_v3 = vadd.f32 %v2336_v49, %v2313_v27  ;;  %v4299_v8 = vmul.f32 0.0010283801, %v3022_v37 }
 0x184   : > { %5569 = vst [vmem:[#allocation87_spill] sm:$0xff] %v4286_v0  ;;  %v1969_v40 = vadd.f32 %v1949_v9, %v1924_v41  ;;  %v1994_v21 = vsel %vm572_vm5, %v1992_v38, %v5570_v58  ;;  %v2023_v1 = vsel %vm602_vm6, %v2021_v57, %v5571_v17  ;;  %v2379_v16 = vsel %vm480_vm3, %v2377_v26, %v5343_v48 }
 0x185   : > { %v2052_v14 = vsel %vm632_vm7, %v2050_v62, %v5572_v52  ;;  %5573 = vst [vmem:[#allocation88_spill] sm:$0xff] %v4299_v8  ;;  %v4305_v41 = vmul.f32 0.036000773, %v3022_v37  ;;  %v1806_v38 = vmul.f32 0.007598758, %v1768_v28  ;;  %v2424_v57 = vsel %vm526_vm4, %v2422_v24, %v5344_v32 }
 0x186   : > { %v5574_v9 = vrot.slane %v4261_v50, 5  ;;  %v5575_v27 = vrot.slane %v4258_v51, 6  ;;  %v4318_v58 = vmul.f32 0.036000773, %v1768_v28  ;;  %v2014_v26 = vadd.f32 %v1994_v21, %v1969_v40 }
 0x187   : > { %v5345_v17 = vrot.slane %v4291_v4, 1  ;;  %v1821_v52 = vrot.slane %v1806_v38, 1  ;;  %v4321_v30 = vmul.f32 0.10936069, %v1768_v28  ;;  %v2399_v48 = vadd.f32 %v2379_v16, %v2354_v3  ;;  %v3038_v38 = vpop.f32.mrf.mxu0 }
 0x188   : > { %v2469_v62 = vsel %vm572_vm5, %v2467_v54, %v5574_v9  ;;  %v4316_v49 = vsel %vm602_vm6, %v2496_v18, %v5575_v27  ;;  %v4323_v0 = vmul.f32 0.10936069, %v3022_v37  ;;  %v4325_v24 = vmul.f32 0.0010283801, %v1768_v28 }
 0x189   : > { %v1862_v54 = vrot.slane %v4318_v58, 2  ;;  %v4329_v32 = vmul.f32 0.21300554, %v3022_v37  ;;  %v5577_v18 = vrot.slane %v4207_v6, 1  ;;  %v4339_v40 = vsel %vm394_vm1, %v1821_v52, %v5345_v17 }
 0x18a   : > { %5576 = vst [vmem:[#allocation89_spill] sm:$0xff] %v4325_v24  ;;  %v4341_v3 = vmul.f32 0.26601171, %v3022_v37  ;;  %v1840_v9 = vadd.f32 %v4339_v40, %v4325_v24  ;;  %v4348_v6 = vmul.f32 0.0010283801, %v3038_v38  ;;  %v2043_v37 = vadd.f32 %v2023_v1, %v2014_v26 }
 0x18b   : > { %v4334_v21 = vsel %vm394_vm1, %v5577_v18, %v1821_v52  ;;  %v5579_v18 = vrot.slane %v4221_v36, 2  ;;  %v1905_v52 = vrot.slane %v4321_v30, 3  ;;  %v1933_v17 = vmul.f32 0.21300554, %v1768_v28 }
 0x18c   : > { %v1839_v27 = vadd.f32 %v4334_v21, %v4216_v7  ;;  %5578 = vst [vmem:[#allocation90_spill] sm:$0xff] %v4348_v6  ;;  %v2444_v22 = vadd.f32 %v2424_v57, %v2399_v48  ;;  %v5580_v16 = vrot.slane %v4305_v41, 2  ;;  %v5354_v47 = vrot.slane %v4323_v0, 3 }
 0x18d   : > { %v1863_v10 = vsel %vm436_vm2, %v5579_v18, %v1862_v54  ;;  %v4359_v63 = vmul.f32 0.007598758, %v3038_v38  ;;  %v4363_v55 = vmul.f32 0.036000773, %v3038_v38  ;;  %v4365_v1 = vmul.f32 0.10936069, %v3038_v38 }
 0x18e   : > { %v1865_v5 = vsel %vm436_vm2, %v1862_v54, %v5580_v16  ;;  %v1880_v15 = vadd.f32 %v1863_v10, %v1839_v27  ;;  %v4367_v48 = vmul.f32 0.21300554, %v3038_v38  ;;  %v5584_v57 = vrot.slane %v4223_v20, 3 }
 0x18f   : > { %5581 = vst [vmem:[#allocation91_spill] sm:$0xff] %v4359_v63  ;;  %v1881_v35 = vadd.f32 %v1865_v5, %v1840_v9  ;;  %5582 = vst [vmem:[#allocation92_spill] sm:$0xff] %v4363_v55  ;;  %v1950_v26 = vrot.slane %v1933_v17, 4  ;;  %v1978_v54 = vmul.f32 0.26601171, %v1768_v28  ;;  %v2072_v16 = vadd.f32 %v2052_v14, %v2043_v37  ;;  %v2243_v37 = vpop.f32.mrf.mxu0 }
 0x190   : > { %5583 = vst [vmem:[#allocation93_spill] sm:$0xff] %v4365_v1  ;;  %v1906_v10 = vsel %vm480_vm3, %v5584_v57, %v1905_v52  ;;  %v1908_v5 = vsel %vm480_vm3, %v1905_v52, %v5354_v47  ;;  %v4376_v18 = vadd.f32 %v2469_v62, %v2444_v22  ;;  %v4379_v44 = vmul.f32 0.26601171, %v3038_v38 }
 0x191   : > { %v1925_v9 = vadd.f32 %v1906_v10, %v1880_v15  ;;  %v1926_v60 = vadd.f32 %v1908_v5, %v1881_v35  ;;  %v5585_v15 = vrot.slane %v4226_v23, 4  ;;  %v1995_v62 = vrot.slane %v1978_v54, 5 }
 0x192   : > { %v4389_v52 = vmul.f32 0.10936069, %v2243_v37  ;;  %v5587_v35 = vrot.slane %v4329_v32, 4  ;;  %v2024_v5 = vrot.slane %v1933_v17, 6  ;;  %v2408_v12 = vmul.f32 0.21300554, %v2243_v37 }
 0x193   : > { %v1951_v22 = vsel %vm526_vm4, %v5585_v15, %v1950_v26  ;;  %v2053_v11 = vrot.slane %v4321_v30, 7  ;;  %v2453_v47 = vmul.f32 0.26601171, %v2243_v37  ;;  %v2080_v15 = vadd.f32 %v2072_v16, %v4221_v36  ;;  %v3025_v30 = vpop.f32.mrf.mxu1 }
 0x194   : > { %5586 = vst [vmem:[#allocation94_spill] sm:$0xff] %v4389_v52  ;;  %v1953_v38 = vsel %vm526_vm4, %v1950_v26, %v5587_v35  ;;  %v1970_v10 = vadd.f32 %v1951_v22, %v1925_v9  ;;  %v4399_v57 = vmul.f32 0.0010283801, %v2243_v37  ;;  %v5589_v61 = vrot.slane %v4228_v39, 5 }
 0x195   : > { %v1971_v14 = vadd.f32 %v1953_v38, %v1926_v60  ;;  %v4404_v17 = vmul.f32 0.007598758, %v2243_v37  ;;  %v4406_v9 = vmul.f32 0.036000773, %v2243_v37  ;;  %v2380_v60 = vrot.slane %v4389_v52, 3 }
 0x196   : > { %5588 = vst [vmem:[#allocation95_spill] sm:$0xff] %v4399_v57  ;;  %v1996_v26 = vsel %vm572_vm5, %v5589_v61, %v1995_v62  ;;  %v5590_v22 = vrot.slane %v4341_v3, 5  ;;  %v5591_v16 = vrot.slane %v4226_v23, 6  ;;  %v2425_v54 = vrot.slane %v2408_v12, 4 }
 0x197   : > { %v2015_v36 = vadd.f32 %v1996_v26, %v1970_v10  ;;  %v5592_v61 = vrot.slane %v4329_v32, 6  ;;  %v5593_v37 = vrot.slane %v4223_v20, 7  ;;  %v2470_v42 = vrot.slane %v2453_v47, 5 }
 0x198   : > { %v1998_v35 = vsel %vm572_vm5, %v1995_v62, %v5590_v22  ;;  %v2025_v38 = vsel %vm602_vm6, %v5591_v16, %v2024_v5  ;;  %v5594_v53 = vrot.slane %v4323_v0, 7  ;;  %v4425_v10 = vadd.f32 %v2080_v15, %v4334_v21 }
 0x199   : > { %v2016_v39 = vadd.f32 %v1998_v35, %v1971_v14  ;;  %v2027_v27 = vsel %vm602_vm6, %v2024_v5, %v5592_v61  ;;  %v2054_v28 = vsel %vm632_vm7, %v5593_v37, %v2053_v11  ;;  %v2499_v23 = vrot.slane %v2408_v12, 6  ;;  %v1778_v35 = vpop.f32.mrf.mxu1 }
 0x19a   : > { %v2056_v62 = vsel %vm632_vm7, %v2053_v11, %v5594_v53  ;;  %5595 = vst [vmem:[#allocation96_spill] sm:$0xff] %v4425_v10  ;;  %v663_v14 = vadd.f32 %v4114_v43, %v3283_v56  ;;  %v5596_v20 = vrot.slane %v4256_v33, 3  ;;  %v2044_v53 = vadd.f32 %v2025_v38, %v2015_v36 }
 0x19b   : > { %v5597_v11 = vrot.slane %v4365_v1, 3  ;;  %v5599_v56 = vrot.slane %v4258_v51, 4  ;;  %v4447_v21 = vmul.f32 0.007598758, %v3025_v30  ;;  %v2045_v15 = vadd.f32 %v2027_v27, %v2016_v39 }
 0x19c   : > { %v4434_v22 = vsel %vm480_vm3, %v5596_v20, %v2380_v60  ;;  %v5600_v16 = vrot.slane %v4367_v48, 4  ;;  %v5602_v36 = vrot.slane %v4261_v50, 5  ;;  %v5606_v20 = vrot.slane %v4258_v51, 6 }
 0x19d   : > { %v4440_v12 = vsel %vm480_vm3, %v2380_v60, %v5597_v11  ;;  %v4445_v43 = vsel %vm526_vm4, %v5599_v56, %v2425_v54  ;;  %v5604_v60 = vrot.slane %v4379_v44, 5  ;;  %v1808_v39 = vmul.f32 0.007598758, %v1778_v35 }
 0x19e   : > { %5598 = vst [vmem:[#allocation97_spill] sm:$0xff] %v4440_v12  ;;  %v4452_v61 = vsel %vm526_vm4, %v2425_v54, %v5600_v16  ;;  %v4457_v38 = vsel %vm572_vm5, %v5602_v36, %v2470_v42  ;;  %v4467_v11 = vsel %vm602_vm6, %v5606_v20, %v2499_v23  ;;  %v4470_v54 = vmul.f32 0.036000773, %v1778_v35 }
 0x19f   : > { %5601 = vst [vmem:[#allocation98_spill] sm:$0xff] %v4452_v61  ;;  %5603 = vst [vmem:[#allocation99_spill] sm:$0xff] %v4457_v38  ;;  %v4462_v37 = vsel %vm572_vm5, %v2470_v42, %v5604_v60  ;;  %v5608_v50 = vrot.slane %v4367_v48, 6  ;;  %v4477_v16 = vmul.f32 0.0010283801, %v3025_v30  ;;  %v3041_v42 = vpop.f32.mrf.mxu0  ;;  %v2073_v51 = vadd.f32 %v2054_v28, %v2044_v53 }
 0x1a0   : > { %5605 = vst [vmem:[#allocation100_spill] sm:$0xff] %v4462_v37  ;;  %5607 = vst [vmem:[#allocation101_spill] sm:$0xff] %v4467_v11  ;;  %v4479_v36 = vmul.f32 0.036000773, %v3025_v30  ;;  %v4481_v60 = vmul.f32 0.10936069, %v1778_v35  ;;  %v2074_v5 = vadd.f32 %v2056_v62, %v2045_v15  ;;  %v4517_v13 = vadd.f32 %v663_v14, %v3413_v19 }
 0x1a1   : > { %v4475_v56 = vsel %vm602_vm6, %v2499_v23, %v5608_v50  ;;  %v5360_v20 = vrot.slane %v4447_v21, 1  ;;  %v1825_v47 = vrot.slane %v1808_v39, 1  ;;  %v1866_v27 = vrot.slane %v4470_v54, 2 }
 0x1a2   : > { %5609 = vst [vmem:[#allocation102_spill] sm:$0xff] %v4475_v56  ;;  %v4485_v26 = vmul.f32 0.10936069, %v3025_v30  ;;  %v4487_v59 = vmul.f32 0.21300554, %v3025_v30  ;;  %v5611_v50 = vrot.slane %v4291_v4, 1  ;;  %v2081_v6 = vadd.f32 %v2073_v51, %v4318_v58 }
 0x1a3   : > { %v4489_v23 = vmul.f32 0.0010283801, %v1778_v35  ;;  %v4499_v28 = vsel %vm394_vm1, %v1825_v47, %v5360_v20  ;;  %v1909_v53 = vrot.slane %v4481_v60, 3  ;;  %v4502_v39 = vmul.f32 0.21300554, %v1778_v35 }
 0x1a4   : > { %v4494_v56 = vsel %vm394_vm1, %v5611_v50, %v1825_v47  ;;  %v5366_v62 = vrot.slane %v4479_v36, 2  ;;  %v4505_v15 = vmul.f32 0.26601171, %v3025_v30  ;;  %v2253_v50 = vpop.f32.mrf.mxu0  ;;  %v5612_v20 = vrot.slane %v4305_v41, 2 }
 0x1a5   : > { %5610 = vst [vmem:[#allocation103_spill] sm:$0xff] %v4489_v23  ;;  %v1841_v37 = vadd.f32 %v4494_v56, %v4299_v8  ;;  %v1842_v4 = vadd.f32 %v4499_v28, %v4489_v23  ;;  %v4519_v30 = vmul.f32 0.007598758, %v3041_v42  ;;  %v1980_v8 = vmul.f32 0.26601171, %v1778_v35 }
 0x1a6   : > { %v1867_v61 = vsel %vm436_vm2, %v5612_v20, %v1866_v27  ;;  %v1869_v29 = vsel %vm436_vm2, %v1866_v27, %v5366_v62  ;;  %v5613_v58 = vrot.slane %v4323_v0, 3  ;;  %v1954_v47 = vrot.slane %v4502_v39, 4 }
 0x1a7   : > { %v1882_v12 = vadd.f32 %v1867_v61, %v1841_v37  ;;  %v1883_v52 = vadd.f32 %v1869_v29, %v1842_v4  ;;  %v4528_v11 = vmul.f32 0.007598758, %v2253_v50  ;;  %v5367_v19 = vrot.slane %v4485_v26, 3 }
 0x1a8   : > { %v1910_v51 = vsel %vm480_vm3, %v5613_v58, %v1909_v53  ;;  %v4534_v27 = vadd.f32 %v2081_v6, %v4339_v40  ;;  %v4538_v61 = vmul.f32 0.036000773, %v3041_v42  ;;  %v4545_v62 = vmul.f32 0.036000773, %v2253_v50 }
 0x1a9   : > { %5614 = vst [vmem:[#allocation104_spill] sm:$0xff] %v4528_v11  ;;  %v1927_v38 = vadd.f32 %v1910_v51, %v1882_v12  ;;  %v1912_v4 = vsel %vm480_vm3, %v1909_v53, %v5367_v19  ;;  %v4547_v12 = vmul.f32 0.0010283801, %v3041_v42  ;;  %v5618_v6 = vrot.slane %v4329_v32, 4 }
 0x1aa   : > { %5615 = vst [vmem:[#allocation105_spill] sm:$0xff] %v4534_v27  ;;  %5616 = vst [vmem:[#allocation106_spill] sm:$0xff] %v4545_v62  ;;  %v1928_v40 = vadd.f32 %v1912_v4, %v1883_v52  ;;  %v1999_v35 = vrot.slane %v1980_v8, 5  ;;  %v4552_v29 = vmul.f32 0.10936069, %v3041_v42  ;;  %v2082_v14 = vadd.f32 %v2074_v5, %v4305_v41 }
 0x1ab   : > { %5617 = vst [vmem:[#allocation107_spill] sm:$0xff] %v4547_v12  ;;  %v1955_v51 = vsel %vm526_vm4, %v5618_v6, %v1954_v47  ;;  %v4554_v20 = vmul.f32 0.21300554, %v3041_v42  ;;  %v4558_v19 = vmul.f32 0.26601171, %v3041_v42  ;;  %v5619_v58 = vrot.slane %v4487_v59, 4 }
 0x1ac   : > { %v1972_v37 = vadd.f32 %v1955_v51, %v1927_v38  ;;  %v4563_v4 = vmul.f32 0.0010283801, %v2253_v50  ;;  %v5621_v6 = vrot.slane %v4519_v30, 1  ;;  %v5622_v8 = vrot.slane %v4528_v11, 1 }
 0x1ad   : > { %v1957_v52 = vsel %vm526_vm4, %v1954_v47, %v5619_v58  ;;  %v4573_v41 = vmul.f32 0.10936069, %v2253_v50  ;;  %v2410_v5 = vmul.f32 0.21300554, %v2253_v50  ;;  %v5625_v51 = vrot.slane %v4341_v3, 5 }
 0x1ae   : > { %5620 = vst [vmem:[#allocation108_spill] sm:$0xff] %v4563_v4  ;;  %v4570_v27 = vsel %vm394_vm1, %v5622_v8, %v5621_v6  ;;  %v1973_v42 = vadd.f32 %v1957_v52, %v1928_v40  ;;  %v2028_v47 = vrot.slane %v4502_v39, 6  ;;  %v2455_v58 = vmul.f32 0.26601171, %v2253_v50  ;;  %v3028_v52 = vpop.f32.mrf.mxu1 }
 0x1af   : > { %5623 = vst [vmem:[#allocation109_spill] sm:$0xff] %v4570_v27  ;;  %5624 = vst [vmem:[#allocation110_spill] sm:$0xff] %v4573_v41  ;;  %v2000_v53 = vsel %vm572_vm5, %v5625_v51, %v1999_v35  ;;  %v2057_v40 = vrot.slane %v4481_v60, 7  ;;  %v2317_v3 = vadd.f32 %v4570_v27, %v4563_v4  ;;  %v5626_v39 = vrot.slane %v4505_v15, 5 }
 0x1b0   : > { %v2017_v8 = vadd.f32 %v2000_v53, %v1972_v37  ;;  %v5627_v51 = vrot.slane %v4538_v61, 2  ;;  %v5628_v11 = vrot.slane %v4545_v62, 2  ;;  %v2384_v53 = vrot.slane %v4573_v41, 3  ;;  %v5631_v62 = vld [vmem:[#allocation2_spill] sm:$0xff] }
 0x1b1   : > { %v2002_v50 = vsel %vm572_vm5, %v1999_v35, %v5626_v39  ;;  %v2429_v6 = vrot.slane %v2410_v5, 4  ;;  %v5629_v60 = vrot.slane %v4329_v32, 6  ;;  %v2474_v55 = vrot.slane %v2455_v58, 5 }
 0x1b2   : > { %v2344_v37 = vsel %vm436_vm2, %v5628_v11, %v5627_v51  ;;  %v2018_v57 = vadd.f32 %v2002_v50, %v1973_v42  ;;  %v2503_v27 = vrot.slane %v2410_v5, 6  ;;  %v5630_v39 = vrot.slane %v3434_v46, 2 }
 0x1b3   : > { %v2029_v38 = vsel %vm602_vm6, %v5629_v60, %v2028_v47  ;;  %v5632_v7 = vrot.slane %v5631_v62, 2  ;;  %v5633_v42 = vrot.slane %v4487_v59, 6  ;;  %v5634_v50 = vrot.slane %v4323_v0, 7 }
 0x1b4   : > { %v2046_v63 = vadd.f32 %v2029_v38, %v2017_v8  ;;  %v4615_v58 = vadd.f32 %v2082_v14, %v4494_v56  ;;  %v2358_v38 = vadd.f32 %v2344_v37, %v2317_v3  ;;  %v1788_v8 = vpop.f32.mrf.mxu1  ;;  %v5636_v51 = vrot.slane %v4485_v26, 7 }
 0x1b5   : > { %v4606_v11 = vsel %vm436_vm2, %v5632_v7, %v5630_v39  ;;  %v2031_v32 = vsel %vm602_vm6, %v2028_v47, %v5633_v42  ;;  %v2058_v5 = vsel %vm632_vm7, %v5634_v50, %v2057_v40  ;;  %v5637_v7 = vrot.slane %v4365_v1, 3 }
 0x1b6   : > { %5635 = vst [vmem:[#allocation2_spill] sm:$0xff] %v4615_v58  ;;  %v2060_v62 = vsel %vm632_vm7, %v2057_v40, %v5636_v51  ;;  %v5639_v47 = vrot.slane %v4552_v29, 3  ;;  %v5640_v39 = vrot.slane %v4367_v48, 4  ;;  %v2047_v14 = vadd.f32 %v2031_v32, %v2018_v57 }
 0x1b7   : > { %v4623_v60 = vsel %vm480_vm3, %v5637_v7, %v2384_v53  ;;  %v5642_v3 = vrot.slane %v4554_v20, 4  ;;  %v5643_v40 = vrot.slane %v4379_v44, 5  ;;  %v5645_v50 = vrot.slane %v4367_v48, 6 }
 0x1b8   : > { %5638 = vst [vmem:[#allocation111_spill] sm:$0xff] %v4623_v60  ;;  %v2387_v0 = vsel %vm480_vm3, %v2384_v53, %v5639_v47  ;;  %v4631_v56 = vsel %vm526_vm4, %v5640_v39, %v2429_v6  ;;  %v2075_v53 = vadd.f32 %v2058_v5, %v2046_v63  ;;  %v5647_v7 = vrot.slane %v4558_v19, 5 }
 0x1b9   : > { %5641 = vst [vmem:[#allocation112_spill] sm:$0xff] %v4631_v56  ;;  %v2432_v37 = vsel %vm526_vm4, %v2429_v6, %v5642_v3  ;;  %v4639_v42 = vsel %vm572_vm5, %v5643_v40, %v2474_v55  ;;  %v4644_v51 = vsel %vm602_vm6, %v5645_v50, %v2503_v27  ;;  %v5648_v57 = vrot.slane %v4554_v20, 6 }
 0x1ba   : > { %5644 = vst [vmem:[#allocation113_spill] sm:$0xff] %v4639_v42  ;;  %5646 = vst [vmem:[#allocation114_spill] sm:$0xff] %v4644_v51  ;;  %v2477_v47 = vsel %vm572_vm5, %v2474_v55, %v5647_v7  ;;  %v1810_v6 = vmul.f32 0.007598758, %v1788_v8  ;;  %v2403_v44 = vadd.f32 %v2387_v0, %v2358_v38  ;;  %v4654_v39 = vmul.f32 0.10936069, %v3028_v52  ;;  %v4670_v7 = vpop.f32.mrf.mxu0 }
 0x1bb   : > { %v4652_v32 = vsel %vm602_vm6, %v2503_v27, %v5648_v57  ;;  %v4656_v3 = vmul.f32 0.036000773, %v1788_v8  ;;  %v4658_v48 = vmul.f32 0.10936069, %v1788_v8  ;;  %v4662_v5 = vmul.f32 0.21300554, %v3028_v52 }
 0x1bc   : > { %5649 = vst [vmem:[#allocation115_spill] sm:$0xff] %v4652_v32  ;;  %v4664_v55 = vrot.slane %v1810_v6, 1  ;;  %v4666_v50 = vmul.f32 0.26601171, %v3028_v52  ;;  %v4668_v27 = vmul.f32 0.036000773, %v3028_v52  ;;  %v2076_v0 = vadd.f32 %v2060_v62, %v2047_v14 }
 0x1bd   : > { %v1870_v38 = vrot.slane %v4656_v3, 2  ;;  %v4673_v57 = vmul.f32 0.0010283801, %v1788_v8  ;;  %v5651_v40 = vrot.slane %v4447_v21, 1  ;;  %v1913_v6 = vrot.slane %v4658_v48, 3 }
 0x1be   : > { %5650 = vst [vmem:[#allocation116_spill] sm:$0xff] %v4668_v27  ;;  %v4682_v35 = vmul.f32 0.21300554, %v1788_v8  ;;  %v2083_v10 = vadd.f32 %v2075_v53, %v4470_v54  ;;  %v2448_v51 = vadd.f32 %v2432_v37, %v2403_v44  ;;  %v1915_v41 = vrot.slane %v4654_v39, 3  ;;  %v2263_v44 = vpop.f32.mrf.mxu0 }
 0x1bf   : > { %v4679_v63 = vsel %vm394_vm1, %v5651_v40, %v4664_v55  ;;  %v4689_v32 = vmul.f32 0.007598758, %v3028_v52  ;;  %v1844_v21 = vadd.f32 %v4664_v55, %v4673_v57  ;;  %v5652_v40 = vrot.slane %v4479_v36, 2 }
 0x1c0   : > { %v1843_v62 = vadd.f32 %v4679_v63, %v4477_v16  ;;  %v1960_v56 = vrot.slane %v4662_v5, 4  ;;  %v2005_v54 = vrot.slane %v4666_v50, 5  ;;  %v4698_v37 = vmul.f32 0.0010283801, %v3028_v52 }
 0x1c1   : > { %v1871_v42 = vsel %vm436_vm2, %v5652_v40, %v1870_v38  ;;  %v4701_v4 = vmul.f32 0.10936069, %v4670_v7  ;;  %v5654_v14 = vrot.slane %v4485_v26, 3  ;;  %v1958_v58 = vrot.slane %v4682_v35, 4 }
 0x1c2   : > { %v1884_v53 = vadd.f32 %v1871_v42, %v1843_v62  ;;  %v1982_v23 = vmul.f32 0.26601171, %v1788_v8  ;;  %v4708_v40 = vadd.f32 %v2083_v10, %v4499_v28  ;;  %v4710_v1 = vadd.f32 %v2477_v47, %v2448_v51 }
 0x1c3   : > { %5653 = vst [vmem:[#allocation117_spill] sm:$0xff] %v4701_v4  ;;  %v1914_v60 = vsel %vm480_vm3, %v5654_v14, %v1913_v6  ;;  %v2034_v52 = vrot.slane %v4662_v5, 6  ;;  %v4715_v62 = vmul.f32 0.21300554, %v4670_v7  ;;  %v1885_v27 = vadd.f32 %v1870_v38, %v1844_v21 }
 0x1c4   : > { %5655 = vst [vmem:[#allocation118_spill] sm:$0xff] %v4708_v40  ;;  %5656 = vst [vmem:[#allocation119_spill] sm:$0xff] %v4710_v1  ;;  %v1929_v50 = vadd.f32 %v1914_v60, %v1884_v53  ;;  %v2285_v46 = vmul.f32 0.007598758, %v2263_v44  ;;  %v4719_v24 = vmul.f32 0.26601171, %v4670_v7  ;;  %v2084_v10 = vadd.f32 %v2076_v0, %v4479_v36 }
 0x1c5   : > { %v4722_v28 = vmul.f32 0.036000773, %v2263_v44  ;;  %v2390_v8 = vrot.slane %v4701_v4, 3  ;;  %v5658_v60 = vrot.slane %v4487_v59, 4  ;;  %v2003_v47 = vrot.slane %v1982_v23, 5 }
 0x1c6   : > { %v4728_v5 = vrot.slane %v2285_v46, 1  ;;  %v1916_v38 = vsel %vm480_vm3, %v1913_v6, %v1915_v41  ;;  %v4732_v14 = vmul.f32 0.10936069, %v2263_v44  ;;  %v4736_v0 = vmul.f32 0.036000773, %v4670_v7 }
 0x1c7   : > { %5657 = vst [vmem:[#allocation120_spill] sm:$0xff] %v4722_v28  ;;  %v1959_v51 = vsel %vm526_vm4, %v5658_v60, %v1958_v58  ;;  %v2345_v53 = vrot.slane %v4722_v28, 2  ;;  %v1930_v42 = vadd.f32 %v1916_v38, %v1885_v27  ;;  %v5660_v40 = vrot.slane %v4519_v30, 1  ;;  %v5663_v60 = vld [vmem:[#allocation39_spill] sm:$0xff] }
 0x1c8   : > { %v1974_v21 = vadd.f32 %v1959_v51, %v1929_v50  ;;  %5659 = vst [vmem:[#allocation121_spill] sm:$0xff] %v4736_v0  ;;  %v2435_v46 = vrot.slane %v4715_v62, 4  ;;  %v2480_v41 = vrot.slane %v4719_v24, 5  ;;  %v4746_v6 = vmul.f32 0.0010283801, %v2263_v44  ;;  %v5662_v50 = vld [vmem:[#allocation42_spill] sm:$0xff] }
 0x1c9   : > { %v4742_v23 = vsel %vm394_vm1, %v5660_v40, %v4728_v5  ;;  %v1093_v51 = vadd.f32 %v5663_v60, %v5662_v50  ;;  %v1961_v36 = vsel %vm526_vm4, %v1958_v58, %v1960_v56  ;;  %v5664_v0 = vrot.slane %v4505_v15, 5  ;;  %v5668_v60 = vld [vmem:[#allocation36_spill] sm:$0xff] }
 0x1ca   : > { %5661 = vst [vmem:[#allocation122_spill] sm:$0xff] %v4742_v23  ;;  %v2032_v30 = vrot.slane %v4682_v35, 6  ;;  %v2318_v40 = vadd.f32 %v4742_v23, %v4547_v12  ;;  %v5665_v1 = vrot.slane %v4538_v61, 2  ;;  %v2388_v28 = vrot.slane %v4732_v14, 3 }
 0x1cb   : > { %v2004_v27 = vsel %vm572_vm5, %v5664_v0, %v2003_v47  ;;  %v4761_v4 = vmul.f32 0.21300554, %v2263_v44  ;;  %v2509_v58 = vrot.slane %v4715_v62, 6  ;;  %v4765_v15 = vmul.f32 0.007598758, %v4670_v7 }
 0x1cc   : > { %v2019_v38 = vadd.f32 %v2004_v27, %v1974_v21  ;;  %v2346_v24 = vsel %vm436_vm2, %v5665_v1, %v2345_v53  ;;  %v1975_v56 = vadd.f32 %v1961_v36, %v1930_v42  ;;  %v2061_v35 = vrot.slane %v4658_v48, 7 }
 0x1cd   : > { %v4769_v0 = vmul.f32 0.0010283801, %v4670_v7  ;;  %v2319_v21 = vadd.f32 %v4728_v5, %v4746_v6  ;;  %v2457_v50 = vmul.f32 0.26601171, %v2263_v44  ;;  %v5667_v1 = vrot.slane %v3573_v31, 7 }
 0x1ce   : > { %v5669_v27 = vrot.slane %v5668_v60, 7  ;;  %v5670_v62 = vrot.slane %v4487_v59, 6  ;;  %v2359_v42 = vadd.f32 %v2346_v24, %v2318_v40  ;;  %v4783_v48 = vadd.f32 %v4606_v11, %v4517_v13  ;;  %v5674_v24 = vld [vmem:[#allocation31_spill] sm:$0xff] }
 0x1cf   : > { %5666 = vst [vmem:[#allocation42_spill] sm:$0xff] %v4769_v0  ;;  %v2006_v36 = vsel %vm572_vm5, %v2003_v47, %v2005_v54  ;;  %v5671_v44 = vrot.slane %v4552_v29, 3  ;;  %v2433_v60 = vrot.slane %v4761_v4, 4  ;;  %v2117_v13 = vrot.slane %v4673_v57, 2 }
 0x1d0   : > { %v1102_v23 = vsel %vm632_vm7, %v5669_v27, %v5667_v1  ;;  %v2033_v12 = vsel %vm602_vm6, %v5670_v62, %v2032_v30  ;;  %v2020_v59 = vadd.f32 %v2006_v36, %v1975_v56  ;;  %v5672_v27 = vrot.slane %v4485_v26, 7 }
 0x1d1   : > { %v1122_v7 = vadd.f32 %v1102_v23, %v1093_v51  ;;  %v2048_v0 = vadd.f32 %v2033_v12, %v2019_v38  ;;  %v2389_v31 = vsel %vm480_vm3, %v5671_v44, %v2388_v28  ;;  %v2035_v11 = vsel %vm602_vm6, %v2032_v30, %v2034_v52 }
 0x1d2   : > { %v2062_v40 = vsel %vm632_vm7, %v5672_v27, %v2061_v35  ;;  %v5673_v54 = vrot.slane %v4654_v39, 7  ;;  %v2360_v47 = vadd.f32 %v2345_v53, %v2319_v21  ;;  %v2478_v23 = vrot.slane %v2457_v50, 5 }
 0x1d3   : > { %v2391_v51 = vsel %vm480_vm3, %v2388_v28, %v2390_v8  ;;  %v2404_v38 = vadd.f32 %v2389_v31, %v2359_v42  ;;  %v1130_v62 = vadd.f32 %v1122_v7, %v5674_v24  ;;  %v5675_v56 = vrot.slane %v4404_v17, 1 }
 0x1d4   : > { %v2064_v12 = vsel %vm632_vm7, %v2061_v35, %v5673_v54  ;;  %v5676_v26 = vrot.slane %v4234_v34, 1  ;;  %v2077_v57 = vadd.f32 %v2062_v40, %v2048_v0  ;;  %v5677_v52 = vrot.slane %v4554_v20, 4 }
 0x1d5   : > { %v5678_v53 = vrot.slane %v4406_v9, 2  ;;  %v5679_v28 = vrot.slane %v4248_v45, 2  ;;  %v2049_v35 = vadd.f32 %v2035_v11, %v2020_v59  ;;  %v5680_v21 = vrot.slane %v4689_v32, 1 }
 0x1d6   : > { %v2297_v36 = vsel %vm394_vm1, %v5676_v26, %v5675_v56  ;;  %v2434_v39 = vsel %vm526_vm4, %v5677_v52, %v2433_v60  ;;  %v2097_v0 = vadd.f32 %v2084_v10, %v4679_v63  ;;  %v5681_v50 = vrot.slane %v4477_v16, 2  ;;  %v5687_v26 = vld [vmem:[#allocation46_spill] sm:$0xff] }
 0x1d7   : > { %v2314_v30 = vadd.f32 %v2297_v36, %v4251_v2  ;;  %v2338_v8 = vsel %vm436_vm2, %v5679_v28, %v5678_v53  ;;  %v2090_v34 = vsel %vm394_vm1, %v4664_v55, %v5680_v21  ;;  %v5682_v7 = vrot.slane %v4698_v37, 2  ;;  %v5683_v55 = vld [vmem:[#allocation45_spill] sm:$0xff] }
 0x1d8   : > { %v2118_v42 = vsel %vm436_vm2, %v5681_v50, %v2117_v13  ;;  %v2405_v31 = vadd.f32 %v2391_v51, %v2360_v47  ;;  %v2518_v59 = vadd.f32 %v4316_v49, %v4376_v18  ;;  %v2449_v40 = vadd.f32 %v2434_v39, %v2404_v38  ;;  %v5692_v28 = vld [vmem:[#allocation89_spill] sm:$0xff]  ;;  %v5696_v50 = vld [vmem:[#allocation91_spill] sm:$0xff] }
 0x1d9   : > { %v4826_v44 = vsel %vm436_vm2, %v2117_v13, %v5682_v7  ;;  %v2355_v27 = vadd.f32 %v2338_v8, %v2314_v30  ;;  %v2507_v11 = vrot.slane %v4761_v4, 6  ;;  %v1143_v54 = vadd.f32 %v1130_v62, %v5683_v55 }
 0x1da   : > { %v5684_v63 = vrot.slane %v4256_v33, 7  ;;  %v5685_v10 = vrot.slane %v4268_v25, 7  ;;  %v2085_v56 = vadd.f32 %v2077_v57, %v4656_v3  ;;  %v2436_v13 = vsel %vm526_vm4, %v2433_v60, %v2435_v46  ;;  %v5689_v57 = vld [vmem:[#allocation33_spill] sm:$0xff] }
 0x1db   : > { %v5686_v47 = vrot.slane %v4558_v19, 5  ;;  %v2400_v49 = vadd.f32 %v4434_v22, %v2355_v27  ;;  %v4843_v18 = vadd.f32 %v2064_v12, %v2049_v35  ;;  %v4845_v4 = vadd.f32 %v2118_v42, %v2097_v0  ;;  %v5694_v35 = vld [vmem:[#allocation84_spill] sm:$0xff]  ;;  %v5700_v27 = vld [vmem:[#allocation47_spill] sm:$0xff] }
 0x1dc   : > { %v2527_v24 = vsel %vm632_vm7, %v5685_v10, %v5684_v63  ;;  %v2481_v38 = vsel %vm572_vm5, %v2478_v23, %v2480_v41  ;;  %v5395_v62 = vrot.slane %v4732_v14, 7  ;;  %v5688_v3 = vrot.slane %v5687_v26, 2 }
 0x1dd   : > { %v2479_v51 = vsel %vm572_vm5, %v5686_v47, %v2478_v23  ;;  %v5690_v46 = vrot.slane %v5689_v57, 2  ;;  %v2445_v60 = vadd.f32 %v4445_v43, %v2400_v49  ;;  %v2547_v52 = vadd.f32 %v2527_v24, %v2518_v59  ;;  %v5701_v59 = vld [vmem:[#allocation54_spill] sm:$0xff]  ;;  %v5707_v24 = vld [vmem:[#allocation48_spill] sm:$0xff] }
 0x1de   : > { %v2450_v22 = vadd.f32 %v2436_v13, %v2405_v31  ;;  %v2494_v12 = vadd.f32 %v2479_v51, %v2449_v40  ;;  %v5691_v39 = vrot.slane %v4554_v20, 6  ;;  %v2098_v23 = vadd.f32 %v2090_v34, %v2085_v56  ;;  %v5699_v31 = vld [vmem:[#allocation96_spill] sm:$0xff]  ;;  %v5702_v34 = vld [vmem:[#allocation95_spill] sm:$0xff]  ;;  %v5709_v13 = vld [vmem:[#allocation37_spill] sm:$0xff] }
 0x1df   : > { %v1160_v19 = vsel %vm436_vm2, %v5690_v46, %v5688_v3  ;;  %v2510_v53 = vsel %vm602_vm6, %v2507_v11, %v2509_v58  ;;  %v5693_v8 = vrot.slane %v5692_v28, 2  ;;  %v5695_v21 = vrot.slane %v5694_v35, 2  ;;  %v5703_v58 = vld [vmem:[#allocation92_spill] sm:$0xff]  ;;  %v5711_v3 = vld [vmem:[#allocation99_spill] sm:$0xff]  ;;  %v5713_v35 = vld [vmem:[#allocation18_spill] sm:$0xff] }
 0x1e0   : > { %v2508_v30 = vsel %vm602_vm6, %v5691_v39, %v2507_v11  ;;  %v1178_v41 = vadd.f32 %v1160_v19, %v1143_v54  ;;  %v5697_v42 = vrot.slane %v5696_v50, 1  ;;  %v5698_v43 = vrot.slane %v4404_v17, 1  ;;  %v5712_v19 = vld [vmem:[#allocation52_spill] sm:$0xff] }
 0x1e1   : > { %v2110_v0 = vsel %vm436_vm2, %v5695_v21, %v5693_v8  ;;  %v1144_v40 = vadd.f32 %v5701_v59, %v5700_v27  ;;  %v5704_v11 = vrot.slane %v5703_v58, 2  ;;  %v5705_v54 = vrot.slane %v4406_v9, 2  ;;  %v5714_v21 = vld [vmem:[#allocation34_spill] sm:$0xff]  ;;  %v5717_v27 = vld [vmem:[#allocation40_spill] sm:$0xff] }
 0x1e2   : > { %v2299_v7 = vsel %vm394_vm1, %v5698_v43, %v5697_v42  ;;  %v2128_v20 = vadd.f32 %v2110_v0, %v5699_v31  ;;  %v5706_v10 = vrot.slane %v4552_v29, 7  ;;  %v5708_v56 = vrot.slane %v5707_v24, 2 }
 0x1e3   : > { %v2315_v55 = vadd.f32 %v2299_v7, %v5702_v34  ;;  %v2340_v63 = vsel %vm436_vm2, %v5705_v54, %v5704_v11  ;;  %v5710_v47 = vrot.slane %v5709_v13, 2  ;;  %v2555_v49 = vadd.f32 %v2547_v52, %v4248_v45  ;;  %v5720_v52 = vld [vmem:[#allocation101_spill] sm:$0xff] }
 0x1e4   : > { %v2537_v17 = vsel %vm632_vm7, %v5706_v10, %v5395_v62  ;;  %v2490_v57 = vadd.f32 %v5711_v3, %v2445_v60  ;;  %v2523_v46 = vadd.f32 %v2508_v30, %v2494_v12  ;;  %v2617_v8 = vmul.f32 %v1178_v41, %v1178_v41  ;;  %v5724_v3 = vld [vmem:[#allocation10_spill] sm:$0xff] }
 0x1e5   : > { %v1635_v51 = vsel %vm436_vm2, %v5710_v47, %v5708_v56  ;;  %v677_v0 = vadd.f32 %v5714_v21, %v5713_v35  ;;  %v5715_v42 = vrot.slane %v5702_v34, 2  ;;  %v5716_v43 = vrot.slane %v4251_v2, 2  ;;  %v5721_v56 = vld [vmem:[#allocation94_spill] sm:$0xff] }
 0x1e6   : > { %v1653_v39 = vadd.f32 %v1635_v51, %v5712_v19  ;;  %v5718_v59 = vrot.slane %v5717_v27, 2  ;;  %v5719_v11 = vrot.slane %v5687_v26, 2  ;;  %v2356_v60 = vadd.f32 %v2340_v63, %v2315_v55  ;;  %v5726_v26 = vld [vmem:[#allocation17_spill] sm:$0xff]  ;;  %v5728_v63 = vld [vmem:[#allocation88_spill] sm:$0xff] }
 0x1e7   : > { %v2585_v31 = vsel %vm436_vm2, %v5716_v43, %v5715_v42  ;;  %v2519_v12 = vadd.f32 %v5720_v52, %v2490_v57  ;;  %v2610_v30 = vmul.f32 %v4783_v48, %v4783_v48  ;;  %v2638_v54 = vsub.f32 %v2128_v20, %v2617_v8 }
 0x1e8   : > { %v1162_v45 = vsel %vm436_vm2, %v5719_v11, %v5718_v59  ;;  %v5722_v13 = vrot.slane %v5721_v56, 7  ;;  %v5723_v2 = vrot.slane %v4256_v33, 7  ;;  %v2568_v51 = vadd.f32 %v2555_v49, %v2297_v36  ;;  %v5731_v59 = vld [vmem:[#allocation105_spill] sm:$0xff]  ;;  %v5732_v11 = vld [vmem:[#allocation30_spill] sm:$0xff] }
 0x1e9   : > { %v1179_v10 = vadd.f32 %v1162_v45, %v1144_v40  ;;  %v5725_v19 = vrot.slane %v5724_v3, 2  ;;  %v5727_v35 = vrot.slane %v5726_v26, 2  ;;  %v5729_v57 = vrot.slane %v5728_v63, 2  ;;  %v5733_v45 = vld [vmem:[#allocation29_spill] sm:$0xff] }
 0x1ea   : > { %v2529_v47 = vsel %vm632_vm7, %v5723_v2, %v5722_v13  ;;  %v5730_v21 = vrot.slane %v5692_v28, 2  ;;  %v2631_v42 = vsub.f32 %v1653_v39, %v2610_v30  ;;  %v627_v36 = vadd.f32 %v5733_v45, %v5732_v11  ;;  %v5734_v49 = vld [vmem:[#allocation49_spill] sm:$0xff]  ;;  %v5744_v11 = vld [vmem:[#allocation50_spill] sm:$0xff] }
 0x1eb   : > { %v695_v55 = vsel %vm436_vm2, %v5727_v35, %v5725_v19  ;;  %v2548_v40 = vadd.f32 %v2529_v47, %v2519_v12  ;;  %v5735_v52 = vrot.slane %v5734_v49, 2  ;;  %v5736_v13 = vrot.slane %v5707_v24, 2  ;;  %v5737_v19 = vld [vmem:[#allocation97_spill] sm:$0xff]  ;;  %v5740_v12 = vld [vmem:[#allocation11_spill] sm:$0xff] }
 0x1ec   : > { %v2112_v20 = vsel %vm436_vm2, %v5730_v21, %v5729_v57  ;;  %v712_v43 = vadd.f32 %v695_v55, %v677_v0  ;;  %v2401_v26 = vadd.f32 %v5737_v19, %v2356_v60  ;;  %v5738_v35 = vld [vmem:[#allocation13_spill] sm:$0xff]  ;;  %v5741_v39 = vrot.slane %v5740_v12, 7  ;;  %v5742_v55 = vld [vmem:[#allocation63_spill] sm:$0xff] }
 0x1ed   : > { %v2129_v33 = vadd.f32 %v2112_v20, %v5731_v59  ;;  %v1637_v2 = vsel %vm436_vm2, %v5736_v13, %v5735_v52  ;;  %v2556_v28 = vadd.f32 %v2548_v40, %v4406_v9  ;;  %v5739_v57 = vrot.slane %v5738_v35, 7  ;;  %v5743_v59 = vld [vmem:[#allocation51_spill] sm:$0xff]  ;;  %v5745_v13 = vld [vmem:[#allocation44_spill] sm:$0xff]  ;;  %v5747_v19 = vld [vmem:[#allocation41_spill] sm:$0xff] }
 0x1ee   : > { %v2701_v47 = vadd.f32 %v2638_v54, %v2631_v42  ;;  %v1654_v21 = vadd.f32 %v1637_v2, %v5742_v55  ;;  %v2618_v20 = vmul.f32 %v1179_v10, %v1179_v10  ;;  %v1095_v45 = vadd.f32 %v5744_v11, %v5743_v59  ;;  %v5749_v2 = vld [vmem:[#allocation98_spill] sm:$0xff] }
 0x1ef   : > { %v639_v0 = vsel %vm632_vm7, %v5741_v39, %v5739_v57  ;;  %v2495_v24 = vadd.f32 %v2481_v38, %v2450_v22  ;;  %v2603_v1 = vadd.f32 %v2585_v31, %v2568_v51  ;;  %v2687_v52 = vadd.f32 %v2617_v8, %v2610_v30  ;;  %v5750_v38 = vld [vmem:[#allocation116_spill] sm:$0xff]  ;;  %v5751_v30 = vld [vmem:[#allocation43_spill] sm:$0xff] }
 0x1f0   : > { %v5746_v60 = vrot.slane %v5745_v13, 7  ;;  %v5748_v9 = vrot.slane %v5747_v19, 7  ;;  %v2611_v25 = vmul.f32 %v712_v43, %v712_v43  ;;  %v2639_v12 = vsub.f32 %v2129_v33, %v2618_v20  ;;  %v5764_v19 = vld [vmem:[#allocation58_spill] sm:$0xff] }
 0x1f1   : > { %v657_v62 = vadd.f32 %v639_v0, %v627_v36  ;;  %v2552_v54 = vadd.f32 %v2537_v17, %v2523_v46  ;;  %v2624_v42 = vmul.f32 %v1178_v41, %v4783_v48  ;;  %v2446_v39 = vadd.f32 %v5749_v2, %v2401_v26  ;;  %v5752_v36 = vld [vmem:[#allocation117_spill] sm:$0xff] }
 0x1f2   : > { %v1106_v40 = vsel %vm632_vm7, %v5748_v9, %v5746_v60  ;;  %v2569_v55 = vadd.f32 %v2556_v28, %v2299_v7  ;;  %v4949_v22 = vadd.f32 %v5750_v38, %v4843_v18  ;;  %v2708_v8 = vadd.f32 0.0009, %v2701_v47  ;;  %v5755_v18 = vld [vmem:[#allocation90_spill] sm:$0xff]  ;;  %v5768_v38 = vld [vmem:[#allocation64_spill] sm:$0xff] }
 0x1f3   : > { %v1124_v57 = vadd.f32 %v1106_v40, %v1095_v45  ;;  %v2632_v31 = vsub.f32 %v1654_v21, %v2611_v25  ;;  %v4953_v59 = vadd.f32 %v4826_v44, %v2098_v23  ;;  %v4955_v33 = vadd.f32 %v2510_v53, %v2495_v24  ;;  %v5758_v44 = vld [vmem:[#allocation12_spill] sm:$0xff] }
 0x1f4   : > { %v5753_v17 = vrot.slane %v5752_v36, 7  ;;  %v5754_v48 = vrot.slane %v4732_v14, 7  ;;  %v2645_v7 = vsub.f32 %v2603_v1, %v2624_v42  ;;  %v2694_v46 = vadd.f32 0.0001, %v2687_v52  ;;  %v5759_v53 = vld [vmem:[#allocation120_spill] sm:$0xff] }
 0x1f5   : > { %v1132_v51 = vadd.f32 %v1124_v57, %v5751_v30  ;;  %v5756_v26 = vrot.slane %v5755_v18, 2  ;;  %v5757_v28 = vrot.slane %v5702_v34, 2  ;;  %v2702_v47 = vadd.f32 %v2639_v12, %v2632_v31  ;;  %v5760_v45 = vld [vmem:[#allocation104_spill] sm:$0xff]  ;;  %v5766_v12 = vld [vmem:[#allocation14_spill] sm:$0xff] }
 0x1f6   : > { %v4962_v41 = vsel %vm632_vm7, %v5754_v48, %v5753_v17  ;;  %v665_v23 = vadd.f32 %v657_v62, %v5758_v44  ;;  %v4971_v21 = vadd.f32 %v2552_v54, %v5759_v53  ;;  %v5761_v14 = vrot.slane %v5760_v45, 1  ;;  %v5763_v52 = vld [vmem:[#allocation100_spill] sm:$0xff] }
 0x1f7   : > { %v2587_v0 = vsel %vm436_vm2, %v5757_v28, %v5756_v26  ;;  %v5762_v24 = vrot.slane %v5696_v50, 1  ;;  %v2491_v13 = vadd.f32 %v5763_v52, %v2446_v39  ;;  %v2652_v60 = vmul.f32 2.0, %v2624_v42  ;;  %v5765_v40 = vld [vmem:[#allocation20_spill] sm:$0xff]  ;;  %v5769_v50 = vld [vmem:[#allocation15_spill] sm:$0xff]  ;;  %v5777_v26 = vld [vmem:[#allocation6_spill] sm:$0xff] }
 0x1f8   : > { %v2604_v11 = vadd.f32 %v2587_v0, %v2569_v55  ;;  %v2715_v34 = vmul.f32 %v2708_v8, %v2694_v46  ;;  %v1145_v9 = vadd.f32 %v1132_v51, %v5764_v19  ;;  %v629_v62 = vadd.f32 %v5766_v12, %v5765_v40  ;;  %v5767_v55 = vld [vmem:[#allocation65_spill] sm:$0xff]  ;;  %v5770_v17 = vld [vmem:[#allocation60_spill] sm:$0xff]  ;;  %v5773_v46 = vld [vmem:[#allocation106_spill] sm:$0xff] }
 0x1f9   : > { %v4978_v1 = vsel %vm394_vm1, %v5762_v24, %v5761_v14  ;;  %v2666_v57 = vmul.f32 2.0, %v2645_v7  ;;  %v2625_v54 = vmul.f32 %v1179_v10, %v712_v43  ;;  %v2688_v2 = vadd.f32 %v2618_v20, %v2611_v25  ;;  %v5776_v43 = vld [vmem:[#allocation102_spill] sm:$0xff]  ;;  %v5779_v0 = vld [vmem:[#allocation8_spill] sm:$0xff]  ;;  %v5784_v24 = vld [vmem:[#allocation57_spill] sm:$0xff] }
 0x1fa   : > { %v1097_v31 = vadd.f32 %v5768_v38, %v5767_v55  ;;  %v2709_v30 = vadd.f32 0.0009, %v2702_v47  ;;  %v678_v36 = vadd.f32 %v665_v23, %v5769_v50  ;;  %v5771_v48 = vrot.slane %v5770_v17, 2  ;;  %v5781_v23 = vld [vmem:[#allocation93_spill] sm:$0xff]  ;;  %v5786_v19 = vld [vmem:[#allocation56_spill] sm:$0xff] }
 0x1fb   : > { %v5772_v39 = vrot.slane %v5717_v27, 2  ;;  %v2316_v8 = vadd.f32 %v4978_v1, %v5755_v18  ;;  %v2646_v51 = vsub.f32 %v2604_v11, %v2625_v54  ;;  %v5774_v7 = vrot.slane %v5773_v46, 2  ;;  %v5788_v38 = vld [vmem:[#allocation9_spill] sm:$0xff] }
 0x1fc   : > { %v5775_v25 = vrot.slane %v5703_v58, 2  ;;  %v2520_v20 = vadd.f32 %v5776_v43, %v2491_v13  ;;  %v5778_v28 = vrot.slane %v5777_v26, 7  ;;  %v5780_v47 = vrot.slane %v5779_v0, 7  ;;  %v5791_v26 = vld [vmem:[#allocation53_spill] sm:$0xff] }
 0x1fd   : > { %v1164_v42 = vsel %vm436_vm2, %v5772_v39, %v5771_v48  ;;  %v5782_v53 = vrot.slane %v5781_v23, 7  ;;  %v5783_v45 = vrot.slane %v5721_v56, 7  ;;  %v5785_v52 = vrot.slane %v5784_v24, 7 }
 0x1fe   : > { %v2342_v10 = vsel %vm436_vm2, %v5775_v25, %v5774_v7  ;;  %v643_v27 = vsel %vm632_vm7, %v5780_v47, %v5778_v28  ;;  %v1180_v44 = vadd.f32 %v1164_v42, %v1145_v9  ;;  %v5787_v40 = vrot.slane %v5786_v19, 7  ;;  %v5802_v19 = vld [vmem:[#allocation28_spill] sm:$0xff] }
 0x1ff   : > { %v2531_v11 = vsel %vm632_vm7, %v5783_v45, %v5782_v53  ;;  %v659_v14 = vadd.f32 %v643_v27, %v629_v62  ;;  %v2673_v12 = vadd.f32 0.0009, %v2666_v57  ;;  %v2653_v55 = vmul.f32 2.0, %v2625_v54  ;;  %v5792_v27 = vld [vmem:[#allocation103_spill] sm:$0xff]  ;;  %v5795_v45 = vld [vmem:[#allocation5_spill] sm:$0xff] }
 0x200   : > { %v1110_v13 = vsel %vm632_vm7, %v5787_v40, %v5785_v52  ;;  %v5789_v50 = vrot.slane %v5788_v38, 2  ;;  %v5790_v48 = vrot.slane %v5724_v3, 2  ;;  %v2659_v42 = vadd.f32 0.0001, %v2652_v60  ;;  %v5803_v40 = vld [vmem:[#allocation21_spill] sm:$0xff] }
 0x201   : > { %v1126_v39 = vadd.f32 %v1110_v13, %v1097_v31  ;;  %v2695_v56 = vadd.f32 0.0001, %v2688_v2  ;;  %v2357_v25 = vadd.f32 %v2342_v10, %v2316_v8  ;;  %3062 = vrcp.f32 %v2715_v34  ;;  %v5796_v2 = vld [vmem:[#allocation61_spill] sm:$0xff]  ;;  %v5800_v10 = vld [vmem:[#allocation111_spill] sm:$0xff] }
 0x202   : > { %v697_v9 = vsel %vm436_vm2, %v5790_v48, %v5789_v50  ;;  %v2667_v62 = vmul.f32 2.0, %v2646_v51  ;;  %v2549_v43 = vadd.f32 %v2531_v11, %v2520_v20  ;;  %v5793_v57 = vrot.slane %v5792_v27, 2  ;;  %v5799_v51 = vld [vmem:[#allocation2_spill] sm:$0xff] }
 0x203   : > { %v713_v7 = vadd.f32 %v697_v9, %v678_v36  ;;  %v1134_v28 = vadd.f32 %v1126_v39, %v5791_v26  ;;  %v2716_v47 = vmul.f32 %v2709_v30, %v2695_v56  ;;  %v5794_v54 = vrot.slane %v5728_v63, 2  ;;  %v5801_v63 = vld [vmem:[#allocation73_spill] sm:$0xff]  ;;  %v5808_v26 = vld [vmem:[#allocation108_spill] sm:$0xff] }
 0x204   : > { %v2619_v3 = vmul.f32 %v1180_v44, %v1180_v44  ;;  %v667_v24 = vadd.f32 %v659_v14, %v5795_v45  ;;  %v5027_v31 = vmul.f32 %v2673_v12, %v2659_v42  ;;  %v2660_v60 = vadd.f32 0.0001, %v2653_v55  ;;  %v5804_v12 = vld [vmem:[#allocation68_spill] sm:$0xff]  ;;  %v5807_v42 = vld [vmem:[#allocation22_spill] sm:$0xff]  ;;  %v5815_v45 = vld [vmem:[#allocation75_spill] sm:$0xff] }
 0x205   : > { %v2114_v53 = vsel %vm436_vm2, %v5794_v54, %v5793_v57  ;;  %v5797_v36 = vrot.slane %v5796_v2, 2  ;;  %v5798_v34 = vrot.slane %v5734_v49, 2  ;;  %v2402_v20 = vadd.f32 %v5800_v10, %v2357_v25 }
 0x206   : > { %v2130_v30 = vadd.f32 %v2114_v53, %v5799_v51  ;;  %v2612_v11 = vmul.f32 %v713_v7, %v713_v7  ;;  %v1147_v52 = vadd.f32 %v1134_v28, %v5801_v63  ;;  %v628_v13 = vadd.f32 %v5803_v40, %v5802_v19  ;;  %v5811_v53 = vld [vmem:[#allocation23_spill] sm:$0xff] }
 0x207   : > { %v1639_v8 = vsel %vm436_vm2, %v5798_v34, %v5797_v36  ;;  %v2674_v14 = vadd.f32 0.0009, %v2667_v62  ;;  %v2557_v55 = vadd.f32 %v2549_v43, %v5703_v58  ;;  %v5805_v48 = vrot.slane %v5779_v0, 7  ;;  %v5813_v43 = vld [vmem:[#allocation3_spill] sm:$0xff] }
 0x208   : > { %v1655_v50 = vadd.f32 %v1639_v8, %v5804_v12  ;;  %v5806_v49 = vrot.slane %v5738_v35, 7  ;;  %3064 = vrcp.f32 %v2716_v47  ;;  %v2689_v39 = vadd.f32 %v2619_v3, %v2612_v11  ;;  %v5817_v47 = vld [vmem:[#allocation55_spill] sm:$0xff]  ;;  %v5819_v8 = vld [vmem:[#allocation112_spill] sm:$0xff] }
 0x209   : > { %v680_v56 = vadd.f32 %v667_v24, %v5807_v42  ;;  %v5809_v28 = vrot.slane %v5808_v26, 2  ;;  %v5810_v57 = vrot.slane %v5755_v18, 2  ;;  %v2640_v54 = vsub.f32 %v2130_v30, %v2619_v3  ;;  %v5820_v18 = vld [vmem:[#allocation4_spill] sm:$0xff]  ;;  %v5821_v19 = vld [vmem:[#allocation59_spill] sm:$0xff] }
 0x20a   : > { %v641_v9 = vsel %vm632_vm7, %v5806_v49, %v5805_v48  ;;  %v5812_v58 = vrot.slane %v5811_v53, 2  ;;  %v5814_v0 = vrot.slane %v5813_v43, 2  ;;  %v5816_v36 = vrot.slane %v5815_v45, 2  ;;  %v5822_v3 = vld [vmem:[#allocation67_spill] sm:$0xff] }
 0x20b   : > { %v658_v25 = vadd.f32 %v641_v9, %v628_v13  ;;  %v2589_v62 = vsel %vm436_vm2, %v5810_v57, %v5809_v28  ;;  %v5818_v34 = vrot.slane %v5817_v47, 2  ;;  %v2447_v51 = vadd.f32 %v5819_v8, %v2402_v20  ;;  %v5823_v42 = vld [vmem:[#allocation7_spill] sm:$0xff] }
 0x20c   : > { %v701_v35 = vsel %vm436_vm2, %v5814_v0, %v5812_v58  ;;  %v1146_v30 = vadd.f32 %v5822_v3, %v5821_v19  ;;  %v5068_v40 = vmul.f32 %v2674_v14, %v2660_v60  ;;  %v2570_v13 = vadd.f32 %v2557_v55, %v4978_v1  ;;  %v5826_v58 = vld [vmem:[#allocation76_spill] sm:$0xff]  ;;  %v5828_v14 = vld [vmem:[#allocation62_spill] sm:$0xff]  ;;  %v5832_v55 = vld [vmem:[#allocation83_spill] sm:$0xff] }
 0x20d   : > { %v1168_v24 = vsel %vm436_vm2, %v5818_v34, %v5816_v36  ;;  %v666_v63 = vadd.f32 %v658_v25, %v5820_v18  ;;  %v5071_v12 = vmul.f32 %v1180_v44, %v713_v7  ;;  %v2633_v48 = vsub.f32 %v1655_v50, %v2612_v11  ;;  %v5838_v18 = vld [vmem:[#allocation113_spill] sm:$0xff]  ;;  %v5839_v3 = vld [vmem:[#allocation119_spill] sm:$0xff] }
 0x20e   : > { %v5063_v10 = vadd.f32 %v1168_v24, %v1147_v52  ;;  %v2696_v49 = vadd.f32 0.0001, %v2689_v39  ;;  %v5073_v9 = vadd.f32 %v701_v35, %v680_v56  ;;  %v5824_v20 = vmov %v5818_v34  ;;  %v5108_v19 = vpop.eup %3062 }
 0x20f   : > { %v679_v28 = vadd.f32 %v666_v63, %v5823_v42  ;;  %v5825_v52 = vrot.slane %v5770_v17, 2  ;;  %v2703_v57 = vadd.f32 %v2640_v54, %v2633_v48  ;;  %v5827_v60 = vrot.slane %v5826_v58, 2 }
 0x210   : > { %v5829_v0 = vrot.slane %v5828_v14, 2  ;;  %v5830_v44 = vrot.slane %v5813_v43, 2  ;;  %v5831_v7 = vrot.slane %v5788_v38, 2  ;;  %v2621_v17 = vmul.f32 %v5063_v10, %v5063_v10  ;;  %v5835_v43 = vld [vmem:[#allocation80_spill] sm:$0xff] }
 0x211   : > { %v1166_v25 = vsel %vm436_vm2, %v5825_v52, %v5824_v20  ;;  %v5834_v35 = vrot.slane %v5796_v2, 2  ;;  %v2605_v47 = vadd.f32 %v2589_v62, %v2570_v13  ;;  %v5836_v38 = vrot.slane %v4477_v16, 2  ;;  %v5841_v13 = vld [vmem:[#allocation118_spill] sm:$0xff] }
 0x212   : > { %v1643_v1 = vsel %vm436_vm2, %v5829_v0, %v5827_v60  ;;  %v699_v11 = vsel %vm436_vm2, %v5831_v7, %v5830_v44  ;;  %v5091_v50 = vadd.f32 %v1166_v25, %v1146_v30  ;;  %v5833_v54 = vmov %v5829_v0  ;;  %v5840_v30 = vld [vmem:[#allocation115_spill] sm:$0xff]  ;;  %v5845_v52 = vld [vmem:[#allocation114_spill] sm:$0xff] }
 0x213   : > { %v1657_v39 = vadd.f32 %v1643_v1, %v5832_v55  ;;  %v714_v56 = vadd.f32 %v699_v11, %v679_v28  ;;  %v1641_v36 = vsel %vm436_vm2, %v5834_v35, %v5833_v54  ;;  %v5837_v24 = vrot.slane %v5792_v27, 2  ;;  %v5843_v28 = vld [vmem:[#allocation110_spill] sm:$0xff]  ;;  %v5848_v7 = vld [vmem:[#allocation35_spill] sm:$0xff] }
 0x214   : > { %v1656_v34 = vadd.f32 %v1641_v36, %v5835_v43  ;;  %v2492_v63 = vadd.f32 %v5838_v18, %v2447_v51  ;;  %v2522_v48 = vadd.f32 %v5840_v30, %v5839_v3  ;;  %v2614_v2 = vmul.f32 %v5073_v9, %v5073_v9  ;;  %v5850_v36 = vld [vmem:[#allocation16_spill] sm:$0xff]  ;;  %v5855_v3 = vld [vmem:[#allocation81_spill] sm:$0xff] }
 0x215   : > { %v2116_v8 = vsel %vm436_vm2, %v5837_v24, %v5836_v38  ;;  %v2642_v62 = vsub.f32 %v4845_v4, %v2621_v17  ;;  %v5842_v16 = vrot.slane %v4552_v29, 7  ;;  %v5844_v27 = vrot.slane %v5843_v28, 7  ;;  %v5849_v29 = vld [vmem:[#allocation32_spill] sm:$0xff]  ;;  %v3065_v30 = vpop.eup %3064 }
 0x216   : > { %v2131_v42 = vadd.f32 %v2116_v8, %v5841_v13  ;;  %v2521_v51 = vadd.f32 %v5845_v52, %v2492_v63  ;;  %v2613_v25 = vmul.f32 %v714_v56, %v714_v56  ;;  %v2620_v60 = vmul.f32 %v5091_v50, %v5091_v50  ;;  %v5852_v38 = vld [vmem:[#allocation24_spill] sm:$0xff]  ;;  %v5854_v63 = vld [vmem:[#allocation82_spill] sm:$0xff] }
 0x217   : > { %v2535_v20 = vsel %vm632_vm7, %v5844_v27, %v5842_v16  ;;  %v2710_v14 = vadd.f32 0.0009, %v2703_v57  ;;  %v2635_v0 = vsub.f32 %v1657_v39, %v2614_v2  ;;  %v5846_v1 = vmov %v5844_v27  ;;  %v5856_v27 = vld [vmem:[#allocation66_spill] sm:$0xff] }
 0x218   : > { %v5847_v4 = vrot.slane %v5781_v23, 7  ;;  %v631_v11 = vadd.f32 %v5849_v29, %v5848_v7  ;;  %v2634_v54 = vsub.f32 %v1656_v34, %v2613_v25  ;;  %v2641_v35 = vsub.f32 %v2131_v42, %v2620_v60  ;;  %v5858_v42 = vld [vmem:[#allocation70_spill] sm:$0xff] }
 0x219   : > { %v5851_v43 = vrot.slane %v5850_v36, 7  ;;  %v5853_v24 = vrot.slane %v5852_v38, 7  ;;  %v2551_v57 = vadd.f32 %v2535_v20, %v2522_v48  ;;  %v2705_v39 = vadd.f32 %v2642_v62, %v2635_v0  ;;  %v5860_v48 = vld [vmem:[#allocation25_spill] sm:$0xff]  ;;  %v5866_v36 = vld [vmem:[#allocation72_spill] sm:$0xff] }
 0x21a   : > { %v2533_v44 = vsel %vm632_vm7, %v5847_v4, %v5846_v1  ;;  %v1099_v23 = vadd.f32 %v5855_v3, %v5854_v63  ;;  %v2690_v16 = vadd.f32 %v2620_v60, %v2613_v25  ;;  %v2704_v28 = vadd.f32 %v2641_v35, %v2634_v54 }
 0x21b   : > { %v2550_v55 = vadd.f32 %v2533_v44, %v2521_v51  ;;  %v647_v8 = vsel %vm632_vm7, %v5853_v24, %v5851_v43  ;;  %v5857_v34 = vrot.slane %v5856_v27, 7  ;;  %v5859_v52 = vrot.slane %v5858_v42, 7  ;;  %v5861_v44 = vld [vmem:[#allocation109_spill] sm:$0xff] }
 0x21c   : > { %v661_v18 = vadd.f32 %v647_v8, %v631_v11  ;;  %v2647_v1 = vsub.f32 %v2605_v47, %v5071_v12  ;;  %v2717_v4 = vmul.f32 %v2710_v14, %v2696_v49  ;;  %v2691_v0 = vadd.f32 %v2621_v17, %v2614_v2  ;;  %v5862_v11 = vld [vmem:[#allocation86_spill] sm:$0xff]  ;;  %v5868_v17 = vld [vmem:[#allocation77_spill] sm:$0xff] }
 0x21d   : > { %v2558_v13 = vadd.f32 %v2550_v55, %v5773_v46  ;;  %v1114_v51 = vsel %vm632_vm7, %v5859_v52, %v5857_v34  ;;  %v2711_v29 = vadd.f32 0.0009, %v2704_v28  ;;  %v5863_v46 = vld [vmem:[#allocation79_spill] sm:$0xff]  ;;  %v2559_v60 = vadd.f32 %v2551_v57, %v4538_v61  ;;  %v5864_v55 = vld [vmem:[#allocation26_spill] sm:$0xff] }
 0x21e   : > { %v669_v62 = vadd.f32 %v5860_v48, %v661_v18  ;;  %v1128_v20 = vadd.f32 %v1114_v51, %v1099_v23  ;;  %v1611_v25 = vadd.f32 %v5863_v46, %v5862_v11  ;;  %v5865_v54 = vrot.slane %v5864_v55, 1  ;;  %v5870_v61 = vld [vmem:[#allocation107_spill] sm:$0xff]  ;;  %v5879_v52 = vld [vmem:[#allocation78_spill] sm:$0xff] }
 0x21f   : > { %v2571_v7 = vadd.f32 %v2558_v13, %v5861_v44  ;;  %v5867_v49 = vrot.slane %v4689_v32, 1  ;;  %v2712_v14 = vadd.f32 0.0009, %v2705_v39  ;;  %v2697_v38 = vadd.f32 0.0001, %v2690_v16  ;;  %v5873_v23 = vld [vmem:[#allocation27_spill] sm:$0xff] }
 0x220   : > { %v682_v35 = vadd.f32 %v5865_v54, %v669_v62  ;;  %v1136_v43 = vadd.f32 %v5866_v36, %v1128_v20  ;;  %v5869_v2 = vrot.slane %v5868_v17, 1  ;;  %v2553_v8 = vadd.f32 %v4962_v41, %v4955_v33  ;;  %v5877_v33 = vld [vmem:[#allocation74_spill] sm:$0xff] }
 0x221   : > { %v2099_v47 = vadd.f32 %v5867_v49, %v4949_v22  ;;  %v2654_v18 = vmul.f32 2.0, %v5071_v12  ;;  %v5871_v57 = vrot.slane %v5870_v61, 2  ;;  %v5872_v63 = vrot.slane %v5808_v26, 2  ;;  %v5875_v22 = vld [vmem:[#allocation71_spill] sm:$0xff]  ;;  %v5882_v20 = vld [vmem:[#allocation122_spill] sm:$0xff] }
 0x222   : > { %v1624_v24 = vadd.f32 %v5869_v2, %v1611_v25  ;;  %v5874_v13 = vrot.slane %v5873_v23, 2  ;;  %v5876_v39 = vrot.slane %v5875_v22, 1  ;;  %v2668_v28 = vmul.f32 2.0, %v2647_v1  ;;  %v5883_v25 = vld [vmem:[#allocation121_spill] sm:$0xff] }
 0x223   : > { %v2591_v3 = vsel %vm436_vm2, %v5872_v63, %v5871_v57  ;;  %v2698_v27 = vadd.f32 0.0001, %v2691_v0  ;;  %v2718_v42 = vmul.f32 %v2711_v29, %v2697_v38  ;;  %3066 = vrcp.f32 %v2717_v4  ;;  %v5885_v29 = vld [vmem:[#allocation19_spill] sm:$0xff]  ;;  %v2739_v57 = vpop.permute.xlu0 %2738 }
 0x224   : > { %v5168_v32 = vadd.f32 %v5874_v13, %v682_v35  ;;  %v1149_v16 = vadd.f32 %v5876_v39, %v1136_v43  ;;  %v2606_v34 = vadd.f32 %v2591_v3, %v2571_v7  ;;  %v5878_v41 = vrot.slane %v5877_v33, 2  ;;  %v5888_v43 = vld [vmem:[#allocation38_spill] sm:$0xff] }
 0x225   : > { %v5880_v51 = vrot.slane %v5879_v52, 2  ;;  %v5881_v48 = vrot.slane %v4698_v37, 2  ;;  %v2572_v44 = vadd.f32 %v2559_v60, %v5882_v20  ;;  %v2719_v11 = vmul.f32 %v2712_v14, %v2698_v27  ;;  %v5887_v37 = vld [vmem:[#allocation69_spill] sm:$0xff] }
 0x226   : > { %v1184_v12 = vadd.f32 %v5878_v41, %v1149_v16  ;;  %v2627_v46 = vmul.f32 %v5091_v50, %v714_v56  ;;  %v2561_v1 = vadd.f32 %v5883_v25, %v2553_v8  ;;  %v2616_v0 = vmul.f32 %v5168_v32, %v5168_v32  ;;  %v5889_v56 = vld [vmem:[#allocation85_spill] sm:$0xff] }
 0x227   : > { %v1659_v26 = vadd.f32 %v5880_v51, %v1624_v24  ;;  %v2134_v62 = vadd.f32 %v5881_v48, %v2099_v47  ;;  %v5884_v7 = vmov %v5865_v54  ;;  %v5886_v35 = vmov %v5876_v39 }
 0x228   : > { %v2623_v4 = vmul.f32 %v1184_v12, %v1184_v12  ;;  %v673_v54 = vsel %vm394_vm1, %v5885_v29, %v5884_v7  ;;  %v1140_v36 = vsel %vm394_vm1, %v5887_v37, %v5886_v35  ;;  %v2648_v60 = vsub.f32 %v2606_v34, %v2627_v46 }
 0x229   : > { %3068 = vrcp.f32 %v2718_v42  ;;  %v681_v50 = vadd.f32 %v673_v54, %v5888_v43  ;;  %v1148_v49 = vadd.f32 %v1140_v36, %v5889_v56  ;;  %v2637_v47 = vsub.f32 %v1659_v26, %v2616_v0 }
 0x22a   : > { %v2644_v14 = vsub.f32 %v2134_v62, %v2623_v4  ;;  %v5890_v38 = vmov %v5874_v13  ;;  %v5891_v55 = vrot.slane %v5811_v53, 2  ;;  %v5892_v2 = vmov %v5878_v41 }
 0x22b   : > { %v5893_v24 = vrot.slane %v5815_v45, 2  ;;  %v5894_v63 = vrot.slane %v4746_v6, 2  ;;  %v5895_v3 = vrot.slane %v5870_v61, 2  ;;  %v2693_v22 = vadd.f32 %v2623_v4, %v2616_v0  ;;  %v2744_v0 = vpop.permute.xlu0 %2743 }
 0x22c   : > { %v703_v17 = vsel %vm436_vm2, %v5891_v55, %v5890_v38  ;;  %v2725_v53 = vmul.f32 %v3065_v30, %v5068_v40  ;;  %v2661_v16 = vadd.f32 0.0001, %v2654_v18  ;;  %v2707_v34 = vadd.f32 %v2644_v14, %v2637_v47  ;;  %v5899_v40 = vld [vmem:[#allocation87_spill] sm:$0xff] }
 0x22d   : > { %v1170_v8 = vsel %vm436_vm2, %v5893_v24, %v5892_v2  ;;  %v2593_v13 = vsel %vm436_vm2, %v5895_v3, %v5894_v63  ;;  %v716_v39 = vadd.f32 %v703_v17, %v681_v50  ;;  %v2675_v42 = vadd.f32 0.0009, %v2668_v28 }
 0x22e   : > { %v1183_v23 = vadd.f32 %v1170_v8, %v1148_v49  ;;  %v2607_v27 = vadd.f32 %v2593_v13, %v2572_v44  ;;  %v2628_v45 = vmul.f32 %v5063_v10, %v5073_v9  ;;  %3070 = vrcp.f32 %v2719_v11 }
 0x22f   : > { %v5896_v33 = vmov %v5880_v51  ;;  %v5897_v41 = vrot.slane %v5826_v58, 2  ;;  %v2669_v51 = vmul.f32 2.0, %v2648_v60  ;;  %v5898_v26 = vrot.slane %v4765_v15, 1  ;;  %v5901_v58 = vld [vmem:[#allocation42_spill] sm:$0xff] }
 0x230   : > { %v2714_v62 = vadd.f32 0.0009, %v2707_v34  ;;  %v2700_v18 = vadd.f32 0.0001, %v2693_v22  ;;  %v2615_v9 = vmul.f32 %v716_v39, %v716_v39  ;;  %v2622_v20 = vmul.f32 %v1183_v23, %v1183_v23  ;;  %v3067_v35 = vpop.eup %3066 }
 0x231   : > { %v1645_v61 = vsel %vm436_vm2, %v5897_v41, %v5896_v33  ;;  %v2574_v48 = vadd.f32 %v5898_v26, %v2561_v1  ;;  %v5900_v28 = vmov %v5898_v26  ;;  %v2649_v52 = vsub.f32 %v2607_v27, %v2628_v45 }
 0x232   : > { %v1658_v30 = vadd.f32 %v1645_v61, %v5899_v40  ;;  %v2565_v10 = vsel %vm394_vm1, %v4728_v5, %v5900_v28  ;;  %v2655_v44 = vmul.f32 2.0, %v2627_v46  ;;  %v2594_v11 = vrot.slane %v5901_v58, 2 }
 0x233   : > { %v2573_v25 = vadd.f32 %v2565_v10, %v4971_v21  ;;  %v2721_v4 = vmul.f32 %v2714_v62, %v2700_v18  ;;  %v2643_v7 = vsub.f32 %v4953_v59, %v2622_v20  ;;  %v2692_v29 = vadd.f32 %v2622_v20, %v2615_v9 }
 0x234   : > { %v2636_v1 = vsub.f32 %v1658_v30, %v2615_v9  ;;  %v2723_v15 = vmul.f32 %v5108_v19, %v5027_v31  ;;  %v2772_v54 = vmul.f32 %v2744_v0, %v2725_v53  ;;  %v2682_v5 = vmul.f32 %v2675_v42, %v2661_v16  ;;  %v2749_v19 = vpop.permute.xlu1 %2748  ;;  %v2759_v30 = vpop.permute.xlu0 %2758 }
 0x235   : > { %v2676_v37 = vadd.f32 0.0009, %v2669_v51  ;;  %v2609_v36 = vadd.f32 %v2594_v11, %v2574_v48  ;;  %v2670_v46 = vmul.f32 2.0, %v2649_v52  ;;  %v2662_v43 = vadd.f32 0.0001, %v2655_v44 }
 0x236   : > { %v2706_v60 = vadd.f32 %v2643_v7, %v2636_v1  ;;  %v2630_v50 = vmul.f32 %v1184_v12, %v5168_v32  ;;  %v5902_v21 = vmov %v5894_v63  ;;  %3072 = vrcp.f32 %v2721_v4  ;;  %v3069_v14 = vpop.eup %3068 }
 0x237   : > { %v2595_v56 = vsel %vm436_vm2, %v5902_v21, %v2594_v11  ;;  %v2699_v49 = vadd.f32 0.0001, %v2692_v29  ;;  %v2771_v31 = vmul.f32 %v2739_v57, %v2723_v15  ;;  %v2727_v38 = vmul.f32 %v3067_v35, %v2682_v5 }
 0x238   : > { %v2608_v59 = vadd.f32 %v2595_v56, %v2573_v25  ;;  %v2713_v47 = vadd.f32 0.0009, %v2706_v60  ;;  %v2656_v55 = vmul.f32 2.0, %v2628_v45  ;;  %v2683_v17 = vmul.f32 %v2676_v37, %v2662_v43  ;;  %v2754_v27 = vpop.permute.xlu1 %2753  ;;  %v2769_v25 = vpop.permute.xlu0 %2768 }
 0x239   : > { %v2651_v2 = vsub.f32 %v2609_v36, %v2630_v50  ;;  %v2629_v24 = vmul.f32 %v1183_v23, %v716_v39  ;;  %v2780_v32 = vsel %vm2778_vm8, %v2772_v54, 0.0  ;;  %v2677_v12 = vadd.f32 0.0009, %v2670_v46 }
 0x23a   : > { %v2720_v8 = vmul.f32 %v2713_v47, %v2699_v49  ;;  %v2729_v6 = vmul.f32 %v3069_v14, %v2683_v17  ;;  %v2779_v13 = vsel %vm2778_vm8, %v2771_v31, 0.0  ;;  %v2773_v22 = vmul.f32 %v2749_v19, %v2727_v38 }
 0x23b   : > { %v2650_v63 = vsub.f32 %v2608_v59, %v2629_v24  ;;  %v3071_v3 = vpop.eup %3070  ;;  %v2663_v53 = vadd.f32 0.0001, %v2656_v55  ;;  %v2672_v16 = vmul.f32 2.0, %v2651_v2  ;;  %v2781_v57 = vadd.f32 %v2780_v32, %v2779_v13 }
 0x23c   : > { %3074 = vrcp.f32 %v2720_v8  ;;  %v2774_v42 = vmul.f32 %v2754_v27, %v2729_v6  ;;  %v2658_v45 = vmul.f32 2.0, %v2630_v50  ;;  %v2782_v39 = vsel %vm2778_vm8, %v2773_v22, 0.0  ;;  %v2764_v0 = vpop.permute.xlu1 %2763 }
 0x23d   : > { %v2684_v34 = vmul.f32 %v2677_v12, %v2663_v53  ;;  %v2671_v33 = vmul.f32 2.0, %v2650_v63  ;;  %v2679_v41 = vadd.f32 0.0009, %v2672_v16  ;;  %v2657_v61 = vmul.f32 2.0, %v2629_v24 }
 0x23e   : > { %v2783_v51 = vadd.f32 %v2782_v39, %v2781_v57  ;;  %v2784_v26 = vsel %vm2778_vm8, %v2774_v42, 0.0  ;;  %v2665_v48 = vadd.f32 0.0001, %v2658_v45 }
 0x23f   : > { %v2731_v23 = vmul.f32 %v3071_v3, %v2684_v34  ;;  %v2678_v62 = vadd.f32 0.0009, %v2671_v33  ;;  %v2664_v10 = vadd.f32 0.0001, %v2657_v61 }
 0x240   : > { %v2686_v28 = vmul.f32 %v2679_v41, %v2665_v48  ;;  %v2785_v9 = vadd.f32 %v2784_v26, %v2783_v51 }
 0x241   : > { %v2775_v18 = vmul.f32 %v2759_v30, %v2731_v23  ;;  %v2685_v52 = vmul.f32 %v2678_v62, %v2664_v10 }
 0x243   : > { %v3073_v40 = vpop.eup %3072  ;;  %v2786_v58 = vsel %vm2778_vm8, %v2775_v18, 0.0 }
 0x244   : > { %v2735_v20 = vmul.f32 %v3073_v40, %v2686_v28  ;;  %v2787_v4 = vadd.f32 %v2786_v58, %v2785_v9 }
 0x246   : > { %v2777_v1 = vmul.f32 %v2769_v25, %v2735_v20 }
 0x248   : > { %v2791_v54 = vsel %vm2790_vm9, %v2777_v1, 0.0 }
 0x249   : > { %v3075_v44 = vpop.eup %3074 }
 0x24a   : > { %v2733_v11 = vmul.f32 %v3075_v44, %v2685_v52 }
 0x24c   : > { %v2776_v7 = vmul.f32 %v2764_v0, %v2733_v11 }
 0x24e   : > { %v2788_v29 = vsel %vm2778_vm8, %v2776_v7, 0.0 }
 0x24f   : > { %v2789_v15 = vadd.f32 %v2788_v29, %v2787_v4 }
 0x251   : > { %v2792_v35 = vadd.f32 %v2791_v54, %v2789_v15 }
 0x253   : > { %2793 = vadd.xlane.f32.xlu1 %v2792_v35 }
 0x2dc   : > { %v2794_v5 = vpop.xlane.xlu1 %2793 }
 0x2dd   : > { %v2795_v37 = vrot.slane %v2794_v5, 4 }
 0x2df   : > { %v2796_v36 = vadd.f32 %v2795_v37, %v2794_v5 }
 0x2e1   : > { %v2797_v60 = vrot.slane %v2796_v36, 2 }
 0x2e3   : > { %v2798_v46 = vadd.f32 %v2797_v60, %v2796_v36 }
 0x2e5   : > { %v2799_v43 = vrot.slane %v2798_v46, 1 }
 0x2e7   : > { %v2800_v50 = vadd.f32 %v2799_v43, %v2798_v46 }
 0x2e9   : > { %3049 = vpush %v2800_v50 }
 0x31a   : > { %s3050_s22 = spop %3049 }
 0x31b   : > { %v2802_v21 = vstv %s3050_s22 }
 0x31c   : > { %2804 = vst.msk [vmem:[%s217_s21] sm:$0x1] %vm2803_vm10, %v2802_v21 }
 0x31d PF: > { %s14_s15 = sadd.s32 1, %s3082_s15  }
 0x31e   : > { %p11_p5 = scmp.ge.s32.totalorder %s14_s15, 4  }
 0x320   :  { %13 = sbr.rel (!%p11_p5) target bundleno = 1 (0x1), region = 69 }

</bundles_post_ra>
